<compile_context>
chip_gen: v6e
topology: v6e:2x2x1
jax: 0.10.0
libtpu: 0.0.40
codegen_flags: <defaults>
</compile_context>

<pallas_src>
import jax
import jax.numpy as jnp
from jax.experimental import pallas as pl
from jax.experimental.pallas import tpu as pltpu


def _pool_selectors(lout):
    """(Lp, Lout) 0/1 matrices selecting even/odd rows (max_pool1d kernel=2, stride=2, floor)."""
    lp = lout // 2
    row = jax.lax.broadcasted_iota(jnp.int32, (lp, lout), 0)
    col = jax.lax.broadcasted_iota(jnp.int32, (lp, lout), 1)
    return ((col == 2 * row).astype(jnp.float32),
            (col == 2 * row + 1).astype(jnp.float32))


def _fused_qhn_kernel(x_ref, c1w_ref, c1b_ref, c2w_ref, c2b_ref,
                      wih_ref, lstmb_ref, whhf_ref, whhb_ref,
                      w1_ref, b1_ref, w2_ref, b2_ref, bits_ref,
                      w3_ref, b3_ref, o_ref, feat_sc):
    B, Lin, _ = x_ref.shape
    K1, _, C1 = c1w_ref.shape
    K2, _, C2 = c2w_ref.shape
    L1 = Lin - K1 + 1            # conv1 output length
    P1 = L1 // 2                 # after pool1
    L2 = P1 - K2 + 1             # conv2 output length
    T = L2 // 2                  # after pool2  (LSTM "batch" size)
    H = whhf_ref.shape[0]        # LSTM hidden
    S = B                        # nn.LSTM(batch_first=False): dim0 (=B) is the sequence axis

    pe1, po1 = _pool_selectors(L1)
    pe2, po2 = _pool_selectors(L2)
    c1b = c1b_ref[...]
    c2b = c2b_ref[...]
    wih = wih_ref[...]           # (16, 8H) = [W_ih_fwd^T | W_ih_bwd^T]
    lstmb = lstmb_ref[...]       # (1, 8H)  = [b_ih_f+b_hh_f | b_ih_b+b_hh_b]

    # ---- conv1 -> relu -> pool -> conv2 -> relu -> pool -> hoisted LSTM input projection ----
    # Per example; B is tiny & static so this is a fully unrolled in-kernel loop (no grid
    # overhead, intermediates stay in vregs/VMEM, the two chains are independent and overlap).
    gx = [None] * S              # gx[s]: (T, 8H) input-gate pre-activations for seq step s
    for b in range(B):
        xb = x_ref[b]                                            # (Lin, 116)
        a1 = jnp.zeros((L1, C1), jnp.float32)
        for k in range(K1):                                      # conv = K shifted matmuls
            a1 = a1 + jnp.dot(xb[k:k + L1, :], c1w_ref[k],
                              preferred_element_type=jnp.float32)
        a1 = jnp.maximum(a1 + c1b, 0.0)                          # bias + ReLU, (L1, 6)
        p1 = jnp.maximum(jnp.dot(pe1, a1, preferred_element_type=jnp.float32),
                         jnp.dot(po1, a1, preferred_element_type=jnp.float32))  # (P1, 6)

        a2 = jnp.zeros((L2, C2), jnp.float32)
        for k in range(K2):
            a2 = a2 + jnp.dot(p1[k:k + L2, :], c2w_ref[k],
                              preferred_element_type=jnp.float32)
        a2 = jnp.maximum(a2 + c2b, 0.0)                          # (L2, 16)
        p2 = jnp.maximum(jnp.dot(pe2, a2, preferred_element_type=jnp.float32),
                         jnp.dot(po2, a2, preferred_element_type=jnp.float32))  # (T, 16)

        # Both directions' input projections in a single matmul (hoisted out of recurrence).
        gx[b] = jnp.dot(p2, wih, preferred_element_type=jnp.float32) + lstmb    # (T, 8H)

    # ---- bidirectional LSTM recurrence (input 16, hidden H) ----
    # Head consumes only out[:, T-1, :H] (forward) and out[:, 0, H:] (backward); LSTM batch
    # members are independent, so only batch members T-1 (fwd) and 0 (bwd) are propagated.
    whh_f = whhf_ref[...]
    whh_b = whhb_ref[...]

    def cell(g, c):
        i = jax.nn.sigmoid(g[:, 0 * H:1 * H])   # PyTorch gate order: i, f, g, o
        f = jax.nn.sigmoid(g[:, 1 * H:2 * H])
        gg = jnp.tanh(g[:, 2 * H:3 * H])
        o = jax.nn.sigmoid(g[:, 3 * H:4 * H])
        c_new = f * c + i * gg
        return o * jnp.tanh(c_new), c_new

    h_f = jnp.zeros((1, H), jnp.float32); c_f = jnp.zeros((1, H), jnp.float32)
    h_b = jnp.zeros((1, H), jnp.float32); c_b = jnp.zeros((1, H), jnp.float32)
    for s in range(S):                           # unrolled; fwd & bwd interleaved for overlap
        sb = S - 1 - s
        g_f = gx[s][T - 1:T, 0:4 * H] + jnp.dot(h_f, whh_f,
                                                preferred_element_type=jnp.float32)
        g_b = gx[sb][0:1, 4 * H:8 * H] + jnp.dot(h_b, whh_b,
                                                 preferred_element_type=jnp.float32)
        h_f, c_f = cell(g_f, c_f)
        h_b, c_b = cell(g_b, c_b)
        feat_sc[s:s + 1, 0:H] = h_f              # feat[s] = [h_fwd(seq=s,batch=T-1) | ...]
        feat_sc[sb:sb + 1, H:2 * H] = h_b        # ... | h_bwd(seq=sb,batch=0)]
    feat = feat_sc[...]                          # (B, 2H)

    # ---- head: fc1+ReLU -> fc2 -> tanh*pi/2 -> RY probabilities -> fc3 -> softmax ----
    h1 = jnp.maximum(
        jnp.dot(feat, w1_ref[...], preferred_element_type=jnp.float32) + b1_ref[...], 0.0)
    z = jnp.dot(h1, w2_ref[...], preferred_element_type=jnp.float32) + b2_ref[...]
    theta = jnp.tanh(z) * (jnp.pi / 2.0)         # torch.tanh(x) * ones_like(x) * pi/2

    # TODO(synk): the original Hybrid layer runs a qiskit aer_simulator circuit (100 shots,
    # optional CNOT). Here we compute the exact statevector probabilities of independent
    # RY(theta_q) rotations on |0> as a deterministic classical stand-in.
    p1q = jnp.sin(0.5 * theta) ** 2              # P(qubit q measures 1)
    p0q = 1.0 - p1q
    bits = bits_ref[...]                         # (nq, 2**nq); bits[q, j] = q-th bit of state j
    nq = bits.shape[0]
    probs = jnp.ones((B, bits.shape[1]), jnp.float32)
    for q in range(nq):
        bq = bits[q:q + 1, :]
        probs = probs * (p1q[:, q:q + 1] * bq + p0q[:, q:q + 1] * (1.0 - bq))

    logits = jnp.dot(probs, w3_ref[...], preferred_element_type=jnp.float32) + b3_ref[...]
    m = jnp.max(logits, axis=1, keepdims=True)   # stabilized softmax over dim 1
    e = jnp.exp(logits - m)
    o_ref[...] = e / jnp.sum(e, axis=1, keepdims=True)


@jax.jit
def simple_qhn_forward(x, params):
    """x: (B, 116, L) in the PyTorch NCW convention. Returns (B, 2) softmax probabilities."""
    x = jnp.transpose(x, (0, 2, 1)).astype(jnp.float32)         # NCW -> NWC once
    B = x.shape[0]
    H = params["lstm_whh_f"].shape[0]
    return pl.pallas_call(
        _fused_qhn_kernel,
        out_shape=jax.ShapeDtypeStruct((B, 2), jnp.float32),
        scratch_shapes=[pltpu.VMEM((B, 2 * H), jnp.float32)],   # feat accumulator
    )(x, params["conv1_w"], params["conv1_b"], params["conv2_w"], params["conv2_b"],
      params["lstm_wih"], params["lstm_b"], params["lstm_whh_f"], params["lstm_whh_b"],
      params["fc1_w"], params["fc1_b"], params["fc2_w"], params["fc2_b"],
      params["qubit_bits"], params["fc3_w"], params["fc3_b"])


# ----------------------------------------------------------------------------- #
# Parameter init (deterministic, synthetic), stored kernel-ready.                #
# Mapping from real PyTorch weights:                                             #
#   convN_w  = torch convN.weight.permute(2, 1, 0)         -> (K, Cin, Cout)     #
#   lstm_wih = [weight_ih_l0.T | weight_ih_l0_reverse.T]    -> (16, 8H)           #
#   lstm_b   = [b_ih_l0+b_hh_l0 | b_ih_l0_rev+b_hh_l0_rev]  -> (1, 8H)            #
#   lstm_whh_f/b = weight_hh_l0(.reverse).T                 -> (H, 4H)            #
#   fcN_w    = torch fcN.weight.T,  fcN_b = bias[None, :]                        #
# ----------------------------------------------------------------------------- #
def init_params(key, lstm_hidden=128, linear_out=64, n_qubits=4):
    ks = jax.random.split(key, 14)

    def rnd(k, shape, scale=0.1):
        return scale * jax.random.normal(k, shape, jnp.float32)

    H = lstm_hidden
    dim = 2 ** n_qubits
    # bits[q, j] = q-th bit of basis state j (little-endian)
    bits = ((jnp.arange(dim)[None, :] >> jnp.arange(n_qubits)[:, None]) & 1).astype(jnp.float32)
    return {
        "conv1_w": rnd(ks[0], (5, 116, 6)),  "conv1_b": rnd(ks[1], (1, 6)),
        "conv2_w": rnd(ks[2], (5, 6, 16)),   "conv2_b": rnd(ks[3], (1, 16)),
        "lstm_wih":   rnd(ks[4], (16, 8 * H)),
        "lstm_b":     rnd(ks[5], (1, 8 * H)),
        "lstm_whh_f": rnd(ks[6], (H, 4 * H)),
        "lstm_whh_b": rnd(ks[7], (H, 4 * H)),
        "fc1_w": rnd(ks[8], (2 * H, linear_out)),     "fc1_b": rnd(ks[9], (1, linear_out)),
        "fc2_w": rnd(ks[10], (linear_out, n_qubits)), "fc2_b": rnd(ks[11], (1, n_qubits)),
        "fc3_w": rnd(ks[12], (dim, 2)),               "fc3_b": rnd(ks[13], (1, 2)),
        "qubit_bits": bits,
    }


# Pure-JAX (non-Pallas) reference with identical semantics, for in-script self-checking.
def reference_forward(x, p):
    x = jnp.transpose(x, (0, 2, 1)).astype(jnp.float32)

    def conv_relu_pool(xin, w, bias):
        K = w.shape[0]
        Lout = xin.shape[1] - K + 1
        acc = sum(jnp.einsum("blc,cf->blf", xin[:, k:k + Lout, :], w[k]) for k in range(K))
        a = jax.nn.relu(acc + bias)
        Lp = Lout // 2
        return a[:, :2 * Lp, :].reshape(a.shape[0], Lp, 2, a.shape[2]).max(axis=2)

    y = conv_relu_pool(x, p["conv1_w"], p["conv1_b"])
    y = conv_relu_pool(y, p["conv2_w"], p["conv2_b"])            # (B, T, 16)
    S, T, _ = y.shape
    H = p["lstm_whh_f"].shape[0]
    wih, lb = p["lstm_wih"], p["lstm_b"]

    def run_dir(off, whh, seq):                                  # full-batch LSTM direction
        h = jnp.zeros((T, H)); c = jnp.zeros((T, H)); outs = []
        for xt in seq:
            g = xt @ wih[:, off:off + 4 * H] + lb[:, off:off + 4 * H] + h @ whh
            i = jax.nn.sigmoid(g[:, :H]); f = jax.nn.sigmoid(g[:, H:2 * H])
            gg = jnp.tanh(g[:, 2 * H:3 * H]); o = jax.nn.sigmoid(g[:, 3 * H:])
            c = f * c + i * gg
            h = o * jnp.tanh(c)
            outs.append(h)
        return outs

    of = run_dir(0, p["lstm_whh_f"], [y[s] for s in range(S)])
    ob = list(reversed(run_dir(4 * H, p["lstm_whh_b"], [y[s] for s in reversed(range(S))])))
    feat = jnp.stack([jnp.concatenate([of[s][T - 1], ob[s][0]]) for s in range(S)], axis=0)

    h1 = jax.nn.relu(feat @ p["fc1_w"] + p["fc1_b"])
    theta = jnp.tanh(h1 @ p["fc2_w"] + p["fc2_b"]) * (jnp.pi / 2.0)
    p1q = jnp.sin(0.5 * theta) ** 2
    bits = p["qubit_bits"]
    probs = jnp.prod(p1q[:, :, None] * bits[None] + (1.0 - p1q)[:, :, None] * (1.0 - bits[None]),
                     axis=1)
    logits = probs @ p["fc3_w"] + p["fc3_b"]
    return jax.nn.softmax(logits, axis=1)


if __name__ == "__main__":
    key = jax.random.PRNGKey(0)
    kx, kp = jax.random.split(key)
    B, C, L = 2, 116, 28                      # L=28 -> conv/pool chain gives T=4 LSTM batch rows
    x = jax.random.normal(kx, (B, C, L), dtype=jnp.float32)
    params = init_params(kp, lstm_hidden=128, linear_out=64, n_qubits=4)

    out = jax.block_until_ready(simple_qhn_forward(x, params))

    with jax.default_matmul_precision("highest"):
        ref = jax.block_until_ready(reference_forward(x, params))

    assert out.shape == (B, 2)
    assert bool(jnp.all(jnp.isfinite(out)))
    assert bool(jnp.allclose(jnp.sum(out, axis=1), 1.0, atol=1e-5))
    assert bool(jnp.allclose(out, ref, atol=1e-3, rtol=1e-3))
    print("KERNEL_OK")
</pallas_src>

<mosaic_0001>
module attributes {stable_mosaic.version = 11 : i64} {
  func.func @_fused_qhn_kernel(%arg0: memref<2x28x116xf32, #tpu.memory_space<vmem>>, %arg1: memref<5x116x6xf32, #tpu.memory_space<vmem>>, %arg2: memref<1x6xf32, #tpu.memory_space<vmem>>, %arg3: memref<5x6x16xf32, #tpu.memory_space<vmem>>, %arg4: memref<1x16xf32, #tpu.memory_space<vmem>>, %arg5: memref<16x1024xf32, #tpu.memory_space<vmem>>, %arg6: memref<1x1024xf32, #tpu.memory_space<vmem>>, %arg7: memref<128x512xf32, #tpu.memory_space<vmem>>, %arg8: memref<128x512xf32, #tpu.memory_space<vmem>>, %arg9: memref<256x64xf32, #tpu.memory_space<vmem>>, %arg10: memref<1x64xf32, #tpu.memory_space<vmem>>, %arg11: memref<64x4xf32, #tpu.memory_space<vmem>>, %arg12: memref<1x4xf32, #tpu.memory_space<vmem>>, %arg13: memref<4x16xf32, #tpu.memory_space<vmem>>, %arg14: memref<16x2xf32, #tpu.memory_space<vmem>>, %arg15: memref<1x2xf32, #tpu.memory_space<vmem>>, %arg16: memref<2x2xf32, #tpu.memory_space<vmem>>, %arg17: memref<2x256xf32, #tpu.memory_space<vmem>>) attributes {dimension_semantics = [], scalar_prefetch = 0 : i64, scratch_operands = 1 : i64, tpu.core_type = #tpu.core_type<tc>} {
    %0 = tpu.iota {dimensions = array<i32: 0>} : vector<12x24xi32>
    %1 = tpu.iota {dimensions = array<i32: 1>} : vector<12x24xi32>
    %c2_i32 = arith.constant 2 : i32
    %2 = vector.broadcast %c2_i32 : i32 to vector<12x24xi32>
    %3 = arith.muli %2, %0 : vector<12x24xi32>
    %4 = arith.cmpi eq, %1, %3 : vector<12x24xi32>
    %5 = arith.extui %4 : vector<12x24xi1> to vector<12x24xi32>
    %6 = arith.sitofp %5 : vector<12x24xi32> to vector<12x24xf32>
    %c2_i32_0 = arith.constant 2 : i32
    %7 = vector.broadcast %c2_i32_0 : i32 to vector<12x24xi32>
    %8 = arith.muli %7, %0 : vector<12x24xi32>
    %c1_i32 = arith.constant 1 : i32
    %9 = vector.broadcast %c1_i32 : i32 to vector<12x24xi32>
    %10 = arith.addi %8, %9 : vector<12x24xi32>
    %11 = arith.cmpi eq, %1, %10 : vector<12x24xi32>
    %12 = arith.extui %11 : vector<12x24xi1> to vector<12x24xi32>
    %13 = arith.sitofp %12 : vector<12x24xi32> to vector<12x24xf32>
    %14 = tpu.iota {dimensions = array<i32: 0>} : vector<4x8xi32>
    %15 = tpu.iota {dimensions = array<i32: 1>} : vector<4x8xi32>
    %c2_i32_1 = arith.constant 2 : i32
    %16 = vector.broadcast %c2_i32_1 : i32 to vector<4x8xi32>
    %17 = arith.muli %16, %14 : vector<4x8xi32>
    %18 = arith.cmpi eq, %15, %17 : vector<4x8xi32>
    %19 = arith.extui %18 : vector<4x8xi1> to vector<4x8xi32>
    %20 = arith.sitofp %19 : vector<4x8xi32> to vector<4x8xf32>
    %c2_i32_2 = arith.constant 2 : i32
    %21 = vector.broadcast %c2_i32_2 : i32 to vector<4x8xi32>
    %22 = arith.muli %21, %14 : vector<4x8xi32>
    %c1_i32_3 = arith.constant 1 : i32
    %23 = vector.broadcast %c1_i32_3 : i32 to vector<4x8xi32>
    %24 = arith.addi %22, %23 : vector<4x8xi32>
    %25 = arith.cmpi eq, %15, %24 : vector<4x8xi32>
    %26 = arith.extui %25 : vector<4x8xi1> to vector<4x8xi32>
    %27 = arith.sitofp %26 : vector<4x8xi32> to vector<4x8xf32>
    %c0 = arith.constant 0 : index
    %c0_4 = arith.constant 0 : index
    %28 = vector.load %arg2[%c0, %c0_4] : memref<1x6xf32, #tpu.memory_space<vmem>>, vector<1x6xf32>
    %c0_5 = arith.constant 0 : index
    %c0_6 = arith.constant 0 : index
    %29 = vector.load %arg4[%c0_5, %c0_6] : memref<1x16xf32, #tpu.memory_space<vmem>>, vector<1x16xf32>
    %c0_7 = arith.constant 0 : index
    %c0_8 = arith.constant 0 : index
    %30 = vector.load %arg5[%c0_7, %c0_8] : memref<16x1024xf32, #tpu.memory_space<vmem>>, vector<16x1024xf32>
    %c0_9 = arith.constant 0 : index
    %c0_10 = arith.constant 0 : index
    %31 = vector.load %arg6[%c0_9, %c0_10] : memref<1x1024xf32, #tpu.memory_space<vmem>>, vector<1x1024xf32>
    %c0_11 = arith.constant 0 : index
    %c0_12 = arith.constant 0 : index
    %c0_13 = arith.constant 0 : index
    %32 = vector.load %arg0[%c0_11, %c0_12, %c0_13] : memref<2x28x116xf32, #tpu.memory_space<vmem>>, vector<1x28x116xf32>
    %33 = vector.shape_cast %32 : vector<1x28x116xf32> to vector<28x116xf32>
    %cst = arith.constant 0.000000e+00 : f32
    %34 = vector.broadcast %cst : f32 to vector<24x6xf32>
    %35 = vector.extract_strided_slice %33 {offsets = [0, 0], sizes = [24, 116], strides = [1, 1]} : vector<28x116xf32> to vector<24x116xf32>
    %c0_14 = arith.constant 0 : index
    %c0_15 = arith.constant 0 : index
    %c0_16 = arith.constant 0 : index
    %36 = vector.load %arg1[%c0_14, %c0_15, %c0_16] : memref<5x116x6xf32, #tpu.memory_space<vmem>>, vector<1x116x6xf32>
    %37 = vector.shape_cast %36 : vector<1x116x6xf32> to vector<116x6xf32>
    %cst_17 = arith.constant dense<0.000000e+00> : vector<24x6xf32>
    %38 = tpu.matmul %35, %37, %cst_17 {dimension_numbers = #tpu.dot_dimension_numbers<[1], [0], [0], [1], [0, 0, 1, 1], [], []>} : vector<24x116xf32>, vector<116x6xf32>, vector<24x6xf32> -> vector<24x6xf32>
    %39 = arith.addf %34, %38 : vector<24x6xf32>
    %40 = vector.extract_strided_slice %33 {offsets = [1, 0], sizes = [24, 116], strides = [1, 1]} : vector<28x116xf32> to vector<24x116xf32>
    %c1 = arith.constant 1 : index
    %c0_18 = arith.constant 0 : index
    %c0_19 = arith.constant 0 : index
    %41 = vector.load %arg1[%c1, %c0_18, %c0_19] : memref<5x116x6xf32, #tpu.memory_space<vmem>>, vector<1x116x6xf32>
    %42 = vector.shape_cast %41 : vector<1x116x6xf32> to vector<116x6xf32>
    %cst_20 = arith.constant dense<0.000000e+00> : vector<24x6xf32>
    %43 = tpu.matmul %40, %42, %cst_20 {dimension_numbers = #tpu.dot_dimension_numbers<[1], [0], [0], [1], [0, 0, 1, 1], [], []>} : vector<24x116xf32>, vector<116x6xf32>, vector<24x6xf32> -> vector<24x6xf32>
    %44 = arith.addf %39, %43 : vector<24x6xf32>
    %45 = vector.extract_strided_slice %33 {offsets = [2, 0], sizes = [24, 116], strides = [1, 1]} : vector<28x116xf32> to vector<24x116xf32>
    %c2 = arith.constant 2 : index
    %c0_21 = arith.constant 0 : index
    %c0_22 = arith.constant 0 : index
    %46 = vector.load %arg1[%c2, %c0_21, %c0_22] : memref<5x116x6xf32, #tpu.memory_space<vmem>>, vector<1x116x6xf32>
    %47 = vector.shape_cast %46 : vector<1x116x6xf32> to vector<116x6xf32>
    %cst_23 = arith.constant dense<0.000000e+00> : vector<24x6xf32>
    %48 = tpu.matmul %45, %47, %cst_23 {dimension_numbers = #tpu.dot_dimension_numbers<[1], [0], [0], [1], [0, 0, 1, 1], [], []>} : vector<24x116xf32>, vector<116x6xf32>, vector<24x6xf32> -> vector<24x6xf32>
    %49 = arith.addf %44, %48 : vector<24x6xf32>
    %50 = vector.extract_strided_slice %33 {offsets = [3, 0], sizes = [24, 116], strides = [1, 1]} : vector<28x116xf32> to vector<24x116xf32>
    %c3 = arith.constant 3 : index
    %c0_24 = arith.constant 0 : index
    %c0_25 = arith.constant 0 : index
    %51 = vector.load %arg1[%c3, %c0_24, %c0_25] : memref<5x116x6xf32, #tpu.memory_space<vmem>>, vector<1x116x6xf32>
    %52 = vector.shape_cast %51 : vector<1x116x6xf32> to vector<116x6xf32>
    %cst_26 = arith.constant dense<0.000000e+00> : vector<24x6xf32>
    %53 = tpu.matmul %50, %52, %cst_26 {dimension_numbers = #tpu.dot_dimension_numbers<[1], [0], [0], [1], [0, 0, 1, 1], [], []>} : vector<24x116xf32>, vector<116x6xf32>, vector<24x6xf32> -> vector<24x6xf32>
    %54 = arith.addf %49, %53 : vector<24x6xf32>
    %55 = vector.extract_strided_slice %33 {offsets = [4, 0], sizes = [24, 116], strides = [1, 1]} : vector<28x116xf32> to vector<24x116xf32>
    %c4 = arith.constant 4 : index
    %c0_27 = arith.constant 0 : index
    %c0_28 = arith.constant 0 : index
    %56 = vector.load %arg1[%c4, %c0_27, %c0_28] : memref<5x116x6xf32, #tpu.memory_space<vmem>>, vector<1x116x6xf32>
    %57 = vector.shape_cast %56 : vector<1x116x6xf32> to vector<116x6xf32>
    %cst_29 = arith.constant dense<0.000000e+00> : vector<24x6xf32>
    %58 = tpu.matmul %55, %57, %cst_29 {dimension_numbers = #tpu.dot_dimension_numbers<[1], [0], [0], [1], [0, 0, 1, 1], [], []>} : vector<24x116xf32>, vector<116x6xf32>, vector<24x6xf32> -> vector<24x6xf32>
    %59 = arith.addf %54, %58 : vector<24x6xf32>
    %60 = vector.broadcast %28 : vector<1x6xf32> to vector<24x6xf32>
    %61 = arith.addf %59, %60 : vector<24x6xf32>
    %cst_30 = arith.constant 0.000000e+00 : f32
    %62 = vector.broadcast %cst_30 : f32 to vector<24x6xf32>
    %63 = arith.maximumf %61, %62 : vector<24x6xf32>
    %cst_31 = arith.constant dense<0.000000e+00> : vector<12x6xf32>
    %64 = tpu.matmul %6, %63, %cst_31 {dimension_numbers = #tpu.dot_dimension_numbers<[1], [0], [0], [1], [0, 0, 1, 1], [], []>} : vector<12x24xf32>, vector<24x6xf32>, vector<12x6xf32> -> vector<12x6xf32>
    %cst_32 = arith.constant dense<0.000000e+00> : vector<12x6xf32>
    %65 = tpu.matmul %13, %63, %cst_32 {dimension_numbers = #tpu.dot_dimension_numbers<[1], [0], [0], [1], [0, 0, 1, 1], [], []>} : vector<12x24xf32>, vector<24x6xf32>, vector<12x6xf32> -> vector<12x6xf32>
    %66 = arith.maximumf %64, %65 : vector<12x6xf32>
    %cst_33 = arith.constant 0.000000e+00 : f32
    %67 = vector.broadcast %cst_33 : f32 to vector<8x16xf32>
    %68 = vector.extract_strided_slice %66 {offsets = [0, 0], sizes = [8, 6], strides = [1, 1]} : vector<12x6xf32> to vector<8x6xf32>
    %c0_34 = arith.constant 0 : index
    %c0_35 = arith.constant 0 : index
    %c0_36 = arith.constant 0 : index
    %69 = vector.load %arg3[%c0_34, %c0_35, %c0_36] : memref<5x6x16xf32, #tpu.memory_space<vmem>>, vector<1x6x16xf32>
    %70 = vector.shape_cast %69 : vector<1x6x16xf32> to vector<6x16xf32>
    %cst_37 = arith.constant dense<0.000000e+00> : vector<8x16xf32>
    %71 = tpu.matmul %68, %70, %cst_37 {dimension_numbers = #tpu.dot_dimension_numbers<[1], [0], [0], [1], [0, 0, 1, 1], [], []>} : vector<8x6xf32>, vector<6x16xf32>, vector<8x16xf32> -> vector<8x16xf32>
    %72 = arith.addf %67, %71 : vector<8x16xf32>
    %73 = vector.extract_strided_slice %66 {offsets = [1, 0], sizes = [8, 6], strides = [1, 1]} : vector<12x6xf32> to vector<8x6xf32>
    %c1_38 = arith.constant 1 : index
    %c0_39 = arith.constant 0 : index
    %c0_40 = arith.constant 0 : index
    %74 = vector.load %arg3[%c1_38, %c0_39, %c0_40] : memref<5x6x16xf32, #tpu.memory_space<vmem>>, vector<1x6x16xf32>
    %75 = vector.shape_cast %74 : vector<1x6x16xf32> to vector<6x16xf32>
    %cst_41 = arith.constant dense<0.000000e+00> : vector<8x16xf32>
    %76 = tpu.matmul %73, %75, %cst_41 {dimension_numbers = #tpu.dot_dimension_numbers<[1], [0], [0], [1], [0, 0, 1, 1], [], []>} : vector<8x6xf32>, vector<6x16xf32>, vector<8x16xf32> -> vector<8x16xf32>
    %77 = arith.addf %72, %76 : vector<8x16xf32>
    %78 = vector.extract_strided_slice %66 {offsets = [2, 0], sizes = [8, 6], strides = [1, 1]} : vector<12x6xf32> to vector<8x6xf32>
    %c2_42 = arith.constant 2 : index
    %c0_43 = arith.constant 0 : index
    %c0_44 = arith.constant 0 : index
    %79 = vector.load %arg3[%c2_42, %c0_43, %c0_44] : memref<5x6x16xf32, #tpu.memory_space<vmem>>, vector<1x6x16xf32>
    %80 = vector.shape_cast %79 : vector<1x6x16xf32> to vector<6x16xf32>
    %cst_45 = arith.constant dense<0.000000e+00> : vector<8x16xf32>
    %81 = tpu.matmul %78, %80, %cst_45 {dimension_numbers = #tpu.dot_dimension_numbers<[1], [0], [0], [1], [0, 0, 1, 1], [], []>} : vector<8x6xf32>, vector<6x16xf32>, vector<8x16xf32> -> vector<8x16xf32>
    %82 = arith.addf %77, %81 : vector<8x16xf32>
    %83 = vector.extract_strided_slice %66 {offsets = [3, 0], sizes = [8, 6], strides = [1, 1]} : vector<12x6xf32> to vector<8x6xf32>
    %c3_46 = arith.constant 3 : index
    %c0_47 = arith.constant 0 : index
    %c0_48 = arith.constant 0 : index
    %84 = vector.load %arg3[%c3_46, %c0_47, %c0_48] : memref<5x6x16xf32, #tpu.memory_space<vmem>>, vector<1x6x16xf32>
    %85 = vector.shape_cast %84 : vector<1x6x16xf32> to vector<6x16xf32>
    %cst_49 = arith.constant dense<0.000000e+00> : vector<8x16xf32>
    %86 = tpu.matmul %83, %85, %cst_49 {dimension_numbers = #tpu.dot_dimension_numbers<[1], [0], [0], [1], [0, 0, 1, 1], [], []>} : vector<8x6xf32>, vector<6x16xf32>, vector<8x16xf32> -> vector<8x16xf32>
    %87 = arith.addf %82, %86 : vector<8x16xf32>
    %88 = vector.extract_strided_slice %66 {offsets = [4, 0], sizes = [8, 6], strides = [1, 1]} : vector<12x6xf32> to vector<8x6xf32>
    %c4_50 = arith.constant 4 : index
    %c0_51 = arith.constant 0 : index
    %c0_52 = arith.constant 0 : index
    %89 = vector.load %arg3[%c4_50, %c0_51, %c0_52] : memref<5x6x16xf32, #tpu.memory_space<vmem>>, vector<1x6x16xf32>
    %90 = vector.shape_cast %89 : vector<1x6x16xf32> to vector<6x16xf32>
    %cst_53 = arith.constant dense<0.000000e+00> : vector<8x16xf32>
    %91 = tpu.matmul %88, %90, %cst_53 {dimension_numbers = #tpu.dot_dimension_numbers<[1], [0], [0], [1], [0, 0, 1, 1], [], []>} : vector<8x6xf32>, vector<6x16xf32>, vector<8x16xf32> -> vector<8x16xf32>
    %92 = arith.addf %87, %91 : vector<8x16xf32>
    %93 = vector.broadcast %29 : vector<1x16xf32> to vector<8x16xf32>
    %94 = arith.addf %92, %93 : vector<8x16xf32>
    %cst_54 = arith.constant 0.000000e+00 : f32
    %95 = vector.broadcast %cst_54 : f32 to vector<8x16xf32>
    %96 = arith.maximumf %94, %95 : vector<8x16xf32>
    %cst_55 = arith.constant dense<0.000000e+00> : vector<4x16xf32>
    %97 = tpu.matmul %20, %96, %cst_55 {dimension_numbers = #tpu.dot_dimension_numbers<[1], [0], [0], [1], [0, 0, 1, 1], [], []>} : vector<4x8xf32>, vector<8x16xf32>, vector<4x16xf32> -> vector<4x16xf32>
    %cst_56 = arith.constant dense<0.000000e+00> : vector<4x16xf32>
    %98 = tpu.matmul %27, %96, %cst_56 {dimension_numbers = #tpu.dot_dimension_numbers<[1], [0], [0], [1], [0, 0, 1, 1], [], []>} : vector<4x8xf32>, vector<8x16xf32>, vector<4x16xf32> -> vector<4x16xf32>
    %99 = arith.maximumf %97, %98 : vector<4x16xf32>
    %cst_57 = arith.constant dense<0.000000e+00> : vector<4x1024xf32>
    %100 = tpu.matmul %99, %30, %cst_57 {dimension_numbers = #tpu.dot_dimension_numbers<[1], [0], [0], [1], [0, 0, 1, 1], [], []>} : vector<4x16xf32>, vector<16x1024xf32>, vector<4x1024xf32> -> vector<4x1024xf32>
    %101 = vector.broadcast %31 : vector<1x1024xf32> to vector<4x1024xf32>
    %102 = arith.addf %100, %101 : vector<4x1024xf32>
    %c1_58 = arith.constant 1 : index
    %c0_59 = arith.constant 0 : index
    %c0_60 = arith.constant 0 : index
    %103 = vector.load %arg0[%c1_58, %c0_59, %c0_60] : memref<2x28x116xf32, #tpu.memory_space<vmem>>, vector<1x28x116xf32>
    %104 = vector.shape_cast %103 : vector<1x28x116xf32> to vector<28x116xf32>
    %cst_61 = arith.constant 0.000000e+00 : f32
    %105 = vector.broadcast %cst_61 : f32 to vector<24x6xf32>
    %106 = vector.extract_strided_slice %104 {offsets = [0, 0], sizes = [24, 116], strides = [1, 1]} : vector<28x116xf32> to vector<24x116xf32>
    %c0_62 = arith.constant 0 : index
    %c0_63 = arith.constant 0 : index
    %c0_64 = arith.constant 0 : index
    %107 = vector.load %arg1[%c0_62, %c0_63, %c0_64] : memref<5x116x6xf32, #tpu.memory_space<vmem>>, vector<1x116x6xf32>
    %108 = vector.shape_cast %107 : vector<1x116x6xf32> to vector<116x6xf32>
    %cst_65 = arith.constant dense<0.000000e+00> : vector<24x6xf32>
    %109 = tpu.matmul %106, %108, %cst_65 {dimension_numbers = #tpu.dot_dimension_numbers<[1], [0], [0], [1], [0, 0, 1, 1], [], []>} : vector<24x116xf32>, vector<116x6xf32>, vector<24x6xf32> -> vector<24x6xf32>
    %110 = arith.addf %105, %109 : vector<24x6xf32>
    %111 = vector.extract_strided_slice %104 {offsets = [1, 0], sizes = [24, 116], strides = [1, 1]} : vector<28x116xf32> to vector<24x116xf32>
    %c1_66 = arith.constant 1 : index
    %c0_67 = arith.constant 0 : index
    %c0_68 = arith.constant 0 : index
    %112 = vector.load %arg1[%c1_66, %c0_67, %c0_68] : memref<5x116x6xf32, #tpu.memory_space<vmem>>, vector<1x116x6xf32>
    %113 = vector.shape_cast %112 : vector<1x116x6xf32> to vector<116x6xf32>
    %cst_69 = arith.constant dense<0.000000e+00> : vector<24x6xf32>
    %114 = tpu.matmul %111, %113, %cst_69 {dimension_numbers = #tpu.dot_dimension_numbers<[1], [0], [0], [1], [0, 0, 1, 1], [], []>} : vector<24x116xf32>, vector<116x6xf32>, vector<24x6xf32> -> vector<24x6xf32>
    %115 = arith.addf %110, %114 : vector<24x6xf32>
    %116 = vector.extract_strided_slice %104 {offsets = [2, 0], sizes = [24, 116], strides = [1, 1]} : vector<28x116xf32> to vector<24x116xf32>
    %c2_70 = arith.constant 2 : index
    %c0_71 = arith.constant 0 : index
    %c0_72 = arith.constant 0 : index
    %117 = vector.load %arg1[%c2_70, %c0_71, %c0_72] : memref<5x116x6xf32, #tpu.memory_space<vmem>>, vector<1x116x6xf32>
    %118 = vector.shape_cast %117 : vector<1x116x6xf32> to vector<116x6xf32>
    %cst_73 = arith.constant dense<0.000000e+00> : vector<24x6xf32>
    %119 = tpu.matmul %116, %118, %cst_73 {dimension_numbers = #tpu.dot_dimension_numbers<[1], [0], [0], [1], [0, 0, 1, 1], [], []>} : vector<24x116xf32>, vector<116x6xf32>, vector<24x6xf32> -> vector<24x6xf32>
    %120 = arith.addf %115, %119 : vector<24x6xf32>
    %121 = vector.extract_strided_slice %104 {offsets = [3, 0], sizes = [24, 116], strides = [1, 1]} : vector<28x116xf32> to vector<24x116xf32>
    %c3_74 = arith.constant 3 : index
    %c0_75 = arith.constant 0 : index
    %c0_76 = arith.constant 0 : index
    %122 = vector.load %arg1[%c3_74, %c0_75, %c0_76] : memref<5x116x6xf32, #tpu.memory_space<vmem>>, vector<1x116x6xf32>
    %123 = vector.shape_cast %122 : vector<1x116x6xf32> to vector<116x6xf32>
    %cst_77 = arith.constant dense<0.000000e+00> : vector<24x6xf32>
    %124 = tpu.matmul %121, %123, %cst_77 {dimension_numbers = #tpu.dot_dimension_numbers<[1], [0], [0], [1], [0, 0, 1, 1], [], []>} : vector<24x116xf32>, vector<116x6xf32>, vector<24x6xf32> -> vector<24x6xf32>
    %125 = arith.addf %120, %124 : vector<24x6xf32>
    %126 = vector.extract_strided_slice %104 {offsets = [4, 0], sizes = [24, 116], strides = [1, 1]} : vector<28x116xf32> to vector<24x116xf32>
    %c4_78 = arith.constant 4 : index
    %c0_79 = arith.constant 0 : index
    %c0_80 = arith.constant 0 : index
    %127 = vector.load %arg1[%c4_78, %c0_79, %c0_80] : memref<5x116x6xf32, #tpu.memory_space<vmem>>, vector<1x116x6xf32>
    %128 = vector.shape_cast %127 : vector<1x116x6xf32> to vector<116x6xf32>
    %cst_81 = arith.constant dense<0.000000e+00> : vector<24x6xf32>
    %129 = tpu.matmul %126, %128, %cst_81 {dimension_numbers = #tpu.dot_dimension_numbers<[1], [0], [0], [1], [0, 0, 1, 1], [], []>} : vector<24x116xf32>, vector<116x6xf32>, vector<24x6xf32> -> vector<24x6xf32>
    %130 = arith.addf %125, %129 : vector<24x6xf32>
    %131 = vector.broadcast %28 : vector<1x6xf32> to vector<24x6xf32>
    %132 = arith.addf %130, %131 : vector<24x6xf32>
    %cst_82 = arith.constant 0.000000e+00 : f32
    %133 = vector.broadcast %cst_82 : f32 to vector<24x6xf32>
    %134 = arith.maximumf %132, %133 : vector<24x6xf32>
    %cst_83 = arith.constant dense<0.000000e+00> : vector<12x6xf32>
    %135 = tpu.matmul %6, %134, %cst_83 {dimension_numbers = #tpu.dot_dimension_numbers<[1], [0], [0], [1], [0, 0, 1, 1], [], []>} : vector<12x24xf32>, vector<24x6xf32>, vector<12x6xf32> -> vector<12x6xf32>
    %cst_84 = arith.constant dense<0.000000e+00> : vector<12x6xf32>
    %136 = tpu.matmul %13, %134, %cst_84 {dimension_numbers = #tpu.dot_dimension_numbers<[1], [0], [0], [1], [0, 0, 1, 1], [], []>} : vector<12x24xf32>, vector<24x6xf32>, vector<12x6xf32> -> vector<12x6xf32>
    %137 = arith.maximumf %135, %136 : vector<12x6xf32>
    %cst_85 = arith.constant 0.000000e+00 : f32
    %138 = vector.broadcast %cst_85 : f32 to vector<8x16xf32>
    %139 = vector.extract_strided_slice %137 {offsets = [0, 0], sizes = [8, 6], strides = [1, 1]} : vector<12x6xf32> to vector<8x6xf32>
    %c0_86 = arith.constant 0 : index
    %c0_87 = arith.constant 0 : index
    %c0_88 = arith.constant 0 : index
    %140 = vector.load %arg3[%c0_86, %c0_87, %c0_88] : memref<5x6x16xf32, #tpu.memory_space<vmem>>, vector<1x6x16xf32>
    %141 = vector.shape_cast %140 : vector<1x6x16xf32> to vector<6x16xf32>
    %cst_89 = arith.constant dense<0.000000e+00> : vector<8x16xf32>
    %142 = tpu.matmul %139, %141, %cst_89 {dimension_numbers = #tpu.dot_dimension_numbers<[1], [0], [0], [1], [0, 0, 1, 1], [], []>} : vector<8x6xf32>, vector<6x16xf32>, vector<8x16xf32> -> vector<8x16xf32>
    %143 = arith.addf %138, %142 : vector<8x16xf32>
    %144 = vector.extract_strided_slice %137 {offsets = [1, 0], sizes = [8, 6], strides = [1, 1]} : vector<12x6xf32> to vector<8x6xf32>
    %c1_90 = arith.constant 1 : index
    %c0_91 = arith.constant 0 : index
    %c0_92 = arith.constant 0 : index
    %145 = vector.load %arg3[%c1_90, %c0_91, %c0_92] : memref<5x6x16xf32, #tpu.memory_space<vmem>>, vector<1x6x16xf32>
    %146 = vector.shape_cast %145 : vector<1x6x16xf32> to vector<6x16xf32>
    %cst_93 = arith.constant dense<0.000000e+00> : vector<8x16xf32>
    %147 = tpu.matmul %144, %146, %cst_93 {dimension_numbers = #tpu.dot_dimension_numbers<[1], [0], [0], [1], [0, 0, 1, 1], [], []>} : vector<8x6xf32>, vector<6x16xf32>, vector<8x16xf32> -> vector<8x16xf32>
    %148 = arith.addf %143, %147 : vector<8x16xf32>
    %149 = vector.extract_strided_slice %137 {offsets = [2, 0], sizes = [8, 6], strides = [1, 1]} : vector<12x6xf32> to vector<8x6xf32>
    %c2_94 = arith.constant 2 : index
    %c0_95 = arith.constant 0 : index
    %c0_96 = arith.constant 0 : index
    %150 = vector.load %arg3[%c2_94, %c0_95, %c0_96] : memref<5x6x16xf32, #tpu.memory_space<vmem>>, vector<1x6x16xf32>
    %151 = vector.shape_cast %150 : vector<1x6x16xf32> to vector<6x16xf32>
    %cst_97 = arith.constant dense<0.000000e+00> : vector<8x16xf32>
    %152 = tpu.matmul %149, %151, %cst_97 {dimension_numbers = #tpu.dot_dimension_numbers<[1], [0], [0], [1], [0, 0, 1, 1], [], []>} : vector<8x6xf32>, vector<6x16xf32>, vector<8x16xf32> -> vector<8x16xf32>
    %153 = arith.addf %148, %152 : vector<8x16xf32>
    %154 = vector.extract_strided_slice %137 {offsets = [3, 0], sizes = [8, 6], strides = [1, 1]} : vector<12x6xf32> to vector<8x6xf32>
    %c3_98 = arith.constant 3 : index
    %c0_99 = arith.constant 0 : index
    %c0_100 = arith.constant 0 : index
    %155 = vector.load %arg3[%c3_98, %c0_99, %c0_100] : memref<5x6x16xf32, #tpu.memory_space<vmem>>, vector<1x6x16xf32>
    %156 = vector.shape_cast %155 : vector<1x6x16xf32> to vector<6x16xf32>
    %cst_101 = arith.constant dense<0.000000e+00> : vector<8x16xf32>
    %157 = tpu.matmul %154, %156, %cst_101 {dimension_numbers = #tpu.dot_dimension_numbers<[1], [0], [0], [1], [0, 0, 1, 1], [], []>} : vector<8x6xf32>, vector<6x16xf32>, vector<8x16xf32> -> vector<8x16xf32>
    %158 = arith.addf %153, %157 : vector<8x16xf32>
    %159 = vector.extract_strided_slice %137 {offsets = [4, 0], sizes = [8, 6], strides = [1, 1]} : vector<12x6xf32> to vector<8x6xf32>
    %c4_102 = arith.constant 4 : index
    %c0_103 = arith.constant 0 : index
    %c0_104 = arith.constant 0 : index
    %160 = vector.load %arg3[%c4_102, %c0_103, %c0_104] : memref<5x6x16xf32, #tpu.memory_space<vmem>>, vector<1x6x16xf32>
    %161 = vector.shape_cast %160 : vector<1x6x16xf32> to vector<6x16xf32>
    %cst_105 = arith.constant dense<0.000000e+00> : vector<8x16xf32>
    %162 = tpu.matmul %159, %161, %cst_105 {dimension_numbers = #tpu.dot_dimension_numbers<[1], [0], [0], [1], [0, 0, 1, 1], [], []>} : vector<8x6xf32>, vector<6x16xf32>, vector<8x16xf32> -> vector<8x16xf32>
    %163 = arith.addf %158, %162 : vector<8x16xf32>
    %164 = vector.broadcast %29 : vector<1x16xf32> to vector<8x16xf32>
    %165 = arith.addf %163, %164 : vector<8x16xf32>
    %cst_106 = arith.constant 0.000000e+00 : f32
    %166 = vector.broadcast %cst_106 : f32 to vector<8x16xf32>
    %167 = arith.maximumf %165, %166 : vector<8x16xf32>
    %cst_107 = arith.constant dense<0.000000e+00> : vector<4x16xf32>
    %168 = tpu.matmul %20, %167, %cst_107 {dimension_numbers = #tpu.dot_dimension_numbers<[1], [0], [0], [1], [0, 0, 1, 1], [], []>} : vector<4x8xf32>, vector<8x16xf32>, vector<4x16xf32> -> vector<4x16xf32>
    %cst_108 = arith.constant dense<0.000000e+00> : vector<4x16xf32>
    %169 = tpu.matmul %27, %167, %cst_108 {dimension_numbers = #tpu.dot_dimension_numbers<[1], [0], [0], [1], [0, 0, 1, 1], [], []>} : vector<4x8xf32>, vector<8x16xf32>, vector<4x16xf32> -> vector<4x16xf32>
    %170 = arith.maximumf %168, %169 : vector<4x16xf32>
    %cst_109 = arith.constant dense<0.000000e+00> : vector<4x1024xf32>
    %171 = tpu.matmul %170, %30, %cst_109 {dimension_numbers = #tpu.dot_dimension_numbers<[1], [0], [0], [1], [0, 0, 1, 1], [], []>} : vector<4x16xf32>, vector<16x1024xf32>, vector<4x1024xf32> -> vector<4x1024xf32>
    %172 = vector.broadcast %31 : vector<1x1024xf32> to vector<4x1024xf32>
    %173 = arith.addf %171, %172 : vector<4x1024xf32>
    %c0_110 = arith.constant 0 : index
    %c0_111 = arith.constant 0 : index
    %174 = vector.load %arg7[%c0_110, %c0_111] : memref<128x512xf32, #tpu.memory_space<vmem>>, vector<128x512xf32>
    %c0_112 = arith.constant 0 : index
    %c0_113 = arith.constant 0 : index
    %175 = vector.load %arg8[%c0_112, %c0_113] : memref<128x512xf32, #tpu.memory_space<vmem>>, vector<128x512xf32>
    %cst_114 = arith.constant 0.000000e+00 : f32
    %176 = vector.broadcast %cst_114 : f32 to vector<1x128xf32>
    %cst_115 = arith.constant 0.000000e+00 : f32
    %177 = vector.broadcast %cst_115 : f32 to vector<1x128xf32>
    %cst_116 = arith.constant 0.000000e+00 : f32
    %178 = vector.broadcast %cst_116 : f32 to vector<1x128xf32>
    %cst_117 = arith.constant 0.000000e+00 : f32
    %179 = vector.broadcast %cst_117 : f32 to vector<1x128xf32>
    %180 = vector.extract_strided_slice %102 {offsets = [3, 0], sizes = [1, 512], strides = [1, 1]} : vector<4x1024xf32> to vector<1x512xf32>
    %cst_118 = arith.constant dense<0.000000e+00> : vector<1x512xf32>
    %181 = tpu.matmul %176, %174, %cst_118 {dimension_numbers = #tpu.dot_dimension_numbers<[1], [0], [0], [1], [0, 0, 1, 1], [], []>} : vector<1x128xf32>, vector<128x512xf32>, vector<1x512xf32> -> vector<1x512xf32>
    %182 = arith.addf %180, %181 : vector<1x512xf32>
    %183 = vector.extract_strided_slice %173 {offsets = [0, 512], sizes = [1, 512], strides = [1, 1]} : vector<4x1024xf32> to vector<1x512xf32>
    %cst_119 = arith.constant dense<0.000000e+00> : vector<1x512xf32>
    %184 = tpu.matmul %178, %175, %cst_119 {dimension_numbers = #tpu.dot_dimension_numbers<[1], [0], [0], [1], [0, 0, 1, 1], [], []>} : vector<1x128xf32>, vector<128x512xf32>, vector<1x512xf32> -> vector<1x512xf32>
    %185 = arith.addf %183, %184 : vector<1x512xf32>
    %186 = vector.extract_strided_slice %182 {offsets = [0, 0], sizes = [1, 128], strides = [1, 1]} : vector<1x512xf32> to vector<1x128xf32>
    %187 = arith.negf %186 : vector<1x128xf32>
    %188 = math.exp %187 : vector<1x128xf32>
    %cst_120 = arith.constant 1.000000e+00 : f32
    %189 = vector.broadcast %cst_120 : f32 to vector<1x128xf32>
    %190 = arith.addf %189, %188 : vector<1x128xf32>
    %191 = arith.divf %189, %190 : vector<1x128xf32>
    %192 = vector.extract_strided_slice %182 {offsets = [0, 128], sizes = [1, 128], strides = [1, 1]} : vector<1x512xf32> to vector<1x128xf32>
    %193 = arith.negf %192 : vector<1x128xf32>
    %194 = math.exp %193 : vector<1x128xf32>
    %cst_121 = arith.constant 1.000000e+00 : f32
    %195 = vector.broadcast %cst_121 : f32 to vector<1x128xf32>
    %196 = arith.addf %195, %194 : vector<1x128xf32>
    %197 = arith.divf %195, %196 : vector<1x128xf32>
    %198 = vector.extract_strided_slice %182 {offsets = [0, 256], sizes = [1, 128], strides = [1, 1]} : vector<1x512xf32> to vector<1x128xf32>
    %199 = math.tanh %198 : vector<1x128xf32>
    %200 = vector.extract_strided_slice %182 {offsets = [0, 384], sizes = [1, 128], strides = [1, 1]} : vector<1x512xf32> to vector<1x128xf32>
    %201 = arith.negf %200 : vector<1x128xf32>
    %202 = math.exp %201 : vector<1x128xf32>
    %cst_122 = arith.constant 1.000000e+00 : f32
    %203 = vector.broadcast %cst_122 : f32 to vector<1x128xf32>
    %204 = arith.addf %203, %202 : vector<1x128xf32>
    %205 = arith.divf %203, %204 : vector<1x128xf32>
    %206 = arith.mulf %197, %177 : vector<1x128xf32>
    %207 = arith.mulf %191, %199 : vector<1x128xf32>
    %208 = arith.addf %206, %207 : vector<1x128xf32>
    %209 = math.tanh %208 : vector<1x128xf32>
    %210 = arith.mulf %205, %209 : vector<1x128xf32>
    %211 = vector.extract_strided_slice %185 {offsets = [0, 0], sizes = [1, 128], strides = [1, 1]} : vector<1x512xf32> to vector<1x128xf32>
    %212 = arith.negf %211 : vector<1x128xf32>
    %213 = math.exp %212 : vector<1x128xf32>
    %cst_123 = arith.constant 1.000000e+00 : f32
    %214 = vector.broadcast %cst_123 : f32 to vector<1x128xf32>
    %215 = arith.addf %214, %213 : vector<1x128xf32>
    %216 = arith.divf %214, %215 : vector<1x128xf32>
    %217 = vector.extract_strided_slice %185 {offsets = [0, 128], sizes = [1, 128], strides = [1, 1]} : vector<1x512xf32> to vector<1x128xf32>
    %218 = arith.negf %217 : vector<1x128xf32>
    %219 = math.exp %218 : vector<1x128xf32>
    %cst_124 = arith.constant 1.000000e+00 : f32
    %220 = vector.broadcast %cst_124 : f32 to vector<1x128xf32>
    %221 = arith.addf %220, %219 : vector<1x128xf32>
    %222 = arith.divf %220, %221 : vector<1x128xf32>
    %223 = vector.extract_strided_slice %185 {offsets = [0, 256], sizes = [1, 128], strides = [1, 1]} : vector<1x512xf32> to vector<1x128xf32>
    %224 = math.tanh %223 : vector<1x128xf32>
    %225 = vector.extract_strided_slice %185 {offsets = [0, 384], sizes = [1, 128], strides = [1, 1]} : vector<1x512xf32> to vector<1x128xf32>
    %226 = arith.negf %225 : vector<1x128xf32>
    %227 = math.exp %226 : vector<1x128xf32>
    %cst_125 = arith.constant 1.000000e+00 : f32
    %228 = vector.broadcast %cst_125 : f32 to vector<1x128xf32>
    %229 = arith.addf %228, %227 : vector<1x128xf32>
    %230 = arith.divf %228, %229 : vector<1x128xf32>
    %231 = arith.mulf %222, %179 : vector<1x128xf32>
    %232 = arith.mulf %216, %224 : vector<1x128xf32>
    %233 = arith.addf %231, %232 : vector<1x128xf32>
    %234 = math.tanh %233 : vector<1x128xf32>
    %235 = arith.mulf %230, %234 : vector<1x128xf32>
    %c0_126 = arith.constant 0 : index
    %c0_127 = arith.constant 0 : index
    %236 = vector.load %arg17[%c0_126, %c0_127] : memref<2x256xf32, #tpu.memory_space<vmem>>, vector<1x128xf32>
    tpu.vector_store %arg17[%c0_126, %c0_127], %210 {strides = array<i32>} : memref<2x256xf32, #tpu.memory_space<vmem>>, vector<1x128xf32>,
    %c1_128 = arith.constant 1 : index
    %c128 = arith.constant 128 : index
    %237 = vector.load %arg17[%c1_128, %c128] : memref<2x256xf32, #tpu.memory_space<vmem>>, vector<1x128xf32>
    tpu.vector_store %arg17[%c1_128, %c128], %235 {strides = array<i32>} : memref<2x256xf32, #tpu.memory_space<vmem>>, vector<1x128xf32>,
    %238 = vector.extract_strided_slice %173 {offsets = [3, 0], sizes = [1, 512], strides = [1, 1]} : vector<4x1024xf32> to vector<1x512xf32>
    %cst_129 = arith.constant dense<0.000000e+00> : vector<1x512xf32>
    %239 = tpu.matmul %210, %174, %cst_129 {dimension_numbers = #tpu.dot_dimension_numbers<[1], [0], [0], [1], [0, 0, 1, 1], [], []>} : vector<1x128xf32>, vector<128x512xf32>, vector<1x512xf32> -> vector<1x512xf32>
    %240 = arith.addf %238, %239 : vector<1x512xf32>
    %241 = vector.extract_strided_slice %102 {offsets = [0, 512], sizes = [1, 512], strides = [1, 1]} : vector<4x1024xf32> to vector<1x512xf32>
    %cst_130 = arith.constant dense<0.000000e+00> : vector<1x512xf32>
    %242 = tpu.matmul %235, %175, %cst_130 {dimension_numbers = #tpu.dot_dimension_numbers<[1], [0], [0], [1], [0, 0, 1, 1], [], []>} : vector<1x128xf32>, vector<128x512xf32>, vector<1x512xf32> -> vector<1x512xf32>
    %243 = arith.addf %241, %242 : vector<1x512xf32>
    %244 = vector.extract_strided_slice %240 {offsets = [0, 0], sizes = [1, 128], strides = [1, 1]} : vector<1x512xf32> to vector<1x128xf32>
    %245 = arith.negf %244 : vector<1x128xf32>
    %246 = math.exp %245 : vector<1x128xf32>
    %cst_131 = arith.constant 1.000000e+00 : f32
    %247 = vector.broadcast %cst_131 : f32 to vector<1x128xf32>
    %248 = arith.addf %247, %246 : vector<1x128xf32>
    %249 = arith.divf %247, %248 : vector<1x128xf32>
    %250 = vector.extract_strided_slice %240 {offsets = [0, 128], sizes = [1, 128], strides = [1, 1]} : vector<1x512xf32> to vector<1x128xf32>
    %251 = arith.negf %250 : vector<1x128xf32>
    %252 = math.exp %251 : vector<1x128xf32>
    %cst_132 = arith.constant 1.000000e+00 : f32
    %253 = vector.broadcast %cst_132 : f32 to vector<1x128xf32>
    %254 = arith.addf %253, %252 : vector<1x128xf32>
    %255 = arith.divf %253, %254 : vector<1x128xf32>
    %256 = vector.extract_strided_slice %240 {offsets = [0, 256], sizes = [1, 128], strides = [1, 1]} : vector<1x512xf32> to vector<1x128xf32>
    %257 = math.tanh %256 : vector<1x128xf32>
    %258 = vector.extract_strided_slice %240 {offsets = [0, 384], sizes = [1, 128], strides = [1, 1]} : vector<1x512xf32> to vector<1x128xf32>
    %259 = arith.negf %258 : vector<1x128xf32>
    %260 = math.exp %259 : vector<1x128xf32>
    %cst_133 = arith.constant 1.000000e+00 : f32
    %261 = vector.broadcast %cst_133 : f32 to vector<1x128xf32>
    %262 = arith.addf %261, %260 : vector<1x128xf32>
    %263 = arith.divf %261, %262 : vector<1x128xf32>
    %264 = arith.mulf %255, %208 : vector<1x128xf32>
    %265 = arith.mulf %249, %257 : vector<1x128xf32>
    %266 = arith.addf %264, %265 : vector<1x128xf32>
    %267 = math.tanh %266 : vector<1x128xf32>
    %268 = arith.mulf %263, %267 : vector<1x128xf32>
    %269 = vector.extract_strided_slice %243 {offsets = [0, 0], sizes = [1, 128], strides = [1, 1]} : vector<1x512xf32> to vector<1x128xf32>
    %270 = arith.negf %269 : vector<1x128xf32>
    %271 = math.exp %270 : vector<1x128xf32>
    %cst_134 = arith.constant 1.000000e+00 : f32
    %272 = vector.broadcast %cst_134 : f32 to vector<1x128xf32>
    %273 = arith.addf %272, %271 : vector<1x128xf32>
    %274 = arith.divf %272, %273 : vector<1x128xf32>
    %275 = vector.extract_strided_slice %243 {offsets = [0, 128], sizes = [1, 128], strides = [1, 1]} : vector<1x512xf32> to vector<1x128xf32>
    %276 = arith.negf %275 : vector<1x128xf32>
    %277 = math.exp %276 : vector<1x128xf32>
    %cst_135 = arith.constant 1.000000e+00 : f32
    %278 = vector.broadcast %cst_135 : f32 to vector<1x128xf32>
    %279 = arith.addf %278, %277 : vector<1x128xf32>
    %280 = arith.divf %278, %279 : vector<1x128xf32>
    %281 = vector.extract_strided_slice %243 {offsets = [0, 256], sizes = [1, 128], strides = [1, 1]} : vector<1x512xf32> to vector<1x128xf32>
    %282 = math.tanh %281 : vector<1x128xf32>
    %283 = vector.extract_strided_slice %243 {offsets = [0, 384], sizes = [1, 128], strides = [1, 1]} : vector<1x512xf32> to vector<1x128xf32>
    %284 = arith.negf %283 : vector<1x128xf32>
    %285 = math.exp %284 : vector<1x128xf32>
    %cst_136 = arith.constant 1.000000e+00 : f32
    %286 = vector.broadcast %cst_136 : f32 to vector<1x128xf32>
    %287 = arith.addf %286, %285 : vector<1x128xf32>
    %288 = arith.divf %286, %287 : vector<1x128xf32>
    %289 = arith.mulf %280, %233 : vector<1x128xf32>
    %290 = arith.mulf %274, %282 : vector<1x128xf32>
    %291 = arith.addf %289, %290 : vector<1x128xf32>
    %292 = math.tanh %291 : vector<1x128xf32>
    %293 = arith.mulf %288, %292 : vector<1x128xf32>
    %c1_137 = arith.constant 1 : index
    %c0_138 = arith.constant 0 : index
    %294 = vector.load %arg17[%c1_137, %c0_138] : memref<2x256xf32, #tpu.memory_space<vmem>>, vector<1x128xf32>
    tpu.vector_store %arg17[%c1_137, %c0_138], %268 {strides = array<i32>} : memref<2x256xf32, #tpu.memory_space<vmem>>, vector<1x128xf32>,
    %c0_139 = arith.constant 0 : index
    %c128_140 = arith.constant 128 : index
    %295 = vector.load %arg17[%c0_139, %c128_140] : memref<2x256xf32, #tpu.memory_space<vmem>>, vector<1x128xf32>
    tpu.vector_store %arg17[%c0_139, %c128_140], %293 {strides = array<i32>} : memref<2x256xf32, #tpu.memory_space<vmem>>, vector<1x128xf32>,
    %c0_141 = arith.constant 0 : index
    %c0_142 = arith.constant 0 : index
    %296 = vector.load %arg17[%c0_141, %c0_142] : memref<2x256xf32, #tpu.memory_space<vmem>>, vector<2x256xf32>
    %c0_143 = arith.constant 0 : index
    %c0_144 = arith.constant 0 : index
    %297 = vector.load %arg9[%c0_143, %c0_144] : memref<256x64xf32, #tpu.memory_space<vmem>>, vector<256x64xf32>
    %cst_145 = arith.constant dense<0.000000e+00> : vector<2x64xf32>
    %298 = tpu.matmul %296, %297, %cst_145 {dimension_numbers = #tpu.dot_dimension_numbers<[1], [0], [0], [1], [0, 0, 1, 1], [], []>} : vector<2x256xf32>, vector<256x64xf32>, vector<2x64xf32> -> vector<2x64xf32>
    %c0_146 = arith.constant 0 : index
    %c0_147 = arith.constant 0 : index
    %299 = vector.load %arg10[%c0_146, %c0_147] : memref<1x64xf32, #tpu.memory_space<vmem>>, vector<1x64xf32>
    %300 = vector.broadcast %299 : vector<1x64xf32> to vector<2x64xf32>
    %301 = arith.addf %298, %300 : vector<2x64xf32>
    %cst_148 = arith.constant 0.000000e+00 : f32
    %302 = vector.broadcast %cst_148 : f32 to vector<2x64xf32>
    %303 = arith.maximumf %301, %302 : vector<2x64xf32>
    %c0_149 = arith.constant 0 : index
    %c0_150 = arith.constant 0 : index
    %304 = vector.load %arg11[%c0_149, %c0_150] : memref<64x4xf32, #tpu.memory_space<vmem>>, vector<64x4xf32>
    %cst_151 = arith.constant dense<0.000000e+00> : vector<2x4xf32>
    %305 = tpu.matmul %303, %304, %cst_151 {dimension_numbers = #tpu.dot_dimension_numbers<[1], [0], [0], [1], [0, 0, 1, 1], [], []>} : vector<2x64xf32>, vector<64x4xf32>, vector<2x4xf32> -> vector<2x4xf32>
    %c0_152 = arith.constant 0 : index
    %c0_153 = arith.constant 0 : index
    %306 = vector.load %arg12[%c0_152, %c0_153] : memref<1x4xf32, #tpu.memory_space<vmem>>, vector<1x4xf32>
    %307 = vector.broadcast %306 : vector<1x4xf32> to vector<2x4xf32>
    %308 = arith.addf %305, %307 : vector<2x4xf32>
    %309 = math.tanh %308 : vector<2x4xf32>
    %cst_154 = arith.constant 1.57079637 : f32
    %310 = vector.broadcast %cst_154 : f32 to vector<2x4xf32>
    %311 = arith.mulf %309, %310 : vector<2x4xf32>
    %cst_155 = arith.constant 5.000000e-01 : f32
    %312 = vector.broadcast %cst_155 : f32 to vector<2x4xf32>
    %313 = arith.mulf %312, %311 : vector<2x4xf32>
    %314 = math.sin %313 : vector<2x4xf32>
    %315 = arith.mulf %314, %314 : vector<2x4xf32>
    %cst_156 = arith.constant 1.000000e+00 : f32
    %316 = vector.broadcast %cst_156 : f32 to vector<2x4xf32>
    %317 = arith.subf %316, %315 : vector<2x4xf32>
    %c0_157 = arith.constant 0 : index
    %c0_158 = arith.constant 0 : index
    %318 = vector.load %arg13[%c0_157, %c0_158] : memref<4x16xf32, #tpu.memory_space<vmem>>, vector<4x16xf32>
    %cst_159 = arith.constant 1.000000e+00 : f32
    %319 = vector.broadcast %cst_159 : f32 to vector<2x16xf32>
    %320 = vector.extract_strided_slice %318 {offsets = [0, 0], sizes = [1, 16], strides = [1, 1]} : vector<4x16xf32> to vector<1x16xf32>
    %321 = vector.extract_strided_slice %315 {offsets = [0, 0], sizes = [2, 1], strides = [1, 1]} : vector<2x4xf32> to vector<2x1xf32>
    %322 = vector.broadcast %321 : vector<2x1xf32> to vector<2x16xf32>
    %323 = vector.broadcast %320 : vector<1x16xf32> to vector<2x16xf32>
    %324 = arith.mulf %322, %323 : vector<2x16xf32>
    %325 = vector.extract_strided_slice %317 {offsets = [0, 0], sizes = [2, 1], strides = [1, 1]} : vector<2x4xf32> to vector<2x1xf32>
    %cst_160 = arith.constant 1.000000e+00 : f32
    %326 = vector.broadcast %cst_160 : f32 to vector<1x16xf32>
    %327 = arith.subf %326, %320 : vector<1x16xf32>
    %328 = vector.broadcast %325 : vector<2x1xf32> to vector<2x16xf32>
    %329 = vector.broadcast %327 : vector<1x16xf32> to vector<2x16xf32>
    %330 = arith.mulf %328, %329 : vector<2x16xf32>
    %331 = arith.addf %324, %330 : vector<2x16xf32>
    %332 = arith.mulf %319, %331 : vector<2x16xf32>
    %333 = vector.extract_strided_slice %318 {offsets = [1, 0], sizes = [1, 16], strides = [1, 1]} : vector<4x16xf32> to vector<1x16xf32>
    %334 = vector.extract_strided_slice %315 {offsets = [0, 1], sizes = [2, 1], strides = [1, 1]} : vector<2x4xf32> to vector<2x1xf32>
    %335 = vector.broadcast %334 : vector<2x1xf32> to vector<2x16xf32>
    %336 = vector.broadcast %333 : vector<1x16xf32> to vector<2x16xf32>
    %337 = arith.mulf %335, %336 : vector<2x16xf32>
    %338 = vector.extract_strided_slice %317 {offsets = [0, 1], sizes = [2, 1], strides = [1, 1]} : vector<2x4xf32> to vector<2x1xf32>
    %cst_161 = arith.constant 1.000000e+00 : f32
    %339 = vector.broadcast %cst_161 : f32 to vector<1x16xf32>
    %340 = arith.subf %339, %333 : vector<1x16xf32>
    %341 = vector.broadcast %338 : vector<2x1xf32> to vector<2x16xf32>
    %342 = vector.broadcast %340 : vector<1x16xf32> to vector<2x16xf32>
    %343 = arith.mulf %341, %342 : vector<2x16xf32>
    %344 = arith.addf %337, %343 : vector<2x16xf32>
    %345 = arith.mulf %332, %344 : vector<2x16xf32>
    %346 = vector.extract_strided_slice %318 {offsets = [2, 0], sizes = [1, 16], strides = [1, 1]} : vector<4x16xf32> to vector<1x16xf32>
    %347 = vector.extract_strided_slice %315 {offsets = [0, 2], sizes = [2, 1], strides = [1, 1]} : vector<2x4xf32> to vector<2x1xf32>
    %348 = vector.broadcast %347 : vector<2x1xf32> to vector<2x16xf32>
    %349 = vector.broadcast %346 : vector<1x16xf32> to vector<2x16xf32>
    %350 = arith.mulf %348, %349 : vector<2x16xf32>
    %351 = vector.extract_strided_slice %317 {offsets = [0, 2], sizes = [2, 1], strides = [1, 1]} : vector<2x4xf32> to vector<2x1xf32>
    %cst_162 = arith.constant 1.000000e+00 : f32
    %352 = vector.broadcast %cst_162 : f32 to vector<1x16xf32>
    %353 = arith.subf %352, %346 : vector<1x16xf32>
    %354 = vector.broadcast %351 : vector<2x1xf32> to vector<2x16xf32>
    %355 = vector.broadcast %353 : vector<1x16xf32> to vector<2x16xf32>
    %356 = arith.mulf %354, %355 : vector<2x16xf32>
    %357 = arith.addf %350, %356 : vector<2x16xf32>
    %358 = arith.mulf %345, %357 : vector<2x16xf32>
    %359 = vector.extract_strided_slice %318 {offsets = [3, 0], sizes = [1, 16], strides = [1, 1]} : vector<4x16xf32> to vector<1x16xf32>
    %360 = vector.extract_strided_slice %315 {offsets = [0, 3], sizes = [2, 1], strides = [1, 1]} : vector<2x4xf32> to vector<2x1xf32>
    %361 = vector.broadcast %360 : vector<2x1xf32> to vector<2x16xf32>
    %362 = vector.broadcast %359 : vector<1x16xf32> to vector<2x16xf32>
    %363 = arith.mulf %361, %362 : vector<2x16xf32>
    %364 = vector.extract_strided_slice %317 {offsets = [0, 3], sizes = [2, 1], strides = [1, 1]} : vector<2x4xf32> to vector<2x1xf32>
    %cst_163 = arith.constant 1.000000e+00 : f32
    %365 = vector.broadcast %cst_163 : f32 to vector<1x16xf32>
    %366 = arith.subf %365, %359 : vector<1x16xf32>
    %367 = vector.broadcast %364 : vector<2x1xf32> to vector<2x16xf32>
    %368 = vector.broadcast %366 : vector<1x16xf32> to vector<2x16xf32>
    %369 = arith.mulf %367, %368 : vector<2x16xf32>
    %370 = arith.addf %363, %369 : vector<2x16xf32>
    %371 = arith.mulf %358, %370 : vector<2x16xf32>
    %c0_164 = arith.constant 0 : index
    %c0_165 = arith.constant 0 : index
    %372 = vector.load %arg14[%c0_164, %c0_165] : memref<16x2xf32, #tpu.memory_space<vmem>>, vector<16x2xf32>
    %cst_166 = arith.constant dense<0.000000e+00> : vector<2x2xf32>
    %373 = tpu.matmul %371, %372, %cst_166 {dimension_numbers = #tpu.dot_dimension_numbers<[1], [0], [0], [1], [0, 0, 1, 1], [], []>} : vector<2x16xf32>, vector<16x2xf32>, vector<2x2xf32> -> vector<2x2xf32>
    %c0_167 = arith.constant 0 : index
    %c0_168 = arith.constant 0 : index
    %374 = vector.load %arg15[%c0_167, %c0_168] : memref<1x2xf32, #tpu.memory_space<vmem>>, vector<1x2xf32>
    %375 = vector.broadcast %374 : vector<1x2xf32> to vector<2x2xf32>
    %376 = arith.addf %373, %375 : vector<2x2xf32>
    %cst_169 = arith.constant dense<0xFF800000> : vector<2xf32>
    %377 = vector.multi_reduction <maximumf>, %376, %cst_169 [1] : vector<2x2xf32> to vector<2xf32>
    %378 = vector.shape_cast %377 : vector<2xf32> to vector<2x1xf32>
    %379 = vector.broadcast %378 : vector<2x1xf32> to vector<2x2xf32>
    %380 = arith.subf %376, %379 : vector<2x2xf32>
    %381 = math.exp %380 : vector<2x2xf32>
    %cst_170 = arith.constant dense<0.000000e+00> : vector<2xf32>
    %382 = vector.multi_reduction <add>, %381, %cst_170 [1] : vector<2x2xf32> to vector<2xf32>
    %383 = vector.shape_cast %382 : vector<2xf32> to vector<2x1xf32>
    %384 = vector.broadcast %383 : vector<2x1xf32> to vector<2x2xf32>
    %385 = arith.divf %381, %384 : vector<2x2xf32>
    %c0_171 = arith.constant 0 : index
    %c0_172 = arith.constant 0 : index
    %386 = vector.load %arg16[%c0_171, %c0_172] : memref<2x2xf32, #tpu.memory_space<vmem>>, vector<2x2xf32>
    tpu.vector_store %arg16[%c0_171, %c0_172], %385 {strides = array<i32>} : memref<2x2xf32, #tpu.memory_space<vmem>>, vector<2x2xf32>,
    return
  }
}

</mosaic_0001>

<bundles_post_ra>
// kernel: simple_qhn_forward.1
= control target key start
LH: loop header
LB: loop body
LE: loop exit
PB: predicated region body
PF: predicated region fallthrough
CT: control target
= control target key end

     0   :  { %s8317_s0 = inlined_call_operand.vmem [shape: f32[2,28,116], index: 0, kind: input, shape index: {}]   ;;  %s8318_s1 = inlined_call_operand.vmem [shape: f32[5,116,6], index: 1, kind: input, shape index: {}]   ;;  %s8319_s2 = inlined_call_operand.hbm [shape: f32[1,6], index: 2, kind: input, shape index: {}]   ;;  %s8320_s3 = inlined_call_operand.vmem [shape: f32[5,6,16], index: 3, kind: input, shape index: {}]   ;;  %s8321_s4 = inlined_call_operand.hbm [shape: f32[1,16], index: 4, kind: input, shape index: {}]   ;;  %s8322_s5 = inlined_call_operand.hbm [shape: f32[16,1024], index: 5, kind: input, shape index: {}]   ;;  %s8323_s6 = inlined_call_operand.vmem [shape: f32[1,1024], index: 6, kind: input, shape index: {}]   ;;  %s8324_s7 = inlined_call_operand.vmem [shape: f32[128,512], index: 7, kind: input, shape index: {}]   ;;  %s8325_s8 = inlined_call_operand.vmem [shape: f32[128,512], index: 8, kind: input, shape index: {}]   ;;  %s8326_s9 = inlined_call_operand.vmem [shape: f32[256,64], index: 9, kind: input, shape index: {}]   ;;  %s8327_s10 = inlined_call_operand.hbm [shape: f32[1,64], index: 10, kind: input, shape index: {}]   ;;  %s8328_s11 = inlined_call_operand.vmem [shape: f32[64,4], index: 11, kind: input, shape index: {}]   ;;  %s8329_s12 = inlined_call_operand.hbm [shape: f32[1,4], index: 12, kind: input, shape index: {}]   ;;  %s8330_s13 = inlined_call_operand.vmem [shape: f32[4,16], index: 13, kind: input, shape index: {}]   ;;  %s8331_s14 = inlined_call_operand.vmem [shape: f32[16,2], index: 14, kind: input, shape index: {}]   ;;  %s8332_s15 = inlined_call_operand.hbm [shape: f32[1,2], index: 15, kind: input, shape index: {}]   ;;  %s8333_s16 = inlined_call_operand.hbm [shape: f32[2,2], index: 16, kind: output, shape index: {}]  }
   0x1   :  { %8451 = sst [smem:[#allocation94_spill]] %s8317_s0 }
   0x2   :  { %21 = vsyncpa [#allocation4], 0 }
   0x3   :  { %22 = vsyncpa [#allocation7], 0 }
   0x4   :  { %23 = vsyncpa [#allocation10], 0 }
   0x5   :  { %24 = vsyncpa [#allocation13], 0 }
   0x6   :  { %25 = vsyncpa [#allocation5], 0  ;;  %s5853_s21 = smov [#allocation6]   ;;  %s5854_s23 = smov [#allocation9]  }
   0x7   :  { %s48_s22 = sshll.u32 %s5853_s21, 4  ;;  %s78_s24 = sshll.u32 %s5854_s23, 4  ;;  %s49_s22 = int_to_ptr.vmem [resolvable:$true] %s48_s22  ;;  %s79_s24 = int_to_ptr.vmem [resolvable:$true] %s78_s24 }
   0x8   :  { %s5711_s25 = scalar_lea.vmem %s49_s22, 16  ;;  %s5715_s26 = scalar_lea.vmem %s49_s22, 32 }
   0x9   :  { %p5712_p0 = scmp.ne.s32.totalorder %s49_s22, %s5711_s25  ;;  %p5716_p1 = scmp.lt.s32.totalorder %s49_s22, %s49_s22 }
   0xa   :  { %p5717_p2 = scmp.lt.s32.totalorder %s5715_s26, %s5711_s25 }
   0xc   :  { %p5718_p3 = por %p5717_p2, %p5716_p1 }
   0xe   :  { %p5719_p4 = pnand %p5718_p3, %p5712_p0 }
  0x10   :  { %5722 = shalt.err (!%p5719_p4)
}
  0x11   :  { %51 = dma.hbm_to_vmem [thread:$0]  %s8321_s4, 16, %s49_s22, [#allocation7]  }
  0x12   :  { %s5731_s29 = scalar_lea.vmem %s79_s24, 16  ;;  %s5735_s30 = scalar_lea.vmem %s79_s24, 32 }
  0x13   :  { %p5732_p5 = scmp.ne.s32.totalorder %s79_s24, %s5731_s29  ;;  %p5736_p6 = scmp.lt.s32.totalorder %s79_s24, %s79_s24 }
  0x14   :  { %p5737_p7 = scmp.lt.s32.totalorder %s5735_s30, %s5731_s29 }
  0x16   :  { %p5738_p8 = por %p5737_p7, %p5736_p6 }
  0x18   :  { %p5739_p9 = pnand %p5738_p8, %p5732_p5 }
  0x1a   :  { %5742 = shalt.err (!%p5739_p9)
}
  0x1b   :  { %81 = dma.hbm_to_vmem [thread:$0]  %s8327_s10, 16, %s79_s24, [#allocation10]  }
  0x1c   :  { %s5855_s18 = smov [#allocation3]   ;;  %s5856_s20 = smov [#allocation8]  }
  0x1d   :  { %s36_s19 = sshll.u32 %s5855_s18, 4  ;;  %s57_s21 = sshll.u32 %s5856_s20, 4  ;;  %s37_s19 = int_to_ptr.vmem [resolvable:$true] %s36_s19  ;;  %s58_s21 = int_to_ptr.vmem [resolvable:$true] %s57_s21 }
  0x1e   :  { %s5751_s23 = scalar_lea.vmem %s37_s19, 16  ;;  %s5755_s4 = scalar_lea.vmem %s37_s19, 32 }
  0x1f   :  { %p5752_p10 = scmp.ne.s32.totalorder %s37_s19, %s5751_s23  ;;  %p5756_p11 = scmp.lt.s32.totalorder %s37_s19, %s37_s19 }
  0x20   :  { %p5757_p12 = scmp.lt.s32.totalorder %s5755_s4, %s5751_s23 }
  0x22   :  { %p5758_p13 = por %p5757_p12, %p5756_p11 }
  0x24   :  { %p5759_p0 = pnand %p5758_p13, %p5752_p10 }
  0x26   :  { %5762 = shalt.err (!%p5759_p0)
}
  0x27   :  { %39 = dma.hbm_to_vmem [thread:$0]  %s8319_s2, 16, %s37_s19, [#allocation4]  }
  0x28   :  { %s5771_s26 = scalar_lea.vmem %s58_s21, 2048  ;;  %p5776_p2 = scmp.lt.s32.totalorder %s58_s21, %s58_s21 }
  0x29   :  { %p5772_p1 = scmp.ne.s32.totalorder %s58_s21, %s5771_s26  ;;  %p5777_p3 = scmp.lt.s32.totalorder %s5771_s26, %s5771_s26 }
  0x2b   :  { %p5778_p4 = por %p5777_p3, %p5776_p2 }
  0x2d   :  { %p5779_p5 = pnand %p5778_p4, %p5772_p1 }
  0x2f   :  { %5782 = shalt.err (!%p5779_p5)
}
  0x30   :  { %s5857_s10 = smov 1024   ;;  %s5858_s24 = smov 64  }
  0x31   :  { %63 = dma.hbm_to_vmem [thread:$0]  %s8322_s5, 2048, %s58_s21, [#allocation7], %s5857_s10, %s5857_s10, %s5858_s24  }
  0x32   :  { %s5859_s29 = smov [#allocation11]   ;;  %s5860_s0 = smov [#allocation12]  }
  0x33   :  { %s90_s30 = sshll.u32 %s5859_s29, 4  ;;  %s104_s17 = sshll.u32 %s5860_s0, 4  ;;  %s91_s30 = int_to_ptr.vmem [resolvable:$true] %s90_s30  ;;  %s105_s17 = int_to_ptr.vmem [resolvable:$true] %s104_s17 }
  0x34   :  { %s5791_s2 = scalar_lea.vmem %s91_s30, 16  ;;  %s5795_s18 = scalar_lea.vmem %s91_s30, 32 }
  0x35   :  { %p5792_p6 = scmp.ne.s32.totalorder %s91_s30, %s5791_s2  ;;  %p5796_p7 = scmp.lt.s32.totalorder %s91_s30, %s91_s30 }
  0x36   :  { %p5797_p8 = scmp.lt.s32.totalorder %s5795_s18, %s5791_s2 }
  0x38   :  { %p5798_p9 = por %p5797_p8, %p5796_p7 }
  0x3a   :  { %p5799_p10 = pnand %p5798_p9, %p5792_p6 }
  0x3c   :  { %5802 = shalt.err (!%p5799_p10)
}
  0x3d   :  { %93 = dma.hbm_to_vmem [thread:$0]  %s8329_s12, 16, %s91_s30, [#allocation10]  }
  0x3e   :  { %s5811_s23 = scalar_lea.vmem %s105_s17, 16  ;;  %s5815_s5 = scalar_lea.vmem %s105_s17, 32 }
  0x3f   :  { %p5812_p11 = scmp.ne.s32.totalorder %s105_s17, %s5811_s23  ;;  %p5816_p12 = scmp.lt.s32.totalorder %s105_s17, %s105_s17 }
  0x40   :  { %p5817_p13 = scmp.lt.s32.totalorder %s5815_s5, %s5811_s23 }
  0x42   :  { %p5818_p0 = por %p5817_p13, %p5816_p12 }
  0x44   :  { %p5819_p1 = pnand %p5818_p0, %p5812_p11 }
  0x46   :  { %5822 = shalt.err (!%p5819_p1)
}
  0x47   :  { %107 = dma.hbm_to_vmem [thread:$0]  %s8332_s15, 16, %s105_s17, [#allocation13]  }
  0x48   :  { %5843 = dma.done.wait [#allocation4], 16  }
  0x49   :  { %5844 = vsyncadd [#allocation4], 4294967280 }
  0x4a   :  { %5845 = dma.done.wait [#allocation7], 2064  }
  0x4b   :  { %5846 = vsyncadd [#allocation7], 4294965232 }
  0x4c   :  { %5847 = dma.done.wait [#allocation10], 32  }
  0x4d   :  { %5848 = vsyncadd [#allocation10], 4294967264 }
  0x4e   :  { %5849 = dma.done.wait [#allocation13], 16  }
  0x4f   :  { %5850 = vsyncadd [#allocation13], 4294967280  ;;  %v8340_v0 = vmov 0.0   ;;  %vm5862_vm0 = vmmov 0   ;;  %vm220_vm1 = vcmask 1043456   ;;  %v5997_v3 = vld [vmem:[%s8318_s1 + $0xe0] sm:$0xff] }
  0x50   :  { %5074 = vmatprep.subr.mxu0 %v8340_v0  ;;  %5113 = vmatprep.subr.mxu1 %v8340_v0  ;;  %v5987_v1 = vld [vmem:[%s8318_s1 + $0xe8] sm:$0xf]  ;;  %v5992_v2 = vld [vmem:[%s8318_s1 + $0x70] sm:$0xf]  ;;  %v6013_v5 = vld [vmem:[%s8318_s1 + $0xd8] sm:$0xff]  ;;  %s8452_s29 = sld [smem:[#allocation94_spill]] }
  0x51   :  { %5104 = vmatprep.mubr.msk.f32.mxu0 %vm5862_vm0, %v8340_v0  ;;  %5143 = vmatprep.mubr.msk.f32.mxu1 %vm5862_vm0, %v8340_v0  ;;  %v6006_v4 = vld [vmem:[%s8318_s1 + $0x68] sm:$0xff]  ;;  %v6018_v6 = vld [vmem:[%s8318_s1 + $0x60] sm:$0xff]  ;;  %v6027_v7 = vld [vmem:[%s8318_s1 + $0xd0] sm:$0xff]  ;;  %vm205_vm2 = vcmask 1046528   ;;  %vm213_vm3 = vcmask 949248   ;;  %vm409_vm4 = vcmask 1045504  }
  0x52   :  { %5075 = vmatpush3.msk.msra.mxu0 %vm220_vm1, %v5987_v1  ;;  %5114 = vmatpush3.msk.msra.mxu1 %vm220_vm1, %v5992_v2  ;;  %v6032_v8 = vld [vmem:[%s8318_s1 + $0x58] sm:$0xff]  ;;  %v6041_v9 = vld [vmem:[%s8318_s1 + $0xc8] sm:$0xff]  ;;  %v6046_v10 = vld [vmem:[%s8318_s1 + $0x50] sm:$0xff]  ;;  %vm525_vm5 = vcmask 1044480   ;;  %vm752_vm7 = vcmask 195584   ;;  %vm925_vm11 = vcmask 48128  }
  0x53   :  { %5076 = vmatprep.subr.mxu0 %v8340_v0  ;;  %5115 = vmatprep.subr.mxu1 %v8340_v0  ;;  %v6055_v11 = vld [vmem:[%s8318_s1 + $0xc0] sm:$0xff]  ;;  %v6060_v12 = vld [vmem:[%s8318_s1 + $0x48] sm:$0xff]  ;;  %v6069_v13 = vld [vmem:[%s8318_s1 + $0xb8] sm:$0xff]  ;;  %vm1327_vm12 = vcmask 64512   ;;  %vm1514_vm13 = vcmask 130048   ;;  %vm4242_vm14 = vcmask 523264  }
  0x54   :  { %5077 = vmatpush3.msra.mxu0 %v5997_v3  ;;  %5116 = vmatpush3.msra.mxu1 %v6006_v4  ;;  %v6074_v14 = vld [vmem:[%s8318_s1 + $0x40] sm:$0xff]  ;;  %v6088_v16 = vld [vmem:[%s8318_s1 + $0xb0] sm:$0xff]  ;;  %v6093_v17 = vld [vmem:[%s8318_s1 + $0x38] sm:$0xff] }
  0x55   :  { %5078 = vmatprep.subr.mxu0 %v8340_v0  ;;  %5117 = vmatprep.subr.mxu1 %v8340_v0  ;;  %v6109_v21 = vld [vmem:[%s8318_s1 + $0xa8] sm:$0xff]  ;;  %v6114_v22 = vld [vmem:[%s8318_s1 + $0x30] sm:$0xff]  ;;  %v6128_v24 = vld [vmem:[%s8318_s1 + $0xa0] sm:$0xff] }
  0x56   :  { %5079 = vmatpush3.msra.mxu0 %v6013_v5  ;;  %5118 = vmatpush3.msra.mxu1 %v6018_v6  ;;  %v6081_v15 = vld [vmem:[%s8452_s29] sm:$0xff]  ;;  %v6098_v18 = vld [vmem:[%s8452_s29 + $0x8] sm:$0xff]  ;;  %v6142_v26 = vld [vmem:[%s8318_s1 + $0x98] sm:$0xff] }
  0x57   :  { %5080 = vmatprep.subr.mxu0 %v8340_v0  ;;  %5119 = vmatprep.subr.mxu1 %v8340_v0  ;;  %v641_v19 = vrot.slane %v6081_v15, 4  ;;  %v8335_v20 = vrot.slane %v6098_v18, 4  ;;  %v6133_v25 = vld [vmem:[%s8318_s1 + $0x28] sm:$0xff]  ;;  %v6147_v27 = vld [vmem:[%s8318_s1 + $0x20] sm:$0xff]  ;;  %v6156_v28 = vld [vmem:[%s8318_s1 + $0x90] sm:$0xff]  ;;  %v206_v32 = vrot.slane %v6081_v15, 1 }
  0x58   :  { %5081 = vmatpush3.msra.mxu0 %v6027_v7  ;;  %5120 = vmatpush3.msra.mxu1 %v6032_v8  ;;  %v6161_v29 = vld [vmem:[%s8318_s1 + $0x18] sm:$0xff]  ;;  %v6170_v30 = vld [vmem:[%s8318_s1 + $0x88] sm:$0xff]  ;;  %v6175_v31 = vld [vmem:[%s8318_s1 + $0x10] sm:$0xff]  ;;  %v207_v33 = vrot.slane %v6098_v18, 1 }
  0x59   :  { %5082 = vmatprep.subr.mxu0 %v8340_v0  ;;  %5121 = vmatprep.subr.mxu1 %v8340_v0  ;;  %v6121_v23 = vsel %vm220_vm1, %v641_v19, %v8335_v20  ;;  %v6186_v34 = vld [vmem:[%s8318_s1 + $0x80] sm:$0xff]  ;;  %v6191_v35 = vld [vmem:[%s8318_s1 + $0x8] sm:$0xff]  ;;  %v6200_v36 = vld [vmem:[%s8318_s1 + $0x78] sm:$0xff] }
  0x5a   :  { %5083 = vmatpush3.msra.mxu0 %v6041_v9  ;;  %5122 = vmatpush3.msra.mxu1 %v6046_v10  ;;  %v6205_v37 = vld [vmem:[%s8318_s1] sm:$0xff]  ;;  %v208_v38 = vsel %vm205_vm2, %v206_v32, %v207_v33  ;;  %v6226_v40 = vld [vmem:[%s8318_s1 + $0x158] sm:$0xff]  ;;  %v6242_v42 = vld [vmem:[%s8318_s1 + $0x150] sm:$0xff] }
  0x5b   :  { %5084 = vmatprep.subr.mxu0 %v8340_v0  ;;  %5123 = vmatprep.subr.mxu1 %v8340_v0  ;;  %8453 = vst [vmem:[#allocation20_spill] sm:$0xff] %v6205_v37  ;;  %v6217_v39 = vld [vmem:[%s8318_s1 + $0x160] sm:$0xf]  ;;  %8455 = vst [vmem:[#allocation22_spill] sm:$0xff] %v6226_v40  ;;  %v6231_v41 = vld [vmem:[%s8318_s1 + $0x1d8] sm:$0xf] }
  0x5c   :  { %5085 = vmatpush3.msra.mxu0 %v6055_v11  ;;  %5124 = vmatpush3.msra.mxu1 %v6060_v12  ;;  %8454 = vst [vmem:[#allocation21_spill] sm:$0xff] %v6217_v39  ;;  %8456 = vst [vmem:[#allocation23_spill] sm:$0xff] %v6231_v41  ;;  %v6247_v43 = vld [vmem:[%s8318_s1 + $0x1d0] sm:$0xff]  ;;  %v6257_v44 = vld [vmem:[%s8318_s1 + $0x148] sm:$0xff] }
  0x5d   :  { %5086 = vmatprep.subr.mxu0 %v8340_v0  ;;  %5125 = vmatprep.subr.mxu1 %v8340_v0  ;;  %8457 = vst [vmem:[#allocation24_spill] sm:$0xff] %v6242_v42  ;;  %8458 = vst [vmem:[#allocation25_spill] sm:$0xff] %v6247_v43  ;;  %v6262_v45 = vld [vmem:[%s8318_s1 + $0x1c8] sm:$0xff]  ;;  %v6271_v46 = vld [vmem:[%s8318_s1 + $0x140] sm:$0xff] }
  0x5e   :  { %5087 = vmatpush3.msra.mxu0 %v6069_v13  ;;  %5126 = vmatpush3.msra.mxu1 %v6074_v14  ;;  %8459 = vst [vmem:[#allocation26_spill] sm:$0xff] %v6257_v44  ;;  %8460 = vst [vmem:[#allocation27_spill] sm:$0xff] %v6262_v45  ;;  %v6276_v47 = vld [vmem:[%s8318_s1 + $0x1c0] sm:$0xff]  ;;  %v6285_v48 = vld [vmem:[%s8318_s1 + $0x138] sm:$0xff] }
  0x5f   :  { %5088 = vmatprep.subr.mxu0 %v8340_v0  ;;  %5127 = vmatprep.subr.mxu1 %v8340_v0  ;;  %8461 = vst [vmem:[#allocation28_spill] sm:$0xff] %v6271_v46  ;;  %8462 = vst [vmem:[#allocation29_spill] sm:$0xff] %v6276_v47  ;;  %v6290_v49 = vld [vmem:[%s8318_s1 + $0x1b8] sm:$0xff]  ;;  %v6299_v50 = vld [vmem:[%s8318_s1 + $0x130] sm:$0xff] }
  0x60   :  { %5089 = vmatpush3.msra.mxu0 %v6088_v16  ;;  %5128 = vmatpush3.msra.mxu1 %v6093_v17  ;;  %8463 = vst [vmem:[#allocation30_spill] sm:$0xff] %v6285_v48  ;;  %8464 = vst [vmem:[#allocation31_spill] sm:$0xff] %v6290_v49  ;;  %v6304_v51 = vld [vmem:[%s8318_s1 + $0x1b0] sm:$0xff]  ;;  %v6318_v53 = vld [vmem:[%s8318_s1 + $0x128] sm:$0xff] }
  0x61   :  { %5090 = vmatprep.subr.mxu0 %v8340_v0  ;;  %5129 = vmatprep.subr.mxu1 %v8340_v0  ;;  %8465 = vst [vmem:[#allocation32_spill] sm:$0xff] %v6299_v50  ;;  %8466 = vst [vmem:[#allocation33_spill] sm:$0xff] %v6304_v51  ;;  %v6311_v52 = vld [vmem:[%s8452_s29 + $0x10] sm:$0xff]  ;;  %v6323_v54 = vld [vmem:[%s8318_s1 + $0x1a8] sm:$0xff] }
  0x62   :  { %5091 = vmatpush3.msra.mxu0 %v6109_v21  ;;  %5130 = vmatpush3.msra.mxu1 %v6114_v22  ;;  %8467 = vst [vmem:[#allocation34_spill] sm:$0xff] %v6318_v53  ;;  %8468 = vst [vmem:[#allocation35_spill] sm:$0xff] %v6323_v54  ;;  %v6332_v55 = vld [vmem:[%s8318_s1 + $0x120] sm:$0xff]  ;;  %v209_v57 = vrot.slane %v6311_v52, 1  ;;  %v6347_v58 = vld [vmem:[%s8318_s1 + $0x118] sm:$0xff] }
  0x63   :  { %5092 = vmatprep.subr.mxu0 %v8340_v0  ;;  %5131 = vmatprep.subr.mxu1 %v8340_v0  ;;  %8469 = vst [vmem:[#allocation36_spill] sm:$0xff] %v6332_v55  ;;  %v6337_v56 = vld [vmem:[%s8318_s1 + $0x1a0] sm:$0xff]  ;;  %8471 = vst [vmem:[#allocation38_spill] sm:$0xff] %v6347_v58  ;;  %v6352_v59 = vld [vmem:[%s8318_s1 + $0x198] sm:$0xff] }
  0x64   :  { %5093 = vmatpush3.msra.mxu0 %v6128_v24  ;;  %5132 = vmatpush3.msra.mxu1 %v6133_v25  ;;  %8470 = vst [vmem:[#allocation37_spill] sm:$0xff] %v6337_v56  ;;  %8472 = vst [vmem:[#allocation39_spill] sm:$0xff] %v6352_v59  ;;  %v6359_v60 = vld [vmem:[%s8452_s29 + $0x18] sm:$0xf]  ;;  %v210_v61 = vsel %vm205_vm2, %v207_v33, %v209_v57  ;;  %v6371_v62 = vld [vmem:[%s8318_s1 + $0x110] sm:$0xff] }
  0x65   :  { %5094 = vmatprep.subr.mxu0 %v8340_v0  ;;  %5133 = vmatprep.subr.mxu1 %v8340_v0  ;;  %8473 = vst [vmem:[#allocation40_spill] sm:$0xff] %v6371_v62  ;;  %v6376_v63 = vld [vmem:[%s8318_s1 + $0x190] sm:$0xff]  ;;  %v211_v19 = vrot.slane %v6359_v60, 1  ;;  %v6389_v32 = vld [vmem:[%s8318_s1 + $0x108] sm:$0xff]  ;;  %v6413_v20 = vld [vmem:[%s8318_s1 + $0x180] sm:$0xff] }
  0x66   :  { %5095 = vmatpush3.msra.mxu0 %v6142_v26  ;;  %5134 = vmatpush3.msra.mxu1 %v6147_v27  ;;  %8474 = vst [vmem:[#allocation41_spill] sm:$0xff] %v6376_v63  ;;  %8475 = vst [vmem:[#allocation42_spill] sm:$0xff] %v6389_v32  ;;  %v6394_v33 = vld [vmem:[%s8318_s1 + $0x188] sm:$0xff] }
  0x67   :  { %5096 = vmatprep.subr.mxu0 %v8340_v0  ;;  %5135 = vmatprep.subr.mxu1 %v8340_v0  ;;  %8476 = vst [vmem:[#allocation43_spill] sm:$0xff] %v6394_v33  ;;  %8478 = vst [vmem:[#allocation45_spill] sm:$0xff] %v6413_v20 }
  0x68   :  { %5097 = vmatpush3.msra.mxu0 %v6156_v28  ;;  %5136 = vmatpush3.msra.mxu1 %v6161_v29 }
  0x69   :  { %5098 = vmatprep.subr.mxu0 %v8340_v0  ;;  %5137 = vmatprep.subr.mxu1 %v8340_v0 }
  0x6a   :  { %5099 = vmatpush3.msra.mxu0 %v6170_v30  ;;  %5138 = vmatpush3.msra.mxu1 %v6175_v31 }
  0x6b   :  { %5100 = vmatprep.subr.mxu0 %v8340_v0  ;;  %5139 = vmatprep.subr.mxu1 %v8340_v0 }
  0x6c   :  { %5101 = vmatpush3.msra.mxu0 %v6186_v34  ;;  %5140 = vmatpush3.msra.mxu1 %v6191_v35 }
  0x6d   :  { %5102 = vmatprep.subr.mxu0 %v8340_v0  ;;  %5141 = vmatprep.subr.mxu1 %v8340_v0 }
  0x6e   :  { %5103 = vmatpush3.msra.mxu0 %v6200_v36  ;;  %5142 = vmatpush3.msra.mxu1 %v6205_v37 }
  0x6f   :  { %5105 = vmatmul.mubr.msk.f32.vlgmr.msra.gmra.mxu0 %vm213_vm3, %v208_v38  ;;  %5152 = vmatprep.subr.mxu0 %v8340_v0  ;;  %v212_v38 = vsel %vm205_vm2, %v209_v57, %v211_v19  ;;  %v410_v57 = vrot.slane %v6081_v15, 2  ;;  %v411_v19 = vrot.slane %v6098_v18, 2 }
  0x70   :  { %5144 = vmatmul.mubr.msk.f32.vlgmr.msra.gmra.mxu1 %vm213_vm3, %v6081_v15  ;;  %5153 = vmatpush3.msk.msra.mxu0 %vm220_vm1, %v6217_v39 }
  0x71   :  { %5154 = vmatprep.subr.mxu0 %v8340_v0  ;;  %5191 = vmatprep.subr.mxu1 %v8340_v0 }
  0x72   :  { %5155 = vmatpush3.msra.mxu0 %v6226_v40  ;;  %5192 = vmatpush3.msk.msra.mxu1 %vm220_vm1, %v6231_v41 }
  0x73   :  { %5156 = vmatprep.subr.mxu0 %v8340_v0  ;;  %5193 = vmatprep.subr.mxu1 %v8340_v0 }
  0x74   :  { %5157 = vmatpush3.msra.mxu0 %v6242_v42  ;;  %5194 = vmatpush3.msra.mxu1 %v6247_v43 }
  0x75   :  { %5158 = vmatprep.subr.mxu0 %v8340_v0  ;;  %5195 = vmatprep.subr.mxu1 %v8340_v0 }
  0x76   :  { %5159 = vmatpush3.msra.mxu0 %v6257_v44  ;;  %5196 = vmatpush3.msra.mxu1 %v6262_v45 }
  0x77   :  { %5160 = vmatprep.subr.mxu0 %v8340_v0  ;;  %5197 = vmatprep.subr.mxu1 %v8340_v0 }
  0x78   :  { %5161 = vmatpush3.msra.mxu0 %v6271_v46  ;;  %5198 = vmatpush3.msra.mxu1 %v6276_v47 }
  0x79   :  { %5162 = vmatprep.subr.mxu0 %v8340_v0  ;;  %5199 = vmatprep.subr.mxu1 %v8340_v0 }
  0x7a   :  { %5163 = vmatpush3.msra.mxu0 %v6285_v48  ;;  %5200 = vmatpush3.msra.mxu1 %v6290_v49 }
  0x7b   :  { %5164 = vmatprep.subr.mxu0 %v8340_v0  ;;  %5201 = vmatprep.subr.mxu1 %v8340_v0 }
  0x7c   :  { %5165 = vmatpush3.msra.mxu0 %v6299_v50  ;;  %5202 = vmatpush3.msra.mxu1 %v6304_v51 }
  0x7d   :  { %5166 = vmatprep.subr.mxu0 %v8340_v0  ;;  %5203 = vmatprep.subr.mxu1 %v8340_v0 }
  0x7e   :  { %5167 = vmatpush3.msra.mxu0 %v6318_v53  ;;  %5204 = vmatpush3.msra.mxu1 %v6323_v54 }
  0x7f   :  { %5168 = vmatprep.subr.mxu0 %v8340_v0  ;;  %5205 = vmatprep.subr.mxu1 %v8340_v0 }
  0x80   :  { %5169 = vmatpush3.msra.mxu0 %v6332_v55  ;;  %5206 = vmatpush3.msra.mxu1 %v6337_v56 }
  0x81   :  { %5170 = vmatprep.subr.mxu0 %v8340_v0  ;;  %5207 = vmatprep.subr.mxu1 %v8340_v0 }
  0x82   :  { %5171 = vmatpush3.msra.mxu0 %v6347_v58  ;;  %5208 = vmatpush3.msra.mxu1 %v6352_v59 }
  0x83   :  { %5107 = vmatprep.mubr.msk.f32.mxu0 %vm5862_vm0, %v8340_v0  ;;  %5172 = vmatprep.subr.mxu0 %v8340_v0 }
  0x84   :  { %5209 = vmatprep.subr.mxu1 %v8340_v0  ;;  %5108 = vmatmul.mubr.msk.f32.gmra.mxu0 %vm213_vm3, %v210_v61  ;;  %v6408_v61 = vld [vmem:[%s8318_s1 + $0x100] sm:$0xff] }
  0x85   :  { %5173 = vmatpush3.msra.mxu0 %v6371_v62  ;;  %5210 = vmatpush3.msra.mxu1 %v6376_v63  ;;  %8477 = vst [vmem:[#allocation44_spill] sm:$0xff] %v6408_v61  ;;  %v412_v63 = vsel %vm409_vm4, %v410_v57, %v411_v19  ;;  %v8483_v62 = vmov 0.0   ;;  %v6471_v57 = vld [vmem:[%s8318_s1 + $0x250] sm:$0xf] }
  0x86   :  { %5146 = vmatprep.mubr.msk.f32.mxu1 %vm5862_vm0, %v8340_v0  ;;  %5174 = vmatprep.subr.mxu0 %v8340_v0  ;;  %8485 = vst [vmem:[#allocation51_spill] sm:$0xff] %v6471_v57 }
  0x87   :  { %5211 = vmatprep.subr.mxu1 %v8340_v0  ;;  %5147 = vmatmul.mubr.msk.f32.gmra.mxu1 %vm213_vm3, %v6098_v18 }
  0x88   :  { %5175 = vmatpush3.msra.mxu0 %v6389_v32  ;;  %5212 = vmatpush3.msra.mxu1 %v6394_v33  ;;  %v6427_v33 = vld [vmem:[%s8318_s1 + $0xf8] sm:$0xff] }
  0x89   :  { %5110 = vmatprep.mubr.msk.f32.mxu0 %vm5862_vm0, %v8340_v0  ;;  %5176 = vmatprep.subr.mxu0 %v8340_v0  ;;  %8479 = vst [vmem:[#allocation46_spill] sm:$0xff] %v6427_v33  ;;  %v6432_v32 = vld [vmem:[%s8318_s1 + $0x178] sm:$0xff] }
  0x8a   :  { %5213 = vmatprep.subr.mxu1 %v8340_v0  ;;  %5111 = vmatmul.mubr.msk.f32.gmra.mxu0 %vm213_vm3, %v212_v38  ;;  %8480 = vst [vmem:[#allocation47_spill] sm:$0xff] %v6432_v32  ;;  %v6443_v38 = vld [vmem:[%s8318_s1 + $0xf0] sm:$0xff] }
  0x8b   :  { %5177 = vmatpush3.msra.mxu0 %v6408_v61  ;;  %5214 = vmatpush3.msra.mxu1 %v6413_v20  ;;  %8481 = vst [vmem:[#allocation48_spill] sm:$0xff] %v6443_v38  ;;  %v526_v20 = vrot.slane %v6081_v15, 3  ;;  %v527_v61 = vrot.slane %v6098_v18, 3  ;;  %v6463_v15 = vld [vmem:[%s8318_s1 + $0x168] sm:$0xff] }
  0x8c   :  { %5149 = vmatprep.mubr.msk.f32.mxu1 %vm5862_vm0, %v8340_v0  ;;  %5178 = vmatprep.subr.mxu0 %v8340_v0  ;;  %8484 = vst [vmem:[#allocation50_spill] sm:$0xff] %v6463_v15 }
  0x8d   :  { %5215 = vmatprep.subr.mxu1 %v8340_v0  ;;  %5150 = vmatmul.mubr.msk.f32.gmra.mxu1 %vm213_vm3, %v6311_v52  ;;  %v6452_v0 = vld [vmem:[%s8318_s1 + $0x170] sm:$0xff] }
  0x8e   :  { %5179 = vmatpush3.msra.mxu0 %v6427_v33  ;;  %5216 = vmatpush3.msra.mxu1 %v6432_v32  ;;  %8482 = vst [vmem:[#allocation49_spill] sm:$0xff] %v6452_v0  ;;  %v413_v32 = vrot.slane %v6311_v52, 2  ;;  %v529_v33 = vrot.slane %v6311_v52, 3 }
  0x8f   :  { %5180 = vmatprep.subr.mxu0 %v8483_v62  ;;  %5217 = vmatprep.subr.mxu1 %v8483_v62 }
  0x90   :  { %5181 = vmatpush3.msra.mxu0 %v6443_v38  ;;  %5182 = vmatprep.mubr.msk.f32.mxu0 %vm5862_vm0, %v8483_v62  ;;  %v528_v38 = vsel %vm525_vm5, %v526_v20, %v527_v61  ;;  %v414_v20 = vsel %vm409_vm4, %v411_v19, %v413_v32  ;;  %v530_v59 = vsel %vm525_vm5, %v527_v61, %v529_v33  ;;  %v6508_v19 = vld [vmem:[%s8318_s1 + $0x238] sm:$0xff] }
  0x91   :  { %5218 = vmatpush3.msra.mxu1 %v6452_v0  ;;  %5183 = vmatmul.mubr.msk.f32.vlgmr.msra.gmra.mxu0 %vm213_vm3, %v412_v63  ;;  %v6483_v63 = vld [vmem:[%s8318_s1 + $0x248] sm:$0xff]  ;;  %v415_v0 = vrot.slane %v6359_v60, 2  ;;  %8488 = vst [vmem:[#allocation54_spill] sm:$0xff] %v6508_v19 }
  0x92   :  { %5219 = vmatprep.subr.mxu1 %v8483_v62  ;;  %5230 = vmatprep.subr.mxu0 %v8483_v62  ;;  %8486 = vst [vmem:[#allocation52_spill] sm:$0xff] %v6483_v63 }
  0x93   :  { %5220 = vmatpush3.msra.mxu1 %v6463_v15  ;;  %5221 = vmatprep.mubr.msk.f32.mxu1 %vm5862_vm0, %v8483_v62  ;;  %v6496_v15 = vld [vmem:[%s8318_s1 + $0x240] sm:$0xff]  ;;  %v416_v61 = vsel %vm409_vm4, %v413_v32, %v415_v0  ;;  %v6530_v0 = vld [vmem:[%s8318_s1 + $0x228] sm:$0xff]  ;;  %v6547_v32 = vld [vmem:[%s8318_s1 + $0x218] sm:$0xff] }
  0x94   :  { %5231 = vmatpush3.msk.msra.mxu0 %vm220_vm1, %v6471_v57  ;;  %5222 = vmatmul.mubr.msk.f32.vlgmr.msra.gmra.mxu1 %vm213_vm3, %v528_v38  ;;  %8487 = vst [vmem:[#allocation53_spill] sm:$0xff] %v6496_v15  ;;  %v531_v57 = vrot.slane %v6359_v60, 3  ;;  %v6519_v38 = vld [vmem:[%s8318_s1 + $0x230] sm:$0xff]  ;;  %8490 = vst [vmem:[#allocation56_spill] sm:$0xff] %v6530_v0 }
  0x95   :  { %5232 = vmatprep.subr.mxu0 %v8483_v62  ;;  %5185 = vmatprep.mubr.msk.f32.mxu0 %vm5862_vm0, %v8483_v62  ;;  %8489 = vst [vmem:[#allocation55_spill] sm:$0xff] %v6519_v38  ;;  %8492 = vst [vmem:[#allocation58_spill] sm:$0xff] %v6547_v32 }
  0x96   :  { %5233 = vmatpush3.msra.mxu0 %v6483_v63  ;;  %5224 = vmatprep.mubr.msk.f32.mxu1 %vm5862_vm0, %v8483_v62 }
  0x97   :  { %5186 = vmatmul.mubr.msk.f32.gmra.mxu0 %vm213_vm3, %v414_v20  ;;  %5234 = vmatprep.subr.mxu0 %v8483_v62  ;;  %v532_v20 = vsel %vm525_vm5, %v529_v33, %v531_v57  ;;  %v6554_v33 = vld [vmem:[%s8318_s1 + $0x210] sm:$0xff]  ;;  %v6561_v57 = vld [vmem:[%s8318_s1 + $0x208] sm:$0xff] }
  0x98   :  { %5235 = vmatpush3.msra.mxu0 %v6496_v15  ;;  %5225 = vmatmul.mubr.msk.f32.gmra.mxu1 %vm213_vm3, %v530_v59  ;;  %v6538_v59 = vld [vmem:[%s8318_s1 + $0x220] sm:$0xff]  ;;  %8493 = vst [vmem:[#allocation59_spill] sm:$0xff] %v6554_v33  ;;  %8494 = vst [vmem:[#allocation60_spill] sm:$0xff] %v6561_v57 }
  0x99   :  { %5236 = vmatprep.subr.mxu0 %v8483_v62  ;;  %5188 = vmatprep.mubr.msk.f32.mxu0 %vm5862_vm0, %v8483_v62  ;;  %8491 = vst [vmem:[#allocation57_spill] sm:$0xff] %v6538_v59 }
  0x9a   :  { %5237 = vmatpush3.msra.mxu0 %v6508_v19  ;;  %5227 = vmatprep.mubr.msk.f32.mxu1 %vm5862_vm0, %v8483_v62 }
  0x9b   :  { %5189 = vmatmul.mubr.msk.f32.gmra.mxu0 %vm213_vm3, %v416_v61  ;;  %5238 = vmatprep.subr.mxu0 %v8483_v62  ;;  %v6568_v61 = vld [vmem:[%s8318_s1 + $0x200] sm:$0xff] }
  0x9c   :  { %5239 = vmatpush3.msra.mxu0 %v6519_v38  ;;  %5228 = vmatmul.mubr.msk.f32.gmra.mxu1 %vm213_vm3, %v532_v20  ;;  %8495 = vst [vmem:[#allocation61_spill] sm:$0xff] %v6568_v61  ;;  %v6575_v20 = vld [vmem:[%s8318_s1 + $0x1f8] sm:$0xff] }
  0x9d   :  { %5240 = vmatprep.subr.mxu0 %v8483_v62  ;;  %5260 = vmatprep.mubr.msk.f32.mxu0 %vm5862_vm0, %v8483_v62  ;;  %8496 = vst [vmem:[#allocation62_spill] sm:$0xff] %v6575_v20 }
  0x9e   :  { %5241 = vmatpush3.msra.mxu0 %v6530_v0 }
  0x9f   :  { %5242 = vmatprep.subr.mxu0 %v8483_v62 }
  0xa0   :  { %5243 = vmatpush3.msra.mxu0 %v6538_v59  ;;  %v646_v59 = vrot.slane %v6359_v60, 4 }
  0xa1   :  { %5244 = vmatprep.subr.mxu0 %v8483_v62 }
  0xa2   :  { %5245 = vmatpush3.msra.mxu0 %v6547_v32 }
  0xa3   :  { %5246 = vmatprep.subr.mxu0 %v8483_v62 }
  0xa4   :  { %5247 = vmatpush3.msra.mxu0 %v6554_v33  ;;  %v6582_v33 = vld [vmem:[%s8318_s1 + $0x1f0] sm:$0xff] }
  0xa5   :  { %5248 = vmatprep.subr.mxu0 %v8483_v62  ;;  %8497 = vst [vmem:[#allocation63_spill] sm:$0xff] %v6582_v33 }
  0xa6   :  { %5249 = vmatpush3.msra.mxu0 %v6561_v57  ;;  %v6589_v57 = vld [vmem:[%s8318_s1 + $0x1e8] sm:$0xff] }
  0xa7   :  { %5250 = vmatprep.subr.mxu0 %v8483_v62  ;;  %8498 = vst [vmem:[#allocation64_spill] sm:$0xff] %v6589_v57 }
  0xa8   :  { %5251 = vmatpush3.msra.mxu0 %v6568_v61  ;;  %v6596_v61 = vld [vmem:[%s8318_s1 + $0x1e0] sm:$0xff] }
  0xa9   :  { %5252 = vmatprep.subr.mxu0 %v8483_v62  ;;  %8499 = vst [vmem:[#allocation65_spill] sm:$0xff] %v6596_v61 }
  0xaa   :  { %5253 = vmatpush3.msra.mxu0 %v6575_v20  ;;  %v644_v20 = vrot.slane %v6311_v52, 4 }
  0xab   :  { %5254 = vmatprep.subr.mxu0 %v8483_v62 }
  0xac   :  { %5255 = vmatpush3.msra.mxu0 %v6582_v33  ;;  %v8500_v33 = vrot.slane %v6098_v18, 4  ;;  %v647_v52 = vsel %vm220_vm1, %v644_v20, %v646_v59 }
  0xad   :  { %5256 = vmatprep.subr.mxu0 %v8483_v62 }
  0xae   :  { %5257 = vmatpush3.msra.mxu0 %v6589_v57  ;;  %v645_v32 = vsel %vm220_vm1, %v8500_v33, %v644_v20 }
  0xaf   :  { %5258 = vmatprep.subr.mxu0 %v8483_v62 }
  0xb0   :  { %5259 = vmatpush3.msra.mxu0 %v6596_v61 }
  0xb1   :  { %5261 = vmatmul.mubr.msk.f32.vlgmr.msra.gmra.mxu0 %vm213_vm3, %v6121_v23  ;;  %v126_v23 = vlaneseq }
  0xb2   :  { %5263 = vmatprep.mubr.msk.f32.mxu0 %vm5862_vm0, %v8483_v62 }
  0xb3   :  { %v6616_v61 = vshrl.u32 %v126_v23, 7  ;;  %v6618_v57 = vand.u32 127, %v126_v23 }
  0xb5   :  { %5264 = vmatmul.mubr.msk.f32.gmra.mxu0 %vm213_vm3, %v645_v32  ;;  %8501 = vst [vmem:[#allocation66_spill] sm:$0xff] %v6616_v61  ;;  %v131_v18 = vmul.u32 2, %v6616_v61 }
  0xb6   :  { %5266 = vmatprep.mubr.msk.f32.mxu0 %vm5862_vm0, %v8483_v62 }
  0xb7   :  { %vm133_vm6 = vcmp.eq.s32.totalorder %v6618_v57, %v131_v18  ;;  %v139_v59 = vadd.s32 1, %v131_v18 }
  0xb8   :  { %v6623_v60 = vsel %vm133_vm6, 1.0, %v8483_v62 }
  0xb9   :  { %5267 = vmatmul.mubr.msk.f32.gmra.mxu0 %vm213_vm3, %v647_v52  ;;  %5275 = vmatprep.mubr.msk.f32.mxu1 %vm752_vm7, %v6623_v60  ;;  %vm141_vm8 = vcmp.eq.s32.totalorder %v6618_v57, %v139_v59 }
  0xba   :  { %1582 = vmatprep.mubr.f32.mxu0 %v8483_v62 }
 0x12f   :  { %v290_v32 = vpop.f32.mrf.mxu0 }
 0x130   :  { %v379_v33 = vpop.f32.mrf.mxu1 }
 0x131   :  { %v380_v20 = vadd.f32 %v379_v33, %v290_v32  ;;  %v5106_v52 = vpop.f32.mrf.mxu0 }
 0x132   :  { %v5145_v23 = vpop.f32.mrf.mxu1 }
 0x144   :  { %v295_v0 = vpop.f32.mrf.mxu0 }
 0x146   :  { %v5109_v38 = vpop.f32.mrf.mxu0 }
 0x147   :  { %v384_v19 = vpop.f32.mrf.mxu1 }
 0x148   :  { %v385_v23 = vadd.f32 %v384_v19, %v295_v0 }
 0x149   :  { %v5148_v15 = vpop.f32.mrf.mxu1 }
 0x14a   :  { %v300_v63 = vpop.f32.mrf.mxu0 }
 0x14c   :  { %v5112_v58 = vpop.f32.mrf.mxu0 }
 0x14d   :  { %v389_v56 = vpop.f32.mrf.mxu1 }
 0x14e   :  { %v390_v45 = vadd.f32 %v389_v56, %v300_v63 }
 0x14f   :  { %v5151_v55 = vpop.f32.mrf.mxu1 }
 0x151   :  { %v492_v54 = vpop.f32.mrf.mxu0 }
 0x152   :  { %v506_v58 = vadd.f32 %v492_v54, %v380_v20 }
 0x153   :  { %v5184_v53 = vpop.f32.mrf.mxu0 }
 0x154   :  { %v608_v51 = vpop.f32.mrf.mxu1 }
 0x155   :  { %v622_v41 = vadd.f32 %v608_v51, %v506_v58 }
 0x156   :  { %v5223_v50 = vpop.f32.mrf.mxu1 }
 0x157   :  { %v497_v18 = vpop.f32.mrf.mxu0 }
 0x158   :  { %v613_v49 = vpop.f32.mrf.mxu1  ;;  %v507_v15 = vadd.f32 %v497_v18, %v385_v23 }
 0x159   :  { %v5187_v48 = vpop.f32.mrf.mxu0 }
 0x15a   :  { %v5226_v47 = vpop.f32.mrf.mxu1  ;;  %v623_v42 = vadd.f32 %v613_v49, %v507_v15  ;;  %v128_v48 = vadd.s32 8, %v6616_v61  ;;  %v7498_v61 = vld [vmem:[%s8324_s7] sm:$0xff] }
 0x15b   :  { %v502_v46 = vpop.f32.mrf.mxu0 }
 0x15c   :  { %v618_v32 = vpop.f32.mrf.mxu1  ;;  %v508_v43 = vadd.f32 %v502_v46, %v390_v45  ;;  %v132_v54 = vmul.u32 2, %v128_v48 }
 0x15d   :  { %v5190_v33 = vpop.f32.mrf.mxu0 }
 0x15e   :  { %v5229_v52 = vpop.f32.mrf.mxu1  ;;  %v624_v50 = vadd.f32 %v618_v32, %v508_v43  ;;  %v6629_v33 = vld [vmem:[#allocation3] ss:$0 sm:$0xff]  ;;  %vm134_vm9 = vcmp.eq.s32.totalorder %v6618_v57, %v132_v54 }
 0x15f   :  { %v6636_v43 = vsel %vm134_vm9, 1.0, %v8483_v62  ;;  %v6667_v52 = vld [vmem:[%s8320_s3] sm:$0x3f] }
 0x171   :  { %v723_v38 = vpop.f32.mrf.mxu0 }
 0x172   :  { %v737_v39 = vadd.f32 %v723_v38, %v622_v41  ;;  %v140_v41 = vadd.s32 1, %v132_v54  ;;  %v6679_v38 = vld [vmem:[%s8320_s3 + $0x10] sm:$0x3f] }
 0x173   :  { %v5262_v44 = vpop.f32.mrf.mxu0 }
 0x174   :  { %v746_v45 = vadd.f32 %v6629_v33, %v737_v39  ;;  %vm142_vm10 = vcmp.eq.s32.totalorder %v6618_v57, %v140_v41 }
 0x175   :  { %v728_v55 = vpop.f32.mrf.mxu0  ;;  %v6649_v39 = vsel %vm142_vm10, 1.0, %v8483_v62 }
 0x176   :  { %v738_v40 = vadd.f32 %v728_v55, %v623_v42  ;;  %v749_v42 = vmax.f32 %v746_v45, 0.0  ;;  %v6690_v55 = vld [vmem:[%s8320_s3 + $0x18] sm:$0x3f] }
 0x177   :  { %v5265_v53 = vpop.f32.mrf.mxu0 }
 0x178   :  { %v747_v56 = vadd.f32 %v6629_v33, %v738_v40  ;;  %v6659_v40 = vld [vmem:[%s8320_s3 + $0x8] sm:$0x3f] }
 0x179   :  { %v733_v47 = vpop.f32.mrf.mxu0 }
 0x17a   :  { %v739_v37 = vadd.f32 %v733_v47, %v624_v50  ;;  %v750_v49 = vmax.f32 %v747_v56, 0.0  ;;  %v6702_v47 = vld [vmem:[%s8320_s3 + $0x20] sm:$0x3f] }
 0x17b   :  { %v5268_v19 = vpop.f32.mrf.mxu0 }
 0x17c   :  { %v748_v44 = vadd.f32 %v6629_v33, %v739_v37  ;;  %v6641_v37 = vsel %vm141_vm8, 1.0, %v8483_v62 }
 0x17e   :  { %v751_v46 = vmax.f32 %v748_v44, 0.0 }
 0x180   :  { %5269 = vmatprep.subr.mxu1 %v751_v46 }
 0x181   :  { %5270 = vmatpush3.msra.mxu1 %v751_v46 }
 0x182   :  { %5271 = vmatprep.subr.mxu1 %v750_v49 }
 0x183   :  { %5272 = vmatpush3.msra.mxu1 %v750_v49 }
 0x184   :  { %5273 = vmatprep.subr.mxu1 %v749_v42 }
 0x185   :  { %5274 = vmatpush3.msra.mxu1 %v749_v42 }
 0x186   :  { %5276 = vmatmul.mubr.msk.f32.vlgmr.msra.gmra.mxu1 %vm752_vm7, %v6636_v43  ;;  %5278 = vmatprep.subr.mxu1 %v751_v46 }
 0x187   :  { %5279 = vmatpush3.msra.mxu1 %v751_v46  ;;  %5284 = vmatprep.mubr.msk.f32.mxu1 %vm752_vm7, %v6641_v37 }
 0x188   :  { %5280 = vmatprep.subr.mxu1 %v750_v49 }
 0x189   :  { %5281 = vmatpush3.msra.mxu1 %v750_v49 }
 0x18a   :  { %5282 = vmatprep.subr.mxu1 %v749_v42 }
 0x18b   :  { %5283 = vmatpush3.msra.mxu1 %v749_v42 }
 0x18c   :  { %5285 = vmatmul.mubr.msk.f32.vlgmr.msra.gmra.mxu1 %vm752_vm7, %v6649_v39  ;;  %5287 = vmatprep.subr.mxu1 %v8483_v62 }
 0x18d   :  { %5289 = vmatprep.mubr.msk.f32.mxu1 %vm5862_vm0, %v8483_v62  ;;  %5288 = vmatpush3.msk.msra.mxu1 %vm409_vm4, %v6659_v40 }
 0x18e   :  { %5292 = vmatprep.subr.mxu1 %v8483_v62 }
 0x246   :  { %v5277_v51 = vpop.f32.mrf.mxu1 }
 0x248   :  { %v825_v63 = vpop.f32.mrf.mxu1 }
 0x24c   :  { %v5286_v0 = vpop.f32.mrf.mxu1 }
 0x24d   :  { %v916_v57 = vmax.f32 %v5277_v51, %v5286_v0 }
 0x24e   :  { %v906_v59 = vpop.f32.mrf.mxu1 }
 0x24f   :  { %v915_v20 = vmax.f32 %v825_v63, %v906_v59  ;;  %v923_v18 = vrot.slane %v916_v57, 1  ;;  %v1079_v58 = vrot.slane %v916_v57, 2  ;;  %v1160_v48 = vrot.slane %v916_v57, 3 }
 0x250   :  { %v1241_v44 = vrot.slane %v916_v57, 4 }
 0x251   :  { %v922_v32 = vrot.slane %v915_v20, 1  ;;  %v1078_v15 = vrot.slane %v915_v20, 2  ;;  %v1159_v50 = vrot.slane %v915_v20, 3  ;;  %v1240_v56 = vrot.slane %v915_v20, 4 }
 0x253   :  { %v924_v23 = vsel %vm205_vm2, %v922_v32, %v923_v18  ;;  %v1080_v53 = vsel %vm409_vm4, %v1078_v15, %v1079_v58  ;;  %v1161_v19 = vsel %vm525_vm5, %v1159_v50, %v1160_v48  ;;  %v1242_v54 = vsel %vm220_vm1, %v1240_v56, %v1241_v44  ;;  %v6715_v18 = vld [vmem:[#allocation6] ss:$0 sm:$0xff]  ;;  %v6726_v50 = vld [vmem:[#allocation8 + $0x48] sm:$0xff]  ;;  %v6729_v48 = vld [vmem:[#allocation8 + $0x40] sm:$0xff] }
 0x254   :  { %5290 = vmatmul.mubr.msk.f32.vlgmr.msra.gmra.mxu1 %vm925_vm11, %v924_v23  ;;  %1546 = vmatprep.subr.mxu0 %v6726_v50  ;;  %v6735_v56 = vld [vmem:[#allocation8 + $0x8] sm:$0xff]  ;;  %v6737_v44 = vld [vmem:[#allocation8 + $0x50] sm:$0xff] }
 0x255   :  { %5293 = vmatpush3.msk.msra.mxu1 %vm409_vm4, %v6667_v52  ;;  %5294 = vmatprep.mubr.msk.f32.mxu1 %vm5862_vm0, %v8483_v62 }
 0x256   :  { %5297 = vmatprep.subr.mxu1 %v8483_v62  ;;  %1547 = vmatpush1.msra.mxu0 %v6729_v48 }
 0x257   :  { %1548 = vmatprep.subr.mxu0 %v6735_v56 }
 0x258   :  { %5295 = vmatmul.mubr.msk.f32.vlgmr.msra.gmra.mxu1 %vm925_vm11, %v915_v20 }
 0x259   :  { %5298 = vmatpush3.msk.msra.mxu1 %vm409_vm4, %v6679_v38  ;;  %5299 = vmatprep.mubr.msk.f32.mxu1 %vm5862_vm0, %v8483_v62 }
 0x25a   :  { %5302 = vmatprep.subr.mxu1 %v8483_v62 }
 0x25c   :  { %5300 = vmatmul.mubr.msk.f32.vlgmr.msra.gmra.mxu1 %vm925_vm11, %v1080_v53 }
 0x25d   :  { %5303 = vmatpush3.msk.msra.mxu1 %vm409_vm4, %v6690_v55  ;;  %5304 = vmatprep.mubr.msk.f32.mxu1 %vm5862_vm0, %v8483_v62 }
 0x25e   :  { %5307 = vmatprep.subr.mxu1 %v8483_v62 }
 0x260   :  { %5305 = vmatmul.mubr.msk.f32.vlgmr.msra.gmra.mxu1 %vm925_vm11, %v1161_v19  ;;  %v6731_v19 = vld [vmem:[#allocation8 + $0x58] sm:$0xff] }
 0x261   :  { %5308 = vmatpush3.msk.msra.mxu1 %vm409_vm4, %v6702_v47  ;;  %5309 = vmatprep.mubr.msk.f32.mxu1 %vm5862_vm0, %v8483_v62 }
 0x262   :  { %5312 = vmatprep.subr.mxu1 %v8483_v62 }
 0x264   :  { %5310 = vmatmul.mubr.msk.f32.vlgmr.msra.gmra.mxu1 %vm925_vm11, %v1242_v54  ;;  %v6741_v54 = vld [vmem:[#allocation8] sm:$0xff] }
 0x265   :  { %5314 = vmatprep.mubr.msk.f32.mxu1 %vm5862_vm0, %v8483_v62  ;;  %1549 = vmatpush1.msra.mxu0 %v6741_v54 }
 0x314   :  { %v997_v45 = vpop.f32.mrf.mxu1 }
 0x316   :  { %v5291_v46 = vpop.f32.mrf.mxu1 }
 0x317   :  { %v6747_v46 = vld [vmem:[#allocation8 + $0x10] sm:$0xff] }
 0x318   :  { %v1072_v49 = vpop.f32.mrf.mxu1 }
 0x319   :  { %v1073_v63 = vadd.f32 %v1072_v49, %v997_v45  ;;  %v6743_v45 = vld [vmem:[#allocation8 + $0x18] sm:$0xff]  ;;  %v6749_v49 = vld [vmem:[#allocation8 + $0x68] sm:$0xff] }
 0x31a   :  { %v5296_v42 = vpop.f32.mrf.mxu1  ;;  %1688 = vmatprep.subr.mxu0 %v6749_v49 }
 0x31b   :  { %v6753_v42 = vld [vmem:[#allocation8 + $0x78] sm:$0xff] }
 0x31c   :  { %v1152_v41 = vpop.f32.mrf.mxu1 }
 0x31d   :  { %v1156_v57 = vadd.f32 %v1152_v41, %v1073_v63 }
 0x31e   :  { %v5301_v51 = vpop.f32.mrf.mxu1 }
 0x320   :  { %v1233_v0 = vpop.f32.mrf.mxu1 }
 0x321   :  { %v1237_v20 = vadd.f32 %v1233_v0, %v1156_v57  ;;  %v6756_v57 = vld [vmem:[#allocation8 + $0x60] sm:$0xff] }
 0x322   :  { %v5306_v59 = vpop.f32.mrf.mxu1 }
 0x323   :  { %v6758_v59 = vld [vmem:[#allocation8 + $0x70] sm:$0xff] }
 0x324   :  { %v1314_v32 = vpop.f32.mrf.mxu1 }
 0x325   :  { %v1318_v23 = vadd.f32 %v1314_v32, %v1237_v20  ;;  %v6760_v32 = vld [vmem:[#allocation8 + $0x28] sm:$0xff] }
 0x326   :  { %v5311_v15 = vpop.f32.mrf.mxu1 }
 0x327   :  { %v1325_v58 = vadd.f32 %v6715_v18, %v1318_v23  ;;  %v6762_v23 = vld [vmem:[#allocation8 + $0x38] sm:$0xff]  ;;  %v6766_v15 = vld [vmem:[#allocation8 + $0x20] sm:$0xff] }
 0x329   :  { %v1326_v53 = vmax.f32 %v1325_v58, 0.0  ;;  %v6770_v58 = vld [vmem:[#allocation8 + $0x30] sm:$0xff] }
 0x32b   :  { %5313 = vmatpush3.msra.mxu1 %v1326_v53 }
 0x32c   :  { %5315 = vmatmul.mubr.msk.f32.vlgmr.msra.gmra.mxu1 %vm1327_vm12, %v6623_v60  ;;  %5317 = vmatprep.subr.mxu1 %v8483_v62 }
 0x32d   :  { %5318 = vmatpush3.msra.mxu1 %v1326_v53  ;;  %5319 = vmatprep.mubr.msk.f32.mxu1 %vm5862_vm0, %v8483_v62 }
 0x32e   :  { %1617 = vmatprep.subr.mxu1 %v6731_v19 }
 0x330   :  { %5320 = vmatmul.mubr.msk.f32.vlgmr.msra.gmra.mxu1 %vm1327_vm12, %v6641_v37 }
 0x331   :  { %1653 = vmatprep.mubr.f32.mxu1 %v8483_v62  ;;  %1618 = vmatpush1.msra.mxu1 %v6737_v44 }
 0x332   :  { %1619 = vmatprep.subr.mxu1 %v6743_v45 }
 0x333   :  { %1620 = vmatpush1.msra.mxu1 %v6747_v46 }
 0x334   :  { %1759 = vmatprep.subr.mxu1 %v6753_v42 }
 0x3ec   :  { %v1396_v41 = vpop.f32.mrf.mxu1 }
 0x3ee   :  { %v5316_v51 = vpop.f32.mrf.mxu1 }
 0x3ef   :  { %v8523_v51 = vld [vmem:[#allocation41_spill] sm:$0xff] }
 0x3f0   :  { %v1468_v63 = vpop.f32.mrf.mxu1 }
 0x3f1   :  { %v1472_v0 = vmax.f32 %v1396_v41, %v1468_v63  ;;  %v8522_v41 = vld [vmem:[#allocation40_spill] sm:$0xff] }
 0x3f2   :  { %v5321_v20 = vpop.f32.mrf.mxu1 }
 0x3f3   :  { %4727 = vmatmul.mubr.msk.f32.vlgmr.msra.gmra.mxu0 %vm1514_vm13, %v1472_v0  ;;  %4728 = vmatmul.mubr.msk.f32.vlgmr.msra.gmra.mxu1 %vm1514_vm13, %v1472_v0  ;;  %v8525_v20 = vld [vmem:[#allocation43_spill] sm:$0xff] }
 0x3f4   :  { %1689 = vmatpush1.msra.mxu0 %v6756_v57  ;;  %1760 = vmatpush1.msra.mxu1 %v6758_v59 }
 0x3f5   :  { %1690 = vmatprep.subr.mxu0 %v6760_v32  ;;  %1761 = vmatprep.subr.mxu1 %v6762_v23 }
 0x3f6   :  { %1691 = vmatpush1.msra.mxu0 %v6766_v15  ;;  %1724 = vmatprep.mubr.f32.mxu0 %v8483_v62 }
 0x3f7   :  { %1762 = vmatpush1.msra.mxu1 %v6770_v58  ;;  %1795 = vmatprep.mubr.f32.mxu1 %v8483_v62 }
 0x3f8   :  { %5322 = vmatprep.subr.mxu0 %v8483_v62  ;;  %4729 = vmatmul.mubr.msk.f32.vlgmr.msra.gmra.mxu0 %vm1514_vm13, %v1472_v0 }
 0x3f9   :  { %4730 = vmatmul.mubr.msk.f32.vlgmr.msra.gmra.mxu1 %vm1514_vm13, %v1472_v0  ;;  %5323 = vmatpush3.msk.msra.mxu0 %vm220_vm1, %v5987_v1  ;;  %v6827_v1 = vld [vmem:[%s8452_s29 + $0x20] sm:$0xff] }
 0x3fa   :  { %5361 = vmatprep.subr.mxu1 %v8483_v62  ;;  %5324 = vmatprep.subr.mxu0 %v8483_v62  ;;  %v8524_v0 = vld [vmem:[#allocation42_spill] sm:$0xff] }
 0x3fb   :  { %5362 = vmatpush3.msk.msra.mxu1 %vm220_vm1, %v5992_v2  ;;  %5325 = vmatpush3.msra.mxu0 %v5997_v3  ;;  %v6832_v2 = vld [vmem:[%s8452_s29 + $0x28] sm:$0xff]  ;;  %v1811_v3 = vrot.slane %v6827_v1, 1 }
 0x3fc   :  { %5363 = vmatprep.subr.mxu1 %v8483_v62  ;;  %5326 = vmatprep.subr.mxu0 %v8483_v62 }
 0x3fd   :  { %5364 = vmatpush3.msra.mxu1 %v6006_v4  ;;  %5327 = vmatpush3.msra.mxu0 %v6013_v5  ;;  %v1812_v4 = vrot.slane %v6832_v2, 1 }
 0x3fe   :  { %5365 = vmatprep.subr.mxu1 %v8483_v62  ;;  %5328 = vmatprep.subr.mxu0 %v8483_v62 }
 0x3ff   :  { %5366 = vmatpush3.msra.mxu1 %v6018_v6  ;;  %5329 = vmatpush3.msra.mxu0 %v6027_v7  ;;  %v1813_v5 = vsel %vm205_vm2, %v1811_v3, %v1812_v4  ;;  %v8502_v6 = vld [vmem:[#allocation20_spill] sm:$0xff]  ;;  %v8503_v7 = vld [vmem:[#allocation21_spill] sm:$0xff]  ;;  %v1990_v3 = vrot.slane %v6827_v1, 2 }
 0x400   :  { %5367 = vmatprep.subr.mxu1 %v8483_v62  ;;  %5330 = vmatprep.subr.mxu0 %v8483_v62 }
 0x401   :  { %5368 = vmatpush3.msra.mxu1 %v6032_v8  ;;  %5331 = vmatpush3.msra.mxu0 %v6041_v9  ;;  %v8504_v8 = vld [vmem:[#allocation22_spill] sm:$0xff]  ;;  %v8505_v9 = vld [vmem:[#allocation23_spill] sm:$0xff] }
 0x402   :  { %5369 = vmatprep.subr.mxu1 %v8483_v62  ;;  %5332 = vmatprep.subr.mxu0 %v8483_v62 }
 0x403   :  { %5370 = vmatpush3.msra.mxu1 %v6046_v10  ;;  %5333 = vmatpush3.msra.mxu0 %v6055_v11  ;;  %v8506_v10 = vld [vmem:[#allocation24_spill] sm:$0xff]  ;;  %v8507_v11 = vld [vmem:[#allocation25_spill] sm:$0xff] }
 0x404   :  { %5371 = vmatprep.subr.mxu1 %v8483_v62  ;;  %5334 = vmatprep.subr.mxu0 %v8483_v62 }
 0x405   :  { %5372 = vmatpush3.msra.mxu1 %v6060_v12  ;;  %5335 = vmatpush3.msra.mxu0 %v6069_v13  ;;  %v8508_v12 = vld [vmem:[#allocation26_spill] sm:$0xff]  ;;  %v8509_v13 = vld [vmem:[#allocation27_spill] sm:$0xff] }
 0x406   :  { %5373 = vmatprep.subr.mxu1 %v8483_v62  ;;  %5336 = vmatprep.subr.mxu0 %v8483_v62 }
 0x407   :  { %5374 = vmatpush3.msra.mxu1 %v6074_v14  ;;  %5337 = vmatpush3.msra.mxu0 %v6088_v16  ;;  %v8510_v14 = vld [vmem:[#allocation28_spill] sm:$0xff]  ;;  %v8511_v16 = vld [vmem:[#allocation29_spill] sm:$0xff] }
 0x408   :  { %5375 = vmatprep.subr.mxu1 %v8483_v62  ;;  %5338 = vmatprep.subr.mxu0 %v8483_v62 }
 0x409   :  { %5376 = vmatpush3.msra.mxu1 %v6093_v17  ;;  %5339 = vmatpush3.msra.mxu0 %v6109_v21  ;;  %v8512_v17 = vld [vmem:[#allocation30_spill] sm:$0xff]  ;;  %v8513_v21 = vld [vmem:[#allocation31_spill] sm:$0xff] }
 0x40a   :  { %5377 = vmatprep.subr.mxu1 %v8483_v62  ;;  %5340 = vmatprep.subr.mxu0 %v8483_v62 }
 0x40b   :  { %5378 = vmatpush3.msra.mxu1 %v6114_v22  ;;  %5341 = vmatpush3.msra.mxu0 %v6128_v24  ;;  %v6889_v22 = vld [vmem:[%s8452_s29 + $0x30] sm:$0xff] }
 0x40c   :  { %5379 = vmatprep.subr.mxu1 %v8483_v62  ;;  %5342 = vmatprep.subr.mxu0 %v8483_v62  ;;  %v8514_v24 = vld [vmem:[#allocation32_spill] sm:$0xff] }
 0x40d   :  { %5380 = vmatpush3.msra.mxu1 %v6133_v25  ;;  %5343 = vmatpush3.msra.mxu0 %v6142_v26  ;;  %v8515_v25 = vld [vmem:[#allocation33_spill] sm:$0xff]  ;;  %v1814_v26 = vrot.slane %v6889_v22, 1 }
 0x40e   :  { %5381 = vmatprep.subr.mxu1 %v8483_v62  ;;  %5344 = vmatprep.subr.mxu0 %v8483_v62 }
 0x40f   :  { %5382 = vmatpush3.msra.mxu1 %v6147_v27  ;;  %5345 = vmatpush3.msra.mxu0 %v6156_v28  ;;  %v8516_v27 = vld [vmem:[#allocation34_spill] sm:$0xff]  ;;  %v8517_v28 = vld [vmem:[#allocation35_spill] sm:$0xff] }
 0x410   :  { %5383 = vmatprep.subr.mxu1 %v8483_v62  ;;  %5346 = vmatprep.subr.mxu0 %v8483_v62  ;;  %8563 = vst [vmem:[#allocation35_spill] sm:$0xff] %v7498_v61 }
 0x411   :  { %5384 = vmatpush3.msra.mxu1 %v6161_v29  ;;  %5347 = vmatpush3.msra.mxu0 %v6170_v30  ;;  %v8518_v29 = vld [vmem:[#allocation36_spill] sm:$0xff]  ;;  %v8519_v30 = vld [vmem:[#allocation37_spill] sm:$0xff] }
 0x412   :  { %5385 = vmatprep.subr.mxu1 %v8483_v62  ;;  %5348 = vmatprep.subr.mxu0 %v8483_v62 }
 0x413   :  { %5386 = vmatpush3.msra.mxu1 %v6175_v31  ;;  %5349 = vmatpush3.msra.mxu0 %v6186_v34  ;;  %v6907_v31 = vld [vmem:[%s8452_s29 + $0x38] sm:$0xf]  ;;  %v1815_v34 = vsel %vm205_vm2, %v1812_v4, %v1814_v26  ;;  %v1991_v4 = vrot.slane %v6832_v2, 2 }
 0x414   :  { %5387 = vmatprep.subr.mxu1 %v8483_v62  ;;  %5350 = vmatprep.subr.mxu0 %v8483_v62  ;;  %v1816_v53 = vrot.slane %v6907_v31, 1 }
 0x415   :  { %5388 = vmatpush3.msra.mxu1 %v6191_v35  ;;  %5351 = vmatpush3.msra.mxu0 %v6200_v36  ;;  %v8520_v35 = vld [vmem:[#allocation38_spill] sm:$0xff]  ;;  %v8521_v36 = vld [vmem:[#allocation39_spill] sm:$0xff] }
 0x416   :  { %5352 = vmatprep.mubr.msk.f32.mxu0 %vm5862_vm0, %v8483_v62  ;;  %5389 = vmatprep.subr.mxu1 %v8483_v62  ;;  %v1817_v63 = vsel %vm205_vm2, %v1814_v26, %v1816_v53  ;;  %v1995_v26 = vrot.slane %v6907_v31, 2  ;;  %v8537_v53 = vld [vmem:[#allocation55_spill] sm:$0xff] }
 0x417   :  { %5353 = vmatmul.mubr.msk.f32.vlgmr.msra.gmra.mxu0 %vm213_vm3, %v1813_v5  ;;  %5390 = vmatpush3.msra.mxu1 %v8502_v6  ;;  %v8526_v5 = vld [vmem:[#allocation44_spill] sm:$0xff]  ;;  %v8527_v6 = vld [vmem:[#allocation45_spill] sm:$0xff] }
 0x418   :  { %5391 = vmatprep.mubr.msk.f32.mxu1 %vm5862_vm0, %v8483_v62  ;;  %5400 = vmatprep.subr.mxu0 %v8483_v62 }
 0x419   :  { %5392 = vmatmul.mubr.msk.f32.vlgmr.msra.gmra.mxu1 %vm213_vm3, %v6827_v1  ;;  %5401 = vmatpush3.msk.msra.mxu0 %vm220_vm1, %v8503_v7  ;;  %v2086_v7 = vrot.slane %v6827_v1, 3 }
 0x41a   :  { %5402 = vmatprep.subr.mxu0 %v8483_v62  ;;  %5439 = vmatprep.subr.mxu1 %v8483_v62 }
 0x41b   :  { %5403 = vmatpush3.msra.mxu0 %v8504_v8  ;;  %5440 = vmatpush3.msk.msra.mxu1 %vm220_vm1, %v8505_v9  ;;  %v2087_v8 = vrot.slane %v6832_v2, 3  ;;  %v8528_v9 = vld [vmem:[#allocation46_spill] sm:$0xff] }
 0x41c   :  { %5404 = vmatprep.subr.mxu0 %v8483_v62  ;;  %5441 = vmatprep.subr.mxu1 %v8483_v62 }
 0x41d   :  { %5405 = vmatpush3.msra.mxu0 %v8506_v10  ;;  %5442 = vmatpush3.msra.mxu1 %v8507_v11  ;;  %v8529_v10 = vld [vmem:[#allocation47_spill] sm:$0xff]  ;;  %v1992_v11 = vsel %vm409_vm4, %v1990_v3, %v1991_v4  ;;  %v8543_v3 = vld [vmem:[#allocation61_spill] sm:$0xff] }
 0x41e   :  { %5406 = vmatprep.subr.mxu0 %v8483_v62  ;;  %5443 = vmatprep.subr.mxu1 %v8483_v62 }
 0x41f   :  { %5407 = vmatpush3.msra.mxu0 %v8508_v12  ;;  %5444 = vmatpush3.msra.mxu1 %v8509_v13  ;;  %v8530_v12 = vld [vmem:[#allocation48_spill] sm:$0xff]  ;;  %v1993_v13 = vrot.slane %v6889_v22, 2 }
 0x420   :  { %5408 = vmatprep.subr.mxu0 %v8483_v62  ;;  %5445 = vmatprep.subr.mxu1 %v8483_v62 }
 0x421   :  { %5409 = vmatpush3.msra.mxu0 %v8510_v14  ;;  %5446 = vmatpush3.msra.mxu1 %v8511_v16  ;;  %v8531_v14 = vld [vmem:[#allocation49_spill] sm:$0xff]  ;;  %v2088_v16 = vsel %vm525_vm5, %v2086_v7, %v2087_v8  ;;  %v8545_v7 = vld [vmem:[#allocation63_spill] sm:$0xff] }
 0x422   :  { %5410 = vmatprep.subr.mxu0 %v8483_v62  ;;  %5447 = vmatprep.subr.mxu1 %v8483_v62 }
 0x423   :  { %5411 = vmatpush3.msra.mxu0 %v8512_v17  ;;  %5448 = vmatpush3.msra.mxu1 %v8513_v21  ;;  %v2089_v17 = vrot.slane %v6889_v22, 3  ;;  %v8532_v21 = vld [vmem:[#allocation50_spill] sm:$0xff] }
 0x424   :  { %5412 = vmatprep.subr.mxu0 %v8483_v62  ;;  %5449 = vmatprep.subr.mxu1 %v8483_v62 }
 0x425   :  { %5413 = vmatpush3.msra.mxu0 %v8514_v24  ;;  %5450 = vmatpush3.msra.mxu1 %v8515_v25  ;;  %v8533_v24 = vld [vmem:[#allocation51_spill] sm:$0xff]  ;;  %v1994_v25 = vsel %vm409_vm4, %v1991_v4, %v1993_v13  ;;  %v8544_v4 = vld [vmem:[#allocation62_spill] sm:$0xff] }
 0x426   :  { %5414 = vmatprep.subr.mxu0 %v8483_v62  ;;  %5451 = vmatprep.subr.mxu1 %v8483_v62 }
 0x427   :  { %5415 = vmatpush3.msra.mxu0 %v8516_v27  ;;  %5452 = vmatpush3.msra.mxu1 %v8517_v28  ;;  %v2090_v27 = vsel %vm525_vm5, %v2087_v8, %v2089_v17  ;;  %v2091_v28 = vrot.slane %v6907_v31, 3  ;;  %v8546_v8 = vld [vmem:[#allocation64_spill] sm:$0xff] }
 0x428   :  { %5416 = vmatprep.subr.mxu0 %v8483_v62  ;;  %5453 = vmatprep.subr.mxu1 %v8483_v62 }
 0x429   :  { %5417 = vmatpush3.msra.mxu0 %v8518_v29  ;;  %5454 = vmatpush3.msra.mxu1 %v8519_v30  ;;  %v8534_v29 = vld [vmem:[#allocation52_spill] sm:$0xff]  ;;  %v8535_v30 = vld [vmem:[#allocation53_spill] sm:$0xff] }
 0x42a   :  { %5418 = vmatprep.subr.mxu0 %v8483_v62  ;;  %5455 = vmatprep.subr.mxu1 %v8483_v62 }
 0x42b   :  { %5419 = vmatpush3.msra.mxu0 %v8520_v35  ;;  %5456 = vmatpush3.msra.mxu1 %v8521_v36  ;;  %v2092_v35 = vsel %vm525_vm5, %v2089_v17, %v2091_v28  ;;  %v8536_v36 = vld [vmem:[#allocation54_spill] sm:$0xff] }
 0x42c   :  { %5355 = vmatprep.mubr.msk.f32.mxu0 %vm5862_vm0, %v8483_v62  ;;  %5420 = vmatprep.subr.mxu0 %v8483_v62 }
 0x42d   :  { %5457 = vmatprep.subr.mxu1 %v8483_v62  ;;  %5356 = vmatmul.mubr.msk.f32.gmra.mxu0 %vm213_vm3, %v1815_v34  ;;  %v1996_v34 = vsel %vm409_vm4, %v1993_v13, %v1995_v26 }
 0x42e   :  { %5421 = vmatpush3.msra.mxu0 %v8522_v41  ;;  %5458 = vmatpush3.msra.mxu1 %v8523_v51  ;;  %v8538_v41 = vld [vmem:[#allocation56_spill] sm:$0xff]  ;;  %v8539_v51 = vld [vmem:[#allocation57_spill] sm:$0xff] }
 0x42f   :  { %5394 = vmatprep.mubr.msk.f32.mxu1 %vm5862_vm0, %v8483_v62  ;;  %5422 = vmatprep.subr.mxu0 %v8483_v62 }
 0x430   :  { %5459 = vmatprep.subr.mxu1 %v8483_v62  ;;  %5395 = vmatmul.mubr.msk.f32.gmra.mxu1 %vm213_vm3, %v6832_v2 }
 0x431   :  { %5423 = vmatpush3.msra.mxu0 %v8524_v0  ;;  %5460 = vmatpush3.msra.mxu1 %v8525_v20  ;;  %v8541_v0 = vld [vmem:[#allocation59_spill] sm:$0xff]  ;;  %v8542_v20 = vld [vmem:[#allocation60_spill] sm:$0xff] }
 0x432   :  { %5358 = vmatprep.mubr.msk.f32.mxu0 %vm5862_vm0, %v8483_v62  ;;  %5424 = vmatprep.subr.mxu0 %v8483_v62 }
 0x433   :  { %5461 = vmatprep.subr.mxu1 %v8483_v62  ;;  %5359 = vmatmul.mubr.msk.f32.gmra.mxu0 %vm213_vm3, %v1817_v63  ;;  %v8540_v63 = vld [vmem:[#allocation58_spill] sm:$0xff] }
 0x434   :  { %5425 = vmatpush3.msra.mxu0 %v8526_v5  ;;  %5462 = vmatpush3.msra.mxu1 %v8527_v6  ;;  %v2182_v5 = vrot.slane %v6827_v1, 4  ;;  %v2183_v6 = vrot.slane %v6832_v2, 4  ;;  %v2187_v2 = vrot.slane %v6907_v31, 4 }
 0x435   :  { %5397 = vmatprep.mubr.msk.f32.mxu1 %vm5862_vm0, %v8483_v62  ;;  %5426 = vmatprep.subr.mxu0 %v8483_v62 }
 0x436   :  { %5463 = vmatprep.subr.mxu1 %v8483_v62  ;;  %5398 = vmatmul.mubr.msk.f32.gmra.mxu1 %vm213_vm3, %v6889_v22 }
 0x437   :  { %5427 = vmatpush3.msra.mxu0 %v8528_v9  ;;  %5464 = vmatpush3.msra.mxu1 %v8529_v10  ;;  %v2184_v9 = vsel %vm220_vm1, %v2182_v5, %v2183_v6  ;;  %v2185_v10 = vrot.slane %v6889_v22, 4 }
 0x438   :  { %5428 = vmatprep.subr.mxu0 %v8483_v62  ;;  %5465 = vmatprep.subr.mxu1 %v8483_v62 }
 0x439   :  { %5429 = vmatpush3.msra.mxu0 %v8530_v12  ;;  %5430 = vmatprep.mubr.msk.f32.mxu0 %vm5862_vm0, %v8483_v62  ;;  %v2186_v1 = vsel %vm220_vm1, %v2183_v6, %v2185_v10  ;;  %v2188_v22 = vsel %vm220_vm1, %v2185_v10, %v2187_v2 }
 0x43a   :  { %5466 = vmatpush3.msra.mxu1 %v8531_v14  ;;  %5431 = vmatmul.mubr.msk.f32.vlgmr.msra.gmra.mxu0 %vm213_vm3, %v1992_v11  ;;  %v8547_v11 = vld [vmem:[#allocation65_spill] sm:$0xff] }
 0x43b   :  { %5467 = vmatprep.subr.mxu1 %v8483_v62  ;;  %5478 = vmatprep.subr.mxu0 %v8483_v62 }
 0x43c   :  { %5468 = vmatpush3.msra.mxu1 %v8532_v21  ;;  %5469 = vmatprep.mubr.msk.f32.mxu1 %vm5862_vm0, %v8483_v62 }
 0x43d   :  { %5479 = vmatpush3.msk.msra.mxu0 %vm220_vm1, %v8533_v24  ;;  %5470 = vmatmul.mubr.msk.f32.vlgmr.msra.gmra.mxu1 %vm213_vm3, %v2088_v16 }
 0x43e   :  { %5480 = vmatprep.subr.mxu0 %v8483_v62  ;;  %5433 = vmatprep.mubr.msk.f32.mxu0 %vm5862_vm0, %v8483_v62 }
 0x43f   :  { %5481 = vmatpush3.msra.mxu0 %v8534_v29  ;;  %5472 = vmatprep.mubr.msk.f32.mxu1 %vm5862_vm0, %v8483_v62 }
 0x440   :  { %5434 = vmatmul.mubr.msk.f32.gmra.mxu0 %vm213_vm3, %v1994_v25  ;;  %5482 = vmatprep.subr.mxu0 %v8483_v62 }
 0x441   :  { %5483 = vmatpush3.msra.mxu0 %v8535_v30  ;;  %5473 = vmatmul.mubr.msk.f32.gmra.mxu1 %vm213_vm3, %v2090_v27 }
 0x442   :  { %5484 = vmatprep.subr.mxu0 %v8483_v62  ;;  %5436 = vmatprep.mubr.msk.f32.mxu0 %vm5862_vm0, %v8483_v62 }
 0x443   :  { %5485 = vmatpush3.msra.mxu0 %v8536_v36  ;;  %5475 = vmatprep.mubr.msk.f32.mxu1 %vm5862_vm0, %v8483_v62 }
 0x444   :  { %5437 = vmatmul.mubr.msk.f32.gmra.mxu0 %vm213_vm3, %v1996_v34  ;;  %5486 = vmatprep.subr.mxu0 %v8483_v62 }
 0x445   :  { %5487 = vmatpush3.msra.mxu0 %v8537_v53  ;;  %5476 = vmatmul.mubr.msk.f32.gmra.mxu1 %vm213_vm3, %v2092_v35 }
 0x446   :  { %5488 = vmatprep.subr.mxu0 %v8483_v62  ;;  %5508 = vmatprep.mubr.msk.f32.mxu0 %vm5862_vm0, %v8483_v62 }
 0x447   :  { %5489 = vmatpush3.msra.mxu0 %v8538_v41  ;;  %5523 = vmatprep.mubr.msk.f32.mxu1 %vm752_vm7, %v6623_v60 }
 0x448   :  { %5490 = vmatprep.subr.mxu0 %v8483_v62 }
 0x449   :  { %5491 = vmatpush3.msra.mxu0 %v8539_v51 }
 0x44a   :  { %5492 = vmatprep.subr.mxu0 %v8483_v62 }
 0x44b   :  { %5493 = vmatpush3.msra.mxu0 %v8540_v63 }
 0x44c   :  { %5494 = vmatprep.subr.mxu0 %v8483_v62 }
 0x44d   :  { %5495 = vmatpush3.msra.mxu0 %v8541_v0 }
 0x44e   :  { %5496 = vmatprep.subr.mxu0 %v8483_v62 }
 0x44f   :  { %5497 = vmatpush3.msra.mxu0 %v8542_v20 }
 0x450   :  { %5498 = vmatprep.subr.mxu0 %v8483_v62 }
 0x451   :  { %5499 = vmatpush3.msra.mxu0 %v8543_v3 }
 0x452   :  { %5500 = vmatprep.subr.mxu0 %v8483_v62 }
 0x453   :  { %5501 = vmatpush3.msra.mxu0 %v8544_v4 }
 0x454   :  { %5502 = vmatprep.subr.mxu0 %v8483_v62 }
 0x455   :  { %5503 = vmatpush3.msra.mxu0 %v8545_v7 }
 0x456   :  { %5504 = vmatprep.subr.mxu0 %v8483_v62 }
 0x457   :  { %5505 = vmatpush3.msra.mxu0 %v8546_v8 }
 0x458   :  { %5506 = vmatprep.subr.mxu0 %v8483_v62 }
 0x459   :  { %5507 = vmatpush3.msra.mxu0 %v8547_v11 }
 0x45a   :  { %5509 = vmatmul.mubr.msk.f32.vlgmr.msra.gmra.mxu0 %vm213_vm3, %v2184_v9  ;;  %5560 = vmatprep.subr.mxu0 %v8483_v62 }
 0x45b   :  { %5511 = vmatprep.mubr.msk.f32.mxu0 %vm5862_vm0, %v8483_v62 }
 0x45e   :  { %5512 = vmatmul.mubr.msk.f32.gmra.mxu0 %vm213_vm3, %v2186_v1 }
 0x45f   :  { %5514 = vmatprep.mubr.msk.f32.mxu0 %vm5862_vm0, %v8483_v62 }
 0x462   :  { %5515 = vmatmul.mubr.msk.f32.gmra.mxu0 %vm213_vm3, %v2188_v22 }
 0x463   :  { %5562 = vmatprep.mubr.msk.f32.mxu0 %vm5862_vm0, %v8483_v62 }
 0x4b3   :  { %v7036_v12 = vpop.f32.mrf.mxu0  ;;  %v7038_v13 = vpop.f32.mrf.mxu1 }
 0x4b4   :  { %8548 = vst [vmem:[#allocation20_spill] sm:$0xff] %v7036_v12  ;;  %8549 = vst [vmem:[#allocation21_spill] sm:$0xff] %v7038_v13  ;;  %v7474_v13 = vld [vmem:[%s8324_s7 + $0x20] sm:$0xff]  ;;  %v7491_v12 = vld [vmem:[%s8324_s7 + $0x18] sm:$0xff] }
 0x4b5   :  { %v7040_v14 = vpop.f32.mrf.mxu0  ;;  %v7042_v16 = vpop.f32.mrf.mxu1  ;;  %8559 = vst [vmem:[#allocation31_spill] sm:$0xff] %v7474_v13  ;;  %8562 = vst [vmem:[#allocation34_spill] sm:$0xff] %v7491_v12 }
 0x4b6   :  { %8550 = vst [vmem:[#allocation22_spill] sm:$0xff] %v7040_v14  ;;  %8551 = vst [vmem:[#allocation23_spill] sm:$0xff] %v7042_v16  ;;  %v7479_v16 = vld [vmem:[%s8324_s7 + $0x30] sm:$0xff]  ;;  %v7486_v14 = vld [vmem:[%s8324_s7 + $0x8] sm:$0xff] }
 0x4b7   :  { %8560 = vst [vmem:[#allocation32_spill] sm:$0xff] %v7479_v16  ;;  %8561 = vst [vmem:[#allocation33_spill] sm:$0xff] %v7486_v14 }
 0x4b8   :  { %v7044_v31 = vpop.f32.mrf.mxu0 }
 0x4b9   :  { %8552 = vst [vmem:[#allocation24_spill] sm:$0xff] %v7044_v31  ;;  %v7046_v17 = vpop.f32.mrf.mxu1  ;;  %v7467_v31 = vld [vmem:[%s8324_s7 + $0x38] sm:$0xff] }
 0x4ba   :  { %8553 = vst [vmem:[#allocation25_spill] sm:$0xff] %v7046_v17  ;;  %v7048_v21 = vpop.f32.mrf.mxu0  ;;  %8558 = vst [vmem:[#allocation30_spill] sm:$0xff] %v7467_v31 }
 0x4bb   :  { %8554 = vst [vmem:[#allocation26_spill] sm:$0xff] %v7048_v21  ;;  %v7050_v24 = vpop.f32.mrf.mxu1 }
 0x4bc   :  { %8555 = vst [vmem:[#allocation27_spill] sm:$0xff] %v7050_v24 }
 0x4d7   :  { %v1890_v25 = vpop.f32.mrf.mxu0 }
 0x4d9   :  { %v1976_v26 = vpop.f32.mrf.mxu1  ;;  %v5354_v27 = vpop.f32.mrf.mxu0 }
 0x4da   :  { %v1977_v28 = vadd.f32 %v1976_v26, %v1890_v25 }
 0x4db   :  { %v5393_v29 = vpop.f32.mrf.mxu1 }
 0x4ed   :  { %v1895_v30 = vpop.f32.mrf.mxu0 }
 0x4ef   :  { %v5357_v34 = vpop.f32.mrf.mxu0 }
 0x4f0   :  { %v1981_v35 = vpop.f32.mrf.mxu1 }
 0x4f1   :  { %v1982_v2 = vadd.f32 %v1981_v35, %v1895_v30 }
 0x4f2   :  { %v5396_v36 = vpop.f32.mrf.mxu1 }
 0x4f3   :  { %v1900_v53 = vpop.f32.mrf.mxu0 }
 0x4f5   :  { %v5360_v41 = vpop.f32.mrf.mxu0 }
 0x4f6   :  { %v1986_v51 = vpop.f32.mrf.mxu1 }
 0x4f7   :  { %v1987_v25 = vadd.f32 %v1986_v51, %v1900_v53 }
 0x4f8   :  { %v5399_v63 = vpop.f32.mrf.mxu1 }
 0x4fa   :  { %v2069_v0 = vpop.f32.mrf.mxu0 }
 0x4fb   :  { %v2083_v29 = vadd.f32 %v2069_v0, %v1977_v28 }
 0x4fc   :  { %v5432_v20 = vpop.f32.mrf.mxu0 }
 0x4fd   :  { %v2165_v3 = vpop.f32.mrf.mxu1 }
 0x4fe   :  { %v2179_v20 = vadd.f32 %v2165_v3, %v2083_v29 }
 0x4ff   :  { %v5471_v4 = vpop.f32.mrf.mxu1 }
 0x500   :  { %v2074_v5 = vpop.f32.mrf.mxu0 }
 0x501   :  { %v2170_v6 = vpop.f32.mrf.mxu1  ;;  %v2084_v26 = vadd.f32 %v2074_v5, %v1982_v2 }
 0x502   :  { %v5435_v7 = vpop.f32.mrf.mxu0 }
 0x503   :  { %v5474_v8 = vpop.f32.mrf.mxu1  ;;  %v2180_v41 = vadd.f32 %v2170_v6, %v2084_v26 }
 0x504   :  { %v2079_v9 = vpop.f32.mrf.mxu0 }
 0x505   :  { %v2175_v10 = vpop.f32.mrf.mxu1  ;;  %v2085_v34 = vadd.f32 %v2079_v9, %v1987_v25 }
 0x506   :  { %v5438_v11 = vpop.f32.mrf.mxu0 }
 0x507   :  { %v5477_v1 = vpop.f32.mrf.mxu1  ;;  %v2181_v4 = vadd.f32 %v2175_v10, %v2085_v34 }
 0x51a   :  { %v2261_v22 = vpop.f32.mrf.mxu0 }
 0x51b   :  { %v2275_v7 = vadd.f32 %v2261_v22, %v2179_v20 }
 0x51c   :  { %v5510_v27 = vpop.f32.mrf.mxu0 }
 0x51d   :  { %v2278_v35 = vadd.f32 %v6629_v33, %v2275_v7 }
 0x51e   :  { %v2266_v36 = vpop.f32.mrf.mxu0 }
 0x51f   :  { %v2276_v17 = vadd.f32 %v2266_v36, %v2180_v41  ;;  %v2281_v28 = vmax.f32 %v2278_v35, 0.0  ;;  %v7210_v35 = vld [vmem:[%s8324_s7 + $0x180] sm:$0xff] }
 0x520   :  { %v5513_v63 = vpop.f32.mrf.mxu0 }
 0x521   :  { %v2279_v11 = vadd.f32 %v6629_v33, %v2276_v17 }
 0x522   :  { %v2271_v24 = vpop.f32.mrf.mxu0 }
 0x523   :  { %v2277_v8 = vadd.f32 %v2271_v24, %v2181_v4  ;;  %v2282_v51 = vmax.f32 %v2279_v11, 0.0 }
 0x524   :  { %v5516_v21 = vpop.f32.mrf.mxu0 }
 0x525   :  { %v2280_v30 = vadd.f32 %v6629_v33, %v2277_v8 }
 0x527   :  { %v2283_v53 = vmax.f32 %v2280_v30, 0.0 }
 0x529   :  { %5517 = vmatprep.subr.mxu1 %v2283_v53 }
 0x52a   :  { %5518 = vmatpush3.msra.mxu1 %v2283_v53 }
 0x52b   :  { %5519 = vmatprep.subr.mxu1 %v2282_v51 }
 0x52c   :  { %5520 = vmatpush3.msra.mxu1 %v2282_v51 }
 0x52d   :  { %5521 = vmatprep.subr.mxu1 %v2281_v28 }
 0x52e   :  { %5522 = vmatpush3.msra.mxu1 %v2281_v28 }
 0x52f   :  { %5524 = vmatmul.mubr.msk.f32.vlgmr.msra.gmra.mxu1 %vm752_vm7, %v6636_v43  ;;  %5526 = vmatprep.subr.mxu1 %v2283_v53 }
 0x530   :  { %5527 = vmatpush3.msra.mxu1 %v2283_v53  ;;  %5532 = vmatprep.mubr.msk.f32.mxu1 %vm752_vm7, %v6641_v37  ;;  %v7215_v53 = vld [vmem:[%s8324_s7 + $0x190] sm:$0xff] }
 0x531   :  { %5528 = vmatprep.subr.mxu1 %v2282_v51 }
 0x532   :  { %5529 = vmatpush3.msra.mxu1 %v2282_v51  ;;  %v7222_v51 = vld [vmem:[%s8324_s7 + $0x168] sm:$0xff] }
 0x533   :  { %5530 = vmatprep.subr.mxu1 %v2281_v28 }
 0x534   :  { %5531 = vmatpush3.msra.mxu1 %v2281_v28  ;;  %v7227_v28 = vld [vmem:[%s8324_s7 + $0x178] sm:$0xff] }
 0x535   :  { %5533 = vmatmul.mubr.msk.f32.vlgmr.msra.gmra.mxu1 %vm752_vm7, %v6649_v39  ;;  %5535 = vmatprep.subr.mxu1 %v8483_v62 }
 0x536   :  { %5536 = vmatpush3.msk.msra.mxu1 %vm409_vm4, %v6659_v40  ;;  %5537 = vmatprep.mubr.msk.f32.mxu1 %vm5862_vm0, %v8483_v62 }
 0x537   :  { %5540 = vmatprep.subr.mxu1 %v8483_v62 }
 0x5ef   :  { %v5525_v33 = vpop.f32.mrf.mxu1 }
 0x5f1   :  { %v2350_v43 = vpop.f32.mrf.mxu1 }
 0x5f5   :  { %v5534_v17 = vpop.f32.mrf.mxu1 }
 0x5f6   :  { %v2435_v21 = vmax.f32 %v5525_v33, %v5534_v17  ;;  %v7234_v33 = vld [vmem:[%s8324_s7 + $0x160] sm:$0xff]  ;;  %v7246_v17 = vld [vmem:[%s8324_s7 + $0x148] sm:$0xff] }
 0x5f7   :  { %v2425_v24 = vpop.f32.mrf.mxu1 }
 0x5f8   :  { %v2434_v0 = vmax.f32 %v2350_v43, %v2425_v24  ;;  %v2439_v3 = vrot.slane %v2435_v21, 1  ;;  %v2586_v6 = vrot.slane %v2435_v21, 2  ;;  %v2662_v10 = vrot.slane %v2435_v21, 3  ;;  %v7239_v43 = vld [vmem:[%s8324_s7 + $0x170] sm:$0xff]  ;;  %v7258_v24 = vld [vmem:[%s8324_s7 + $0x140] sm:$0xff] }
 0x5f9   :  { %v2738_v2 = vrot.slane %v2435_v21, 4  ;;  %v7251_v21 = vld [vmem:[%s8324_s7 + $0x158] sm:$0xff] }
 0x5fa   :  { %v2438_v5 = vrot.slane %v2434_v0, 1  ;;  %v2585_v40 = vrot.slane %v2434_v0, 2  ;;  %v2737_v1 = vrot.slane %v2434_v0, 4 }
 0x5fc   :  { %v2440_v39 = vsel %vm205_vm2, %v2438_v5, %v2439_v3  ;;  %v2587_v9 = vsel %vm409_vm4, %v2585_v40, %v2586_v6  ;;  %v7270_v3 = vld [vmem:[%s8324_s7 + $0x128] sm:$0xff]  ;;  %v7275_v5 = vld [vmem:[%s8324_s7 + $0x138] sm:$0xff]  ;;  %v7287_v40 = vld [vmem:[%s8324_s7 + $0x130] sm:$0xff] }
 0x5fd   :  { %5538 = vmatmul.mubr.msk.f32.vlgmr.msra.gmra.mxu1 %vm925_vm11, %v2440_v39  ;;  %v7282_v39 = vld [vmem:[%s8324_s7 + $0x120] sm:$0xff]  ;;  %v7294_v6 = vld [vmem:[%s8324_s7 + $0x108] sm:$0xff] }
 0x5fe   :  { %5541 = vmatpush3.msk.msra.mxu1 %vm409_vm4, %v6667_v52  ;;  %5542 = vmatprep.mubr.msk.f32.mxu1 %vm5862_vm0, %v8483_v62  ;;  %v2661_v52 = vrot.slane %v2434_v0, 3 }
 0x5ff   :  { %5545 = vmatprep.subr.mxu1 %v8483_v62 }
 0x601   :  { %5543 = vmatmul.mubr.msk.f32.vlgmr.msra.gmra.mxu1 %vm925_vm11, %v2434_v0  ;;  %v7263_v0 = vld [vmem:[%s8324_s7 + $0x150] sm:$0xff] }
 0x602   :  { %5546 = vmatpush3.msk.msra.mxu1 %vm409_vm4, %v6679_v38  ;;  %5547 = vmatprep.mubr.msk.f32.mxu1 %vm5862_vm0, %v8483_v62  ;;  %v2663_v38 = vsel %vm525_vm5, %v2661_v52, %v2662_v10  ;;  %v7306_v52 = vld [vmem:[%s8324_s7 + $0x100] sm:$0xff]  ;;  %v7311_v10 = vld [vmem:[%s8324_s7 + $0x110] sm:$0xff] }
 0x603   :  { %5550 = vmatprep.subr.mxu1 %v8483_v62 }
 0x605   :  { %5548 = vmatmul.mubr.msk.f32.vlgmr.msra.gmra.mxu1 %vm925_vm11, %v2587_v9  ;;  %v7299_v9 = vld [vmem:[%s8324_s7 + $0x118] sm:$0xff] }
 0x606   :  { %5551 = vmatpush3.msk.msra.mxu1 %vm409_vm4, %v6690_v55  ;;  %5552 = vmatprep.mubr.msk.f32.mxu1 %vm5862_vm0, %v8483_v62  ;;  %v2739_v55 = vsel %vm220_vm1, %v2737_v1, %v2738_v2  ;;  %v7323_v1 = vld [vmem:[%s8324_s7 + $0xf8] sm:$0xff]  ;;  %v7330_v2 = vld [vmem:[%s8324_s7 + $0xe0] sm:$0xff] }
 0x607   :  { %5555 = vmatprep.subr.mxu1 %v8483_v62 }
 0x609   :  { %5553 = vmatmul.mubr.msk.f32.vlgmr.msra.gmra.mxu1 %vm925_vm11, %v2663_v38  ;;  %v7318_v38 = vld [vmem:[%s8324_s7 + $0xe8] sm:$0xff] }
 0x60a   :  { %5556 = vmatpush3.msk.msra.mxu1 %vm409_vm4, %v6702_v47  ;;  %5557 = vmatprep.mubr.msk.f32.mxu1 %vm5862_vm0, %v8483_v62 }
 0x60b   :  { %5565 = vmatprep.subr.mxu1 %v8483_v62 }
 0x60d   :  { %5558 = vmatmul.mubr.msk.f32.vlgmr.msra.gmra.mxu1 %vm925_vm11, %v2739_v55  ;;  %v7335_v55 = vld [vmem:[%s8324_s7 + $0xf0] sm:$0xff] }
 0x60e   :  { %5567 = vmatprep.mubr.msk.f32.mxu1 %vm5862_vm0, %v8483_v62 }
 0x6bd   :  { %v2509_v22 = vpop.f32.mrf.mxu1 }
 0x6bf   :  { %v5539_v25 = vpop.f32.mrf.mxu1 }
 0x6c0   :  { %v7347_v25 = vld [vmem:[%s8324_s7 + $0xd8] sm:$0xff] }
 0x6c1   :  { %v2581_v26 = vpop.f32.mrf.mxu1 }
 0x6c2   :  { %v2582_v36 = vadd.f32 %v2581_v26, %v2509_v22  ;;  %v7342_v22 = vld [vmem:[%s8324_s7 + $0xc8] sm:$0xff]  ;;  %v7354_v26 = vld [vmem:[%s8324_s7 + $0xc0] sm:$0xff] }
 0x6c3   :  { %v5544_v27 = vpop.f32.mrf.mxu1 }
 0x6c4   :  { %v7359_v27 = vld [vmem:[%s8324_s7 + $0xd0] sm:$0xff] }
 0x6c5   :  { %v2656_v29 = vpop.f32.mrf.mxu1 }
 0x6c6   :  { %v2660_v41 = vadd.f32 %v2656_v29, %v2582_v36  ;;  %v7366_v29 = vld [vmem:[%s8324_s7 + $0xa8] sm:$0xff]  ;;  %v7378_v36 = vld [vmem:[%s8324_s7 + $0xa0] sm:$0xff] }
 0x6c7   :  { %v5549_v34 = vpop.f32.mrf.mxu1 }
 0x6c8   :  { %v7371_v34 = vld [vmem:[%s8324_s7 + $0xb8] sm:$0xff] }
 0x6c9   :  { %v2732_v47 = vpop.f32.mrf.mxu1 }
 0x6ca   :  { %v2736_v20 = vadd.f32 %v2732_v47, %v2660_v41  ;;  %v7383_v47 = vld [vmem:[%s8324_s7 + $0xb0] sm:$0xff]  ;;  %v7390_v41 = vld [vmem:[%s8324_s7 + $0x88] sm:$0xff] }
 0x6cb   :  { %v5554_v63 = vpop.f32.mrf.mxu1 }
 0x6cc   :  { %v7395_v63 = vld [vmem:[%s8324_s7 + $0x98] sm:$0xff] }
 0x6cd   :  { %v2808_v4 = vpop.f32.mrf.mxu1 }
 0x6ce   :  { %v2812_v7 = vadd.f32 %v2808_v4, %v2736_v20  ;;  %v7402_v20 = vld [vmem:[%s8324_s7 + $0x80] sm:$0xff]  ;;  %v7407_v4 = vld [vmem:[%s8324_s7 + $0x90] sm:$0xff] }
 0x6cf   :  { %v5559_v8 = vpop.f32.mrf.mxu1 }
 0x6d0   :  { %v2813_v11 = vadd.f32 %v6715_v18, %v2812_v7  ;;  %v7414_v7 = vld [vmem:[%s8324_s7 + $0x68] sm:$0xff]  ;;  %v7419_v8 = vld [vmem:[%s8324_s7 + $0x78] sm:$0xff] }
 0x6d2   :  { %v2814_v30 = vmax.f32 %v2813_v11, 0.0  ;;  %v7426_v11 = vld [vmem:[%s8324_s7 + $0x60] sm:$0xff] }
 0x6d4   :  { %5561 = vmatpush3.msra.mxu0 %v2814_v30  ;;  %5566 = vmatpush3.msra.mxu1 %v2814_v30  ;;  %v7431_v30 = vld [vmem:[%s8324_s7 + $0x70] sm:$0xff] }
 0x6d5   :  { %5563 = vmatmul.mubr.msk.f32.vlgmr.msra.gmra.mxu0 %vm1327_vm12, %v6623_v60  ;;  %5568 = vmatmul.mubr.msk.f32.vlgmr.msra.gmra.mxu1 %vm1327_vm12, %v6641_v37  ;;  %vm4590_vm12 = vcmask 9216  }
 0x6d6   :  { %2987 = vmatprep.subr.mxu0 %v6726_v50  ;;  %3058 = vmatprep.subr.mxu1 %v6731_v19  ;;  %v7124_v19 = vld [vmem:[%s8324_s7 + $0x1e8] sm:$0xff] }
 0x6d7   :  { %2988 = vmatpush1.msra.mxu0 %v6729_v48  ;;  %3059 = vmatpush1.msra.mxu1 %v6737_v44  ;;  %v7138_v44 = vld [vmem:[%s8324_s7 + $0x1e0] sm:$0xff] }
 0x6d8   :  { %2989 = vmatprep.subr.mxu0 %v6735_v56  ;;  %3060 = vmatprep.subr.mxu1 %v6743_v45  ;;  %v7129_v56 = vld [vmem:[%s8324_s7 + $0x1f8] sm:$0xff]  ;;  %v7150_v45 = vld [vmem:[%s8324_s7 + $0x1c8] sm:$0xff] }
 0x6d9   :  { %2990 = vmatpush1.msra.mxu0 %v6741_v54  ;;  %3061 = vmatpush1.msra.mxu1 %v6747_v46  ;;  %v7143_v54 = vld [vmem:[%s8324_s7 + $0x1f0] sm:$0xff]  ;;  %v7155_v46 = vld [vmem:[%s8324_s7 + $0x1d8] sm:$0xff] }
 0x6da   :  { %3023 = vmatprep.mubr.f32.mxu0 %v8483_v62  ;;  %3094 = vmatprep.mubr.f32.mxu1 %v8483_v62 }
 0x6db   :  { %3129 = vmatprep.subr.mxu0 %v6749_v49  ;;  %3200 = vmatprep.subr.mxu1 %v6753_v42  ;;  %v7162_v49 = vld [vmem:[%s8324_s7 + $0x1c0] sm:$0xff]  ;;  %v7167_v42 = vld [vmem:[%s8324_s7 + $0x1d0] sm:$0xff] }
 0x795   :  { %v2881_v60 = vpop.f32.mrf.mxu0  ;;  %v2951_v37 = vpop.f32.mrf.mxu1 }
 0x796   :  { %v2955_v18 = vmax.f32 %v2881_v60, %v2951_v37  ;;  %v7438_v60 = vld [vmem:[%s8324_s7 + $0x48] sm:$0xff]  ;;  %v7443_v37 = vld [vmem:[%s8324_s7 + $0x58] sm:$0xff] }
 0x797   :  { %v5564_v50 = vpop.f32.mrf.mxu0  ;;  %v5569_v48 = vpop.f32.mrf.mxu1 }
 0x798   :  { %4771 = vmatmul.mubr.msk.f32.vlgmr.msra.gmra.mxu0 %vm1514_vm13, %v2955_v18  ;;  %4772 = vmatmul.mubr.msk.f32.vlgmr.msra.gmra.mxu1 %vm1514_vm13, %v2955_v18  ;;  %v7455_v50 = vld [vmem:[%s8324_s7 + $0x50] sm:$0xff]  ;;  %v7462_v48 = vld [vmem:[%s8324_s7 + $0x28] sm:$0xff] }
 0x799   :  { %3130 = vmatpush1.msra.mxu0 %v6756_v57  ;;  %3201 = vmatpush1.msra.mxu1 %v6758_v59  ;;  %v7174_v57 = vld [vmem:[%s8324_s7 + $0x1a8] sm:$0xff]  ;;  %v7179_v59 = vld [vmem:[%s8324_s7 + $0x1b8] sm:$0xff]  ;;  %8556 = vst [vmem:[#allocation28_spill] sm:$0xff] %v7455_v50  ;;  %8557 = vst [vmem:[#allocation29_spill] sm:$0xff] %v7462_v48 }
 0x79a   :  { %3131 = vmatprep.subr.mxu0 %v6760_v32  ;;  %3202 = vmatprep.subr.mxu1 %v6762_v23  ;;  %v7186_v32 = vld [vmem:[%s8324_s7 + $0x1a0] sm:$0xff]  ;;  %v7191_v23 = vld [vmem:[%s8324_s7 + $0x1b0] sm:$0xff] }
 0x79b   :  { %3132 = vmatpush1.msra.mxu0 %v6766_v15  ;;  %3203 = vmatpush1.msra.mxu1 %v6770_v58  ;;  %v7198_v15 = vld [vmem:[%s8324_s7 + $0x188] sm:$0xff]  ;;  %v7203_v58 = vld [vmem:[%s8324_s7 + $0x198] sm:$0xff] }
 0x79c   :  { %3165 = vmatprep.mubr.f32.mxu0 %v8483_v62  ;;  %3236 = vmatprep.mubr.f32.mxu1 %v8483_v62 }
 0x79d   :  { %3371 = vmatprep.subr.mxu0 %v7124_v19  ;;  %3442 = vmatprep.subr.mxu1 %v7129_v56 }
 0x79e   :  { %4773 = vmatmul.mubr.msk.f32.vlgmr.msra.gmra.mxu0 %vm1514_vm13, %v2955_v18  ;;  %4774 = vmatmul.mubr.msk.f32.vlgmr.msra.gmra.mxu1 %vm1514_vm13, %v2955_v18  ;;  %v7450_v18 = vld [vmem:[%s8324_s7 + $0x40] sm:$0xff] }
 0x79f   :  { %3372 = vmatpush1.msra.mxu0 %v7138_v44  ;;  %3443 = vmatpush1.msra.mxu1 %v7143_v54 }
 0x7a0   :  { %3373 = vmatprep.subr.mxu0 %v7150_v45  ;;  %3444 = vmatprep.subr.mxu1 %v7155_v46 }
 0x7a1   :  { %3374 = vmatpush1.msra.mxu0 %v7162_v49  ;;  %3445 = vmatpush1.msra.mxu1 %v7167_v42 }
 0x7a2   :  { %3375 = vmatprep.subr.mxu0 %v7174_v57  ;;  %3446 = vmatprep.subr.mxu1 %v7179_v59 }
 0x7a3   :  { %3376 = vmatpush1.msra.mxu0 %v7186_v32  ;;  %3447 = vmatpush1.msra.mxu1 %v7191_v23 }
 0x7a4   :  { %3377 = vmatprep.subr.mxu0 %v7198_v15  ;;  %3448 = vmatprep.subr.mxu1 %v7203_v58 }
 0x7a5   :  { %3378 = vmatpush1.msra.mxu0 %v7210_v35  ;;  %3449 = vmatpush1.msra.mxu1 %v7215_v53 }
 0x7a6   :  { %3379 = vmatprep.subr.mxu0 %v7222_v51  ;;  %3450 = vmatprep.subr.mxu1 %v7227_v28 }
 0x7a7   :  { %3380 = vmatpush1.msra.mxu0 %v7234_v33  ;;  %3451 = vmatpush1.msra.mxu1 %v7239_v43 }
 0x7a8   :  { %3381 = vmatprep.subr.mxu0 %v7246_v17  ;;  %3452 = vmatprep.subr.mxu1 %v7251_v21 }
 0x7a9   :  { %3382 = vmatpush1.msra.mxu0 %v7258_v24  ;;  %3453 = vmatpush1.msra.mxu1 %v7263_v0 }
 0x7aa   :  { %3383 = vmatprep.subr.mxu0 %v7270_v3  ;;  %3454 = vmatprep.subr.mxu1 %v7275_v5 }
 0x7ab   :  { %3384 = vmatpush1.msra.mxu0 %v7282_v39  ;;  %3455 = vmatpush1.msra.mxu1 %v7287_v40 }
 0x7ac   :  { %3385 = vmatprep.subr.mxu0 %v7294_v6  ;;  %3456 = vmatprep.subr.mxu1 %v7299_v9 }
 0x7ad   :  { %3386 = vmatpush1.msra.mxu0 %v7306_v52  ;;  %3457 = vmatpush1.msra.mxu1 %v7311_v10 }
 0x7ae   :  { %3387 = vmatprep.subr.mxu0 %v7318_v38  ;;  %3458 = vmatprep.subr.mxu1 %v7323_v1 }
 0x7af   :  { %3388 = vmatpush1.msra.mxu0 %v7330_v2  ;;  %3459 = vmatpush1.msra.mxu1 %v7335_v55 }
 0x7b0   :  { %3389 = vmatprep.subr.mxu0 %v7342_v22  ;;  %3460 = vmatprep.subr.mxu1 %v7347_v25 }
 0x7b1   :  { %3390 = vmatpush1.msra.mxu0 %v7354_v26  ;;  %3461 = vmatpush1.msra.mxu1 %v7359_v27 }
 0x7b2   :  { %3391 = vmatprep.subr.mxu0 %v7366_v29  ;;  %3462 = vmatprep.subr.mxu1 %v7371_v34 }
 0x7b3   :  { %3392 = vmatpush1.msra.mxu0 %v7378_v36  ;;  %3463 = vmatpush1.msra.mxu1 %v7383_v47 }
 0x7b4   :  { %3393 = vmatprep.subr.mxu0 %v7390_v41  ;;  %3464 = vmatprep.subr.mxu1 %v7395_v63 }
 0x7b5   :  { %3394 = vmatpush1.msra.mxu0 %v7402_v20  ;;  %3465 = vmatpush1.msra.mxu1 %v7407_v4 }
 0x7b6   :  { %3395 = vmatprep.subr.mxu0 %v7414_v7  ;;  %3466 = vmatprep.subr.mxu1 %v7419_v8 }
 0x7b7   :  { %3396 = vmatpush1.msra.mxu0 %v7426_v11  ;;  %3467 = vmatpush1.msra.mxu1 %v7431_v30 }
 0x7b8   :  { %3397 = vmatprep.subr.mxu0 %v7438_v60  ;;  %3468 = vmatprep.subr.mxu1 %v7443_v37 }
 0x7b9   :  { %3398 = vmatpush1.msra.mxu0 %v7450_v18  ;;  %3469 = vmatpush1.msra.mxu1 %v7455_v50  ;;  %v7505_v50 = vld [vmem:[%s8324_s7 + $0x10] sm:$0xff] }
 0x7ba   :  { %3399 = vmatprep.subr.mxu0 %v7462_v48  ;;  %3470 = vmatprep.subr.mxu1 %v7467_v31  ;;  %8564 = vst [vmem:[#allocation36_spill] sm:$0xff] %v7505_v50  ;;  %v7514_v31 = vld [vmem:[%s8325_s8 + $0x1e8] sm:$0xff]  ;;  %v7555_v48 = vld [vmem:[%s8325_s8 + $0x1d0] sm:$0xff] }
 0x7bb   :  { %3400 = vmatpush1.msra.mxu0 %v7474_v13  ;;  %3471 = vmatpush1.msra.mxu1 %v7479_v16  ;;  %8565 = vst [vmem:[#allocation37_spill] sm:$0xff] %v7514_v31  ;;  %v7519_v16 = vld [vmem:[%s8325_s8 + $0x1f8] sm:$0xff]  ;;  %v7550_v13 = vld [vmem:[%s8325_s8 + $0x1c0] sm:$0xff]  ;;  %8572 = vst [vmem:[#allocation44_spill] sm:$0xff] %v7555_v48 }
 0x7bc   :  { %3401 = vmatprep.subr.mxu0 %v7486_v14  ;;  %3472 = vmatprep.subr.mxu1 %v7491_v12  ;;  %8566 = vst [vmem:[#allocation38_spill] sm:$0xff] %v7519_v16  ;;  %v7531_v12 = vld [vmem:[%s8325_s8 + $0x1f0] sm:$0xff]  ;;  %v7543_v14 = vld [vmem:[%s8325_s8 + $0x1d8] sm:$0xff]  ;;  %8571 = vst [vmem:[#allocation43_spill] sm:$0xff] %v7550_v13 }
 0x7bd   :  { %3402 = vmatpush1.msra.mxu0 %v7498_v61  ;;  %3435 = vmatprep.mubr.f32.mxu0 %v8483_v62  ;;  %v7526_v61 = vld [vmem:[%s8325_s8 + $0x1e0] sm:$0xff]  ;;  %8568 = vst [vmem:[#allocation40_spill] sm:$0xff] %v7531_v12  ;;  %8570 = vst [vmem:[#allocation42_spill] sm:$0xff] %v7543_v14 }
 0x7be   :  { %3473 = vmatpush1.msra.mxu1 %v7505_v50  ;;  %3506 = vmatprep.mubr.f32.mxu1 %v8483_v62  ;;  %8567 = vst [vmem:[#allocation39_spill] sm:$0xff] %v7526_v61  ;;  %v7538_v50 = vld [vmem:[%s8325_s8 + $0x1c8] sm:$0xff] }
 0x7bf   :  { %3436 = vmatmul.mubr.f32.vlgmr.msra.gmra.mxu0 %v8483_v62  ;;  %3507 = vmatmul.mubr.f32.vlgmr.msra.gmra.mxu1 %v8483_v62  ;;  %8569 = vst [vmem:[#allocation41_spill] sm:$0xff] %v7538_v50 }
 0x7c0   :  { %3529 = vmatprep.subr.mxu0 %v7514_v31  ;;  %3600 = vmatprep.subr.mxu1 %v7519_v16  ;;  %v7562_v31 = vld [vmem:[%s8325_s8 + $0x1a8] sm:$0xff]  ;;  %v7567_v16 = vld [vmem:[%s8325_s8 + $0x1b8] sm:$0xff] }
 0x7c1   :  { %3530 = vmatpush1.msra.mxu0 %v7526_v61  ;;  %3601 = vmatpush1.msra.mxu1 %v7531_v12  ;;  %8573 = vst [vmem:[#allocation45_spill] sm:$0xff] %v7562_v31  ;;  %8574 = vst [vmem:[#allocation46_spill] sm:$0xff] %v7567_v16  ;;  %v7574_v61 = vld [vmem:[%s8325_s8 + $0x1a0] sm:$0xff]  ;;  %v7579_v12 = vld [vmem:[%s8325_s8 + $0x1b0] sm:$0xff] }
 0x7c2   :  { %3531 = vmatprep.subr.mxu0 %v7538_v50  ;;  %3602 = vmatprep.subr.mxu1 %v7543_v14  ;;  %8575 = vst [vmem:[#allocation47_spill] sm:$0xff] %v7574_v61  ;;  %8576 = vst [vmem:[#allocation48_spill] sm:$0xff] %v7579_v12  ;;  %v7586_v50 = vld [vmem:[%s8325_s8 + $0x188] sm:$0xff]  ;;  %v7591_v14 = vld [vmem:[%s8325_s8 + $0x198] sm:$0xff] }
 0x7c3   :  { %3532 = vmatpush1.msra.mxu0 %v7550_v13  ;;  %3603 = vmatpush1.msra.mxu1 %v7555_v48  ;;  %8577 = vst [vmem:[#allocation49_spill] sm:$0xff] %v7586_v50  ;;  %8578 = vst [vmem:[#allocation50_spill] sm:$0xff] %v7591_v14  ;;  %v7598_v13 = vld [vmem:[%s8325_s8 + $0x180] sm:$0xff]  ;;  %v7603_v48 = vld [vmem:[%s8325_s8 + $0x190] sm:$0xff] }
 0x7c4   :  { %3533 = vmatprep.subr.mxu0 %v7562_v31  ;;  %3604 = vmatprep.subr.mxu1 %v7567_v16  ;;  %8579 = vst [vmem:[#allocation51_spill] sm:$0xff] %v7598_v13  ;;  %8580 = vst [vmem:[#allocation52_spill] sm:$0xff] %v7603_v48  ;;  %v7610_v31 = vld [vmem:[%s8325_s8 + $0x168] sm:$0xff]  ;;  %v7615_v16 = vld [vmem:[%s8325_s8 + $0x178] sm:$0xff] }
 0x7c5   :  { %3534 = vmatpush1.msra.mxu0 %v7574_v61  ;;  %3605 = vmatpush1.msra.mxu1 %v7579_v12  ;;  %8581 = vst [vmem:[#allocation53_spill] sm:$0xff] %v7610_v31  ;;  %8582 = vst [vmem:[#allocation54_spill] sm:$0xff] %v7615_v16  ;;  %v7622_v61 = vld [vmem:[%s8325_s8 + $0x160] sm:$0xff]  ;;  %v7627_v12 = vld [vmem:[%s8325_s8 + $0x170] sm:$0xff] }
 0x7c6   :  { %3535 = vmatprep.subr.mxu0 %v7586_v50  ;;  %3606 = vmatprep.subr.mxu1 %v7591_v14  ;;  %8583 = vst [vmem:[#allocation55_spill] sm:$0xff] %v7622_v61  ;;  %8584 = vst [vmem:[#allocation56_spill] sm:$0xff] %v7627_v12  ;;  %v7634_v50 = vld [vmem:[%s8325_s8 + $0x148] sm:$0xff]  ;;  %v7639_v14 = vld [vmem:[%s8325_s8 + $0x158] sm:$0xff] }
 0x7c7   :  { %3536 = vmatpush1.msra.mxu0 %v7598_v13  ;;  %3607 = vmatpush1.msra.mxu1 %v7603_v48  ;;  %8585 = vst [vmem:[#allocation57_spill] sm:$0xff] %v7634_v50  ;;  %8586 = vst [vmem:[#allocation58_spill] sm:$0xff] %v7639_v14  ;;  %v7646_v13 = vld [vmem:[%s8325_s8 + $0x140] sm:$0xff]  ;;  %v7651_v48 = vld [vmem:[%s8325_s8 + $0x150] sm:$0xff] }
 0x7c8   :  { %3537 = vmatprep.subr.mxu0 %v7610_v31  ;;  %3608 = vmatprep.subr.mxu1 %v7615_v16  ;;  %8587 = vst [vmem:[#allocation59_spill] sm:$0xff] %v7646_v13  ;;  %8588 = vst [vmem:[#allocation60_spill] sm:$0xff] %v7651_v48  ;;  %v7658_v31 = vld [vmem:[%s8325_s8 + $0x128] sm:$0xff]  ;;  %v7663_v16 = vld [vmem:[%s8325_s8 + $0x138] sm:$0xff] }
 0x7c9   :  { %3538 = vmatpush1.msra.mxu0 %v7622_v61  ;;  %3609 = vmatpush1.msra.mxu1 %v7627_v12  ;;  %8589 = vst [vmem:[#allocation61_spill] sm:$0xff] %v7658_v31  ;;  %8590 = vst [vmem:[#allocation62_spill] sm:$0xff] %v7663_v16  ;;  %v7670_v61 = vld [vmem:[%s8325_s8 + $0x120] sm:$0xff]  ;;  %v7675_v12 = vld [vmem:[%s8325_s8 + $0x130] sm:$0xff] }
 0x7ca   :  { %3539 = vmatprep.subr.mxu0 %v7634_v50  ;;  %3610 = vmatprep.subr.mxu1 %v7639_v14  ;;  %8591 = vst [vmem:[#allocation63_spill] sm:$0xff] %v7670_v61  ;;  %8592 = vst [vmem:[#allocation64_spill] sm:$0xff] %v7675_v12  ;;  %v7682_v50 = vld [vmem:[%s8325_s8 + $0x108] sm:$0xff]  ;;  %v7687_v14 = vld [vmem:[%s8325_s8 + $0x118] sm:$0xff] }
 0x7cb   :  { %3540 = vmatpush1.msra.mxu0 %v7646_v13  ;;  %3611 = vmatpush1.msra.mxu1 %v7651_v48  ;;  %8593 = vst [vmem:[#allocation65_spill] sm:$0xff] %v7682_v50  ;;  %8594 = vst [vmem:[#allocation67_spill] sm:$0xff] %v7687_v14  ;;  %v7694_v13 = vld [vmem:[%s8325_s8 + $0x100] sm:$0xff]  ;;  %v7699_v48 = vld [vmem:[%s8325_s8 + $0x110] sm:$0xff] }
 0x7cc   :  { %3541 = vmatprep.subr.mxu0 %v7658_v31  ;;  %3612 = vmatprep.subr.mxu1 %v7663_v16  ;;  %8595 = vst [vmem:[#allocation68_spill] sm:$0xff] %v7694_v13  ;;  %8596 = vst [vmem:[#allocation69_spill] sm:$0xff] %v7699_v48  ;;  %v7706_v31 = vld [vmem:[%s8325_s8 + $0xe8] sm:$0xff]  ;;  %v7711_v16 = vld [vmem:[%s8325_s8 + $0xf8] sm:$0xff] }
 0x7cd   :  { %3542 = vmatpush1.msra.mxu0 %v7670_v61  ;;  %3613 = vmatpush1.msra.mxu1 %v7675_v12  ;;  %8597 = vst [vmem:[#allocation70_spill] sm:$0xff] %v7706_v31  ;;  %8598 = vst [vmem:[#allocation71_spill] sm:$0xff] %v7711_v16  ;;  %v7718_v61 = vld [vmem:[%s8325_s8 + $0xe0] sm:$0xff]  ;;  %v7723_v12 = vld [vmem:[%s8325_s8 + $0xf0] sm:$0xff] }
 0x7ce   :  { %3543 = vmatprep.subr.mxu0 %v7682_v50  ;;  %3614 = vmatprep.subr.mxu1 %v7687_v14  ;;  %8599 = vst [vmem:[#allocation72_spill] sm:$0xff] %v7718_v61  ;;  %8600 = vst [vmem:[#allocation73_spill] sm:$0xff] %v7723_v12  ;;  %v7730_v50 = vld [vmem:[%s8325_s8 + $0xc8] sm:$0xff]  ;;  %v7735_v14 = vld [vmem:[%s8325_s8 + $0xd8] sm:$0xff] }
 0x7cf   :  { %3544 = vmatpush1.msra.mxu0 %v7694_v13  ;;  %3615 = vmatpush1.msra.mxu1 %v7699_v48  ;;  %8601 = vst [vmem:[#allocation74_spill] sm:$0xff] %v7730_v50  ;;  %8602 = vst [vmem:[#allocation75_spill] sm:$0xff] %v7735_v14  ;;  %v7742_v13 = vld [vmem:[%s8325_s8 + $0xc0] sm:$0xff]  ;;  %v7747_v48 = vld [vmem:[%s8325_s8 + $0xd0] sm:$0xff] }
 0x7d0   :  { %3545 = vmatprep.subr.mxu0 %v7706_v31  ;;  %3616 = vmatprep.subr.mxu1 %v7711_v16  ;;  %8603 = vst [vmem:[#allocation76_spill] sm:$0xff] %v7742_v13  ;;  %8604 = vst [vmem:[#allocation77_spill] sm:$0xff] %v7747_v48  ;;  %v7754_v31 = vld [vmem:[%s8325_s8 + $0xa8] sm:$0xff]  ;;  %v7759_v16 = vld [vmem:[%s8325_s8 + $0xb8] sm:$0xff] }
 0x7d1   :  { %3546 = vmatpush1.msra.mxu0 %v7718_v61  ;;  %3617 = vmatpush1.msra.mxu1 %v7723_v12  ;;  %8605 = vst [vmem:[#allocation78_spill] sm:$0xff] %v7754_v31  ;;  %8606 = vst [vmem:[#allocation79_spill] sm:$0xff] %v7759_v16  ;;  %v7766_v61 = vld [vmem:[%s8325_s8 + $0xa0] sm:$0xff]  ;;  %v7771_v12 = vld [vmem:[%s8325_s8 + $0xb0] sm:$0xff] }
 0x7d2   :  { %3547 = vmatprep.subr.mxu0 %v7730_v50  ;;  %3618 = vmatprep.subr.mxu1 %v7735_v14  ;;  %8607 = vst [vmem:[#allocation80_spill] sm:$0xff] %v7766_v61  ;;  %8608 = vst [vmem:[#allocation81_spill] sm:$0xff] %v7771_v12  ;;  %v7778_v50 = vld [vmem:[%s8325_s8 + $0x88] sm:$0xff]  ;;  %v7783_v14 = vld [vmem:[%s8325_s8 + $0x98] sm:$0xff] }
 0x7d3   :  { %3548 = vmatpush1.msra.mxu0 %v7742_v13  ;;  %3619 = vmatpush1.msra.mxu1 %v7747_v48  ;;  %8609 = vst [vmem:[#allocation82_spill] sm:$0xff] %v7778_v50  ;;  %8610 = vst [vmem:[#allocation83_spill] sm:$0xff] %v7783_v14  ;;  %v7790_v13 = vld [vmem:[%s8325_s8 + $0x80] sm:$0xff]  ;;  %v7795_v48 = vld [vmem:[%s8325_s8 + $0x90] sm:$0xff] }
 0x7d4   :  { %3549 = vmatprep.subr.mxu0 %v7754_v31  ;;  %3620 = vmatprep.subr.mxu1 %v7759_v16  ;;  %8611 = vst [vmem:[#allocation84_spill] sm:$0xff] %v7790_v13  ;;  %8612 = vst [vmem:[#allocation85_spill] sm:$0xff] %v7795_v48  ;;  %v7802_v31 = vld [vmem:[%s8325_s8 + $0x68] sm:$0xff]  ;;  %v7807_v16 = vld [vmem:[%s8325_s8 + $0x78] sm:$0xff] }
 0x7d5   :  { %3550 = vmatpush1.msra.mxu0 %v7766_v61  ;;  %3621 = vmatpush1.msra.mxu1 %v7771_v12  ;;  %8613 = vst [vmem:[#allocation86_spill] sm:$0xff] %v7802_v31  ;;  %8614 = vst [vmem:[#allocation87_spill] sm:$0xff] %v7807_v16  ;;  %v7814_v61 = vld [vmem:[%s8325_s8 + $0x60] sm:$0xff]  ;;  %v7819_v12 = vld [vmem:[%s8325_s8 + $0x70] sm:$0xff] }
 0x7d6   :  { %3551 = vmatprep.subr.mxu0 %v7778_v50  ;;  %3622 = vmatprep.subr.mxu1 %v7783_v14  ;;  %8615 = vst [vmem:[#allocation88_spill] sm:$0xff] %v7814_v61  ;;  %8616 = vst [vmem:[#allocation89_spill] sm:$0xff] %v7819_v12  ;;  %v7826_v50 = vld [vmem:[%s8325_s8 + $0x48] sm:$0xff]  ;;  %v7831_v14 = vld [vmem:[%s8325_s8 + $0x58] sm:$0xff] }
 0x7d7   :  { %3552 = vmatpush1.msra.mxu0 %v7790_v13  ;;  %3623 = vmatpush1.msra.mxu1 %v7795_v48  ;;  %8617 = vst [vmem:[#allocation90_spill] sm:$0xff] %v7826_v50  ;;  %8618 = vst [vmem:[#allocation91_spill] sm:$0xff] %v7831_v14  ;;  %v7838_v13 = vld [vmem:[%s8325_s8 + $0x40] sm:$0xff]  ;;  %v7843_v48 = vld [vmem:[%s8325_s8 + $0x50] sm:$0xff] }
 0x7d8   :  { %3553 = vmatprep.subr.mxu0 %v7802_v31  ;;  %3624 = vmatprep.subr.mxu1 %v7807_v16  ;;  %8619 = vst [vmem:[#allocation92_spill] sm:$0xff] %v7838_v13  ;;  %8620 = vst [vmem:[#allocation93_spill] sm:$0xff] %v7843_v48  ;;  %v7850_v31 = vld [vmem:[%s8325_s8 + $0x28] sm:$0xff]  ;;  %v7855_v16 = vld [vmem:[%s8325_s8 + $0x38] sm:$0xff] }
 0x7d9   :  { %3554 = vmatpush1.msra.mxu0 %v7814_v61  ;;  %3625 = vmatpush1.msra.mxu1 %v7819_v12  ;;  %v7862_v61 = vld [vmem:[%s8325_s8 + $0x20] sm:$0xff]  ;;  %v7867_v12 = vld [vmem:[%s8325_s8 + $0x30] sm:$0xff] }
 0x7da   :  { %3555 = vmatprep.subr.mxu0 %v7826_v50  ;;  %3626 = vmatprep.subr.mxu1 %v7831_v14  ;;  %v7874_v50 = vld [vmem:[%s8325_s8 + $0x8] sm:$0xff]  ;;  %v7879_v14 = vld [vmem:[%s8325_s8 + $0x18] sm:$0xff] }
 0x7db   :  { %3556 = vmatpush1.msra.mxu0 %v7838_v13  ;;  %3627 = vmatpush1.msra.mxu1 %v7843_v48  ;;  %v7886_v13 = vld [vmem:[%s8325_s8] sm:$0xff]  ;;  %v7893_v48 = vld [vmem:[%s8325_s8 + $0x10] sm:$0xff] }
 0x7dc   :  { %3557 = vmatprep.subr.mxu0 %v7850_v31  ;;  %3628 = vmatprep.subr.mxu1 %v7855_v16 }
 0x7dd   :  { %3558 = vmatpush1.msra.mxu0 %v7862_v61  ;;  %3629 = vmatpush1.msra.mxu1 %v7867_v12 }
 0x7de   :  { %3559 = vmatprep.subr.mxu0 %v7874_v50  ;;  %3630 = vmatprep.subr.mxu1 %v7879_v14 }
 0x7df   :  { %3560 = vmatpush1.msra.mxu0 %v7886_v13  ;;  %3593 = vmatprep.mubr.f32.mxu0 %v8483_v62 }
 0x7e0   :  { %3631 = vmatpush1.msra.mxu1 %v7893_v48  ;;  %3664 = vmatprep.mubr.f32.mxu1 %v8483_v62 }
 0x7e1   :  { %3594 = vmatmul.mubr.f32.vlgmr.msra.gmra.mxu0 %v8483_v62  ;;  %3665 = vmatmul.mubr.f32.vlgmr.msra.gmra.mxu1 %v8483_v62 }
 0x7e2   :  { %3739 = vmatprep.subr.mxu0 %v7124_v19  ;;  %3810 = vmatprep.subr.mxu1 %v7129_v56  ;;  %v8621_v19 = vld [vmem:[#allocation28_spill] sm:$0xff]  ;;  %v8622_v56 = vld [vmem:[#allocation29_spill] sm:$0xff] }
 0x7e3   :  { %3740 = vmatpush1.msra.mxu0 %v7138_v44  ;;  %3811 = vmatpush1.msra.mxu1 %v7143_v54  ;;  %v8623_v44 = vld [vmem:[#allocation30_spill] sm:$0xff]  ;;  %v8624_v54 = vld [vmem:[#allocation31_spill] sm:$0xff] }
 0x7e4   :  { %3741 = vmatprep.subr.mxu0 %v7150_v45  ;;  %3812 = vmatprep.subr.mxu1 %v7155_v46  ;;  %v8625_v45 = vld [vmem:[#allocation32_spill] sm:$0xff]  ;;  %v8626_v46 = vld [vmem:[#allocation33_spill] sm:$0xff] }
 0x7e5   :  { %3742 = vmatpush1.msra.mxu0 %v7162_v49  ;;  %3813 = vmatpush1.msra.mxu1 %v7167_v42  ;;  %v8627_v49 = vld [vmem:[#allocation34_spill] sm:$0xff]  ;;  %v8628_v42 = vld [vmem:[#allocation35_spill] sm:$0xff] }
 0x7e6   :  { %3743 = vmatprep.subr.mxu0 %v7174_v57  ;;  %3814 = vmatprep.subr.mxu1 %v7179_v59  ;;  %v8629_v57 = vld [vmem:[#allocation36_spill] sm:$0xff]  ;;  %v8630_v59 = vld [vmem:[#allocation37_spill] sm:$0xff] }
 0x7e7   :  { %3744 = vmatpush1.msra.mxu0 %v7186_v32  ;;  %3815 = vmatpush1.msra.mxu1 %v7191_v23  ;;  %v8631_v32 = vld [vmem:[#allocation38_spill] sm:$0xff] }
 0x7e8   :  { %3745 = vmatprep.subr.mxu0 %v7198_v15  ;;  %3816 = vmatprep.subr.mxu1 %v7203_v58 }
 0x7e9   :  { %3746 = vmatpush1.msra.mxu0 %v7210_v35  ;;  %3817 = vmatpush1.msra.mxu1 %v7215_v53  ;;  %v8632_v35 = vld [vmem:[#allocation66_spill] sm:$0xff] }
 0x7ea   :  { %3747 = vmatprep.subr.mxu0 %v7222_v51  ;;  %3818 = vmatprep.subr.mxu1 %v7227_v28  ;;  %v7978_v53 = vsub.s32 0, %v8632_v35  ;;  %v7985_v28 = vld [vmem:[%s8323_s6] sm:$0xff] }
 0x7eb   :  { %3748 = vmatpush1.msra.mxu0 %v7234_v33  ;;  %3819 = vmatpush1.msra.mxu1 %v7239_v43  ;;  %v7988_v43 = vsub.s32 1, %v8632_v35 }
 0x7ec   :  { %3749 = vmatprep.subr.mxu0 %v7246_v17  ;;  %3820 = vmatprep.subr.mxu1 %v7251_v21  ;;  %v7992_v17 = vrot.slane %v7985_v28, %v7978_v53 }
 0x7ed   :  { %3750 = vmatpush1.msra.mxu0 %v7258_v24  ;;  %3821 = vmatpush1.msra.mxu1 %v7263_v0  ;;  %v7998_v0 = vrot.slane %v7985_v28, %v7988_v43 }
 0x7ee   :  { %3751 = vmatprep.subr.mxu0 %v7270_v3  ;;  %3822 = vmatprep.subr.mxu1 %v7275_v5  ;;  %v8633_v5 = vld [vmem:[#allocation20_spill] sm:$0xff] }
 0x7ef   :  { %3752 = vmatpush1.msra.mxu0 %v7282_v39  ;;  %3823 = vmatpush1.msra.mxu1 %v7287_v40  ;;  %v1585_v39 = vadd.f32 %v8633_v5, %v7992_v17 }
 0x7f0   :  { %3753 = vmatprep.subr.mxu0 %v7294_v6  ;;  %3824 = vmatprep.subr.mxu1 %v7299_v9 }
 0x7f1   :  { %3754 = vmatpush1.msra.mxu0 %v7306_v52  ;;  %3825 = vmatpush1.msra.mxu1 %v7311_v10  ;;  %v8634_v52 = vld [vmem:[#allocation22_spill] sm:$0xff] }
 0x7f2   :  { %3755 = vmatprep.subr.mxu0 %v7318_v38  ;;  %3826 = vmatprep.subr.mxu1 %v7323_v1  ;;  %v1587_v10 = vadd.f32 %v8634_v52, %v7998_v0 }
 0x7f3   :  { %3756 = vmatpush1.msra.mxu0 %v7330_v2  ;;  %3827 = vmatpush1.msra.mxu1 %v7335_v55  ;;  %v8005_v55 = vsub.s32 3, %v8632_v35 }
 0x7f4   :  { %3757 = vmatprep.subr.mxu0 %v7342_v22  ;;  %3828 = vmatprep.subr.mxu1 %v7347_v25 }
 0x7f5   :  { %3758 = vmatpush1.msra.mxu0 %v7354_v26  ;;  %3829 = vmatpush1.msra.mxu1 %v7359_v27  ;;  %v8008_v26 = vsub.s32 2, %v8632_v35 }
 0x7f6   :  { %3759 = vmatprep.subr.mxu0 %v7366_v29  ;;  %3830 = vmatprep.subr.mxu1 %v7371_v34  ;;  %v8012_v34 = vrot.slane %v7985_v28, %v8005_v55 }
 0x7f7   :  { %3760 = vmatpush1.msra.mxu0 %v7378_v36  ;;  %3831 = vmatpush1.msra.mxu1 %v7383_v47  ;;  %v8016_v47 = vrot.slane %v7985_v28, %v8008_v26 }
 0x7f8   :  { %3761 = vmatprep.subr.mxu0 %v7390_v41  ;;  %3832 = vmatprep.subr.mxu1 %v7395_v63  ;;  %v8635_v41 = vld [vmem:[#allocation23_spill] sm:$0xff] }
 0x7f9   :  { %3762 = vmatpush1.msra.mxu0 %v7402_v20  ;;  %3833 = vmatpush1.msra.mxu1 %v7407_v4  ;;  %v1658_v63 = vadd.f32 %v8635_v41, %v8012_v34  ;;  %v5863_v41 = vmov 1983009808  }
 0x7fa   :  { %3763 = vmatprep.subr.mxu0 %v7414_v7  ;;  %3834 = vmatprep.subr.mxu1 %v7419_v8  ;;  %v8636_v7 = vld [vmem:[#allocation21_spill] sm:$0xff] }
 0x7fb   :  { %3764 = vmatpush1.msra.mxu0 %v7426_v11  ;;  %3835 = vmatpush1.msra.mxu1 %v7431_v30  ;;  %v1656_v8 = vadd.f32 %v8636_v7, %v8016_v47 }
 0x7fc   :  { %3765 = vmatprep.subr.mxu0 %v7438_v60  ;;  %3836 = vmatprep.subr.mxu1 %v7443_v37 }
 0x7fd   :  { %3766 = vmatpush1.msra.mxu0 %v7450_v18  ;;  %3837 = vmatpush1.msra.mxu1 %v8621_v19 }
 0x7fe   :  { %3767 = vmatprep.subr.mxu0 %v8622_v56  ;;  %3838 = vmatprep.subr.mxu1 %v8623_v44  ;;  %v1492_v56 = vsub.s32 4, %v8632_v35  ;;  %v1496_v44 = vsub.s32 5, %v8632_v35 }
 0x7ff   :  { %3768 = vmatpush1.msra.mxu0 %v8624_v54  ;;  %3839 = vmatpush1.msra.mxu1 %v8625_v45 }
 0x800   :  { %3769 = vmatprep.subr.mxu0 %v8626_v46  ;;  %3840 = vmatprep.subr.mxu1 %v8627_v49  ;;  %v8025_v54 = vrot.slane %v7985_v28, %v1492_v56  ;;  %v8028_v45 = vrot.slane %v7985_v28, %v1496_v44 }
 0x801   :  { %3770 = vmatpush1.msra.mxu0 %v8628_v42  ;;  %3841 = vmatpush1.msra.mxu1 %v8629_v57 }
 0x802   :  { %3803 = vmatprep.mubr.f32.mxu0 %v8483_v62  ;;  %3874 = vmatprep.mubr.f32.mxu1 %v8483_v62 }
 0x803   :  { %3897 = vmatprep.subr.mxu0 %v8630_v59  ;;  %3968 = vmatprep.subr.mxu1 %v8631_v32 }
 0x858   :  { %v7971_v23 = vpop.f32.mrf.mxu0  ;;  %v7973_v15 = vpop.f32.mrf.mxu1 }
 0x85a   :  { %v7975_v58 = vpop.f32.mrf.mxu0  ;;  %v7980_v51 = vpop.f32.mrf.mxu1 }
 0x85e   :  { %v3167_v33 = vpop.f32.mrf.mxu0  ;;  %v7994_v21 = vpop.f32.mrf.mxu1 }
 0x85f   :  { %v3168_v46 = vadd.f32 %v3167_v33, %v8025_v54 }
 0x860   :  { %v3169_v24 = vpop.f32.mrf.mxu0  ;;  %v3240_v40 = vpop.f32.mrf.mxu1 }
 0x861   :  { %v3170_v59 = vadd.f32 %v3169_v24, %v8028_v45 }
 0x87f   :  { %v3437_v3 = vpop.f32.mrf.mxu0  ;;  %v3508_v1 = vpop.f32.mrf.mxu1 }
 0x880   :  { %v3517_v6 = vrot.slane %v3437_v3, 5  ;;  %v3519_v20 = vrot.slane %v3508_v1, 5 }
 0x881   :  { %v3439_v9 = vpop.f32.mrf.mxu0  ;;  %v3510_v29 = vpop.f32.mrf.mxu1 }
 0x882   :  { %v3525_v38 = vadd.f32 %v3517_v6, %v1585_v39  ;;  %v3518_v2 = vrot.slane %v3439_v9, 5  ;;  %v3520_v36 = vrot.slane %v3510_v29, 5  ;;  %v3527_v11 = vadd.f32 %v3519_v20, %v1656_v8 }
 0x884   :  { %v4775_v22 = vmul.f32 -1.442695, %v3525_v38  ;;  %v3526_v25 = vadd.f32 %v3518_v2, %v1587_v10  ;;  %v3528_v4 = vadd.f32 %v3520_v36, %v1658_v63  ;;  %v1504_v10 = vsub.s32 7, %v8632_v35 }
 0x885   :  { %v3725_v63 = vunpack.c.l.s4 %v5863_v41 }
 0x886   :  { %5629 = vpow2.f32 %v4775_v22  ;;  %v4776_v27 = vmul.f32 -1.442695, %v3526_v25  ;;  %v4777_v30 = vmul.f32 -1.442695, %v3528_v4  ;;  %v8036_v25 = vrot.slane %v7985_v28, %v1504_v10  ;;  %v8647_v10 = vld [vmem:[#allocation49_spill] sm:$0xff] }
 0x887   :  { %v3726_v8 = vunpack.c.0.s8 %v3725_v63  ;;  %v8653_v63 = vld [vmem:[#allocation55_spill] sm:$0xff] }
 0x888   :  { %5631 = vpow2.f32 %v4776_v27  ;;  %v1500_v27 = vsub.s32 6, %v8632_v35  ;;  %v3241_v29 = vadd.f32 %v3240_v40, %v8036_v25 }
 0x889   :  { %5633 = vtanh.f32 %v3527_v11  ;;  %v8047_v40 = vsub.s32 %v3726_v8, %v8632_v35  ;;  %v8641_v35 = vld [vmem:[#allocation43_spill] sm:$0xff] }
 0x88a   :  { %5635 = vpow2.f32 %v4777_v30  ;;  %v8042_v20 = vrot.slane %v7985_v28, %v1500_v27  ;;  %v8651_v27 = vld [vmem:[#allocation53_spill] sm:$0xff] }
 0x88c   :  { %v3239_v4 = vadd.f32 %v7994_v21, %v8042_v20 }
 0x893   :  { %v5630_v60 = vpop.eup %5629 }
 0x894   :  { %v3678_v37 = vadd.f32 1.0, %v5630_v60 }
 0x895   :  { %v5632_v18 = vpop.eup %5631 }
 0x896   :  { %5637 = vrcp.f32 %v3678_v37  ;;  %v3684_v19 = vadd.f32 1.0, %v5632_v18  ;;  %v5634_v49 = vpop.eup %5633 }
 0x897   :  { %v5636_v57 = vpop.eup %5635 }
 0x898   :  { %5639 = vrcp.f32 %v3684_v19  ;;  %v3691_v38 = vadd.f32 1.0, %v5636_v57 }
 0x8a1   :  { %v3595_v42 = vpop.f32.mrf.mxu0  ;;  %v3666_v2 = vpop.f32.mrf.mxu1 }
 0x8a2   :  { %v3671_v32 = vadd.f32 %v3595_v42, %v3168_v46  ;;  %v3673_v30 = vadd.f32 %v3666_v2, %v3239_v4  ;;  %v8638_v42 = vld [vmem:[#allocation40_spill] sm:$0xff]  ;;  %v8649_v2 = vld [vmem:[#allocation51_spill] sm:$0xff] }
 0x8a3   :  { %v5638_v3 = vpop.eup %5637  ;;  %v3597_v5 = vpop.f32.mrf.mxu0  ;;  %v8654_v4 = vld [vmem:[#allocation56_spill] sm:$0xff] }
 0x8a4   :  { %v3695_v39 = vmul.f32 %v5638_v3, %v5634_v49  ;;  %v4778_v6 = vmul.f32 -1.442695, %v3671_v32  ;;  %v3672_v9 = vadd.f32 %v3597_v5, %v3170_v59  ;;  %v3668_v24 = vpop.f32.mrf.mxu1  ;;  %v8637_v49 = vld [vmem:[#allocation39_spill] sm:$0xff]  ;;  %v8639_v59 = vld [vmem:[#allocation41_spill] sm:$0xff]  ;;  %v8640_v32 = vld [vmem:[#allocation42_spill] sm:$0xff] }
 0x8a5   :  { %v5640_v52 = vpop.eup %5639  ;;  %v3674_v36 = vadd.f32 %v3668_v24, %v3241_v29  ;;  %v8642_v3 = vld [vmem:[#allocation44_spill] sm:$0xff]  ;;  %v8643_v5 = vld [vmem:[#allocation45_spill] sm:$0xff]  ;;  %v8652_v29 = vld [vmem:[#allocation54_spill] sm:$0xff] }
 0x8a6   :  { %v3694_v1 = vmul.f32 0.0, %v5640_v52  ;;  %5641 = vpow2.f32 %v4778_v6  ;;  %v4779_v22 = vmul.f32 -1.442695, %v3672_v9  ;;  %v8645_v6 = vld [vmem:[#allocation47_spill] sm:$0xff]  ;;  %v8646_v9 = vld [vmem:[#allocation48_spill] sm:$0xff] }
 0x8a7   :  { %v4780_v7 = vmul.f32 -1.442695, %v3674_v36 }
 0x8a8   :  { %v8033_v33 = vadd.f32 %v3695_v39, %v3694_v1  ;;  %5643 = vpow2.f32 %v4779_v22  ;;  %v8644_v39 = vld [vmem:[#allocation46_spill] sm:$0xff]  ;;  %v8650_v22 = vld [vmem:[#allocation52_spill] sm:$0xff] }
 0x8a9   :  { %5645 = vrcp.f32 %v3691_v38  ;;  %v8648_v38 = vld [vmem:[#allocation50_spill] sm:$0xff] }
 0x8aa   :  { %5647 = vtanh.f32 %v8033_v33 }
 0x8ab   :  { %5649 = vpow2.f32 %v4780_v7 }
 0x8b3   :  { %v5642_v11 = vpop.eup %5641 }
 0x8b4   :  { %v3702_v60 = vadd.f32 1.0, %v5642_v11  ;;  %v8655_v11 = vld [vmem:[#allocation57_spill] sm:$0xff] }
 0x8b5   :  { %v5644_v37 = vpop.eup %5643 }
 0x8b6   :  { %v5646_v18 = vpop.eup %5645  ;;  %5651 = vrcp.f32 %v3702_v60  ;;  %v3708_v19 = vadd.f32 1.0, %v5644_v37  ;;  %v8657_v60 = vld [vmem:[#allocation59_spill] sm:$0xff]  ;;  %v8658_v37 = vld [vmem:[#allocation60_spill] sm:$0xff] }
 0x8b7   :  { %v5648_v56 = vpop.eup %5647  ;;  %5653 = vtanh.f32 %v3673_v30  ;;  %v8656_v30 = vld [vmem:[#allocation58_spill] sm:$0xff] }
 0x8b8   :  { %5655 = vrcp.f32 %v3708_v19  ;;  %v3698_v28 = vmul.f32 %v5648_v56, %v5646_v18  ;;  %v5650_v52 = vpop.eup %5649  ;;  %v8659_v19 = vld [vmem:[#allocation61_spill] sm:$0xff]  ;;  %v8660_v56 = vld [vmem:[#allocation62_spill] sm:$0xff] }
 0x8b9   :  { %v3715_v41 = vadd.f32 1.0, %v5650_v52  ;;  %v8676_v52 = vld [vmem:[#allocation79_spill] sm:$0xff] }
 0x8ba   :  { %v3730_v44 = vrot.slane %v3698_v28, %v8047_v40  ;;  %v3737_v21 = vrot.slane %v3698_v28, 3  ;;  %v8661_v28 = vld [vmem:[#allocation63_spill] sm:$0xff] }
 0x8bb   :  { %5657 = vrcp.f32 %v3715_v41  ;;  %v8686_v41 = vld [vmem:[#allocation89_spill] sm:$0xff] }
 0x8bc   :  { %v3731_v46 = vcombine.high %v3730_v44, %v3730_v44  ;;  %3804 = vmatmul.mubr.f32.vlgmr.msra.gmra.mxu0 %v3737_v21  ;;  %3875 = vmatmul.mubr.f32.vlgmr.msra.gmra.mxu1 %v3737_v21  ;;  %v8662_v44 = vld [vmem:[#allocation64_spill] sm:$0xff]  ;;  %v8663_v21 = vld [vmem:[#allocation65_spill] sm:$0xff] }
 0x8bd   :  { %3898 = vmatpush1.msra.mxu0 %v8637_v49  ;;  %3969 = vmatpush1.msra.mxu1 %v8638_v42  ;;  %v8665_v49 = vld [vmem:[#allocation68_spill] sm:$0xff]  ;;  %v8666_v42 = vld [vmem:[#allocation69_spill] sm:$0xff] }
 0x8be   :  { %v4781_v57 = vrot.slane %v3731_v46, 9  ;;  %3899 = vmatprep.subr.mxu0 %v8639_v59  ;;  %3970 = vmatprep.subr.mxu1 %v8640_v32  ;;  %v8664_v46 = vld [vmem:[#allocation67_spill] sm:$0xff]  ;;  %v8669_v32 = vld [vmem:[#allocation72_spill] sm:$0xff] }
 0x8bf   :  { %3900 = vmatpush1.msra.mxu0 %v8641_v35  ;;  %3971 = vmatpush1.msra.mxu1 %v8642_v3  ;;  %v8668_v59 = vld [vmem:[#allocation71_spill] sm:$0xff]  ;;  %v8670_v35 = vld [vmem:[#allocation73_spill] sm:$0xff]  ;;  %v8671_v3 = vld [vmem:[#allocation74_spill] sm:$0xff] }
 0x8c0   :  { %3735 = vst [vmem:[#allocation2] sm:$0x1] %v4781_v57  ;;  %3901 = vmatprep.subr.mxu0 %v8643_v5  ;;  %3972 = vmatprep.subr.mxu1 %v8644_v39  ;;  %v8667_v57 = vld [vmem:[#allocation70_spill] sm:$0xff]  ;;  %v8672_v5 = vld [vmem:[#allocation75_spill] sm:$0xff]  ;;  %v8673_v39 = vld [vmem:[#allocation76_spill] sm:$0xff] }
 0x8c1   :  { %3902 = vmatpush1.msra.mxu0 %v8645_v6  ;;  %3973 = vmatpush1.msra.mxu1 %v8646_v9  ;;  %v8674_v6 = vld [vmem:[#allocation77_spill] sm:$0xff]  ;;  %v8675_v9 = vld [vmem:[#allocation78_spill] sm:$0xff] }
 0x8c2   :  { %3903 = vmatprep.subr.mxu0 %v8647_v10  ;;  %3974 = vmatprep.subr.mxu1 %v8648_v38  ;;  %v8677_v10 = vld [vmem:[#allocation80_spill] sm:$0xff]  ;;  %v8678_v38 = vld [vmem:[#allocation81_spill] sm:$0xff] }
 0x8c3   :  { %v5652_v1 = vpop.eup %5651  ;;  %3904 = vmatpush1.msra.mxu0 %v8649_v2  ;;  %3975 = vmatpush1.msra.mxu1 %v8650_v22  ;;  %v8680_v2 = vld [vmem:[#allocation83_spill] sm:$0xff]  ;;  %v8681_v22 = vld [vmem:[#allocation84_spill] sm:$0xff] }
 0x8c4   :  { %v5654_v24 = vpop.eup %5653  ;;  %3905 = vmatprep.subr.mxu0 %v8651_v27  ;;  %3976 = vmatprep.subr.mxu1 %v8652_v29  ;;  %v8683_v27 = vld [vmem:[#allocation86_spill] sm:$0xff]  ;;  %v8684_v29 = vld [vmem:[#allocation87_spill] sm:$0xff] }
 0x8c5   :  { %v5656_v36 = vpop.eup %5655  ;;  %3906 = vmatpush1.msra.mxu0 %v8653_v63  ;;  %3977 = vmatpush1.msra.mxu1 %v8654_v4  ;;  %v3719_v8 = vmul.f32 %v5654_v24, %v5652_v1  ;;  %v8679_v1 = vld [vmem:[#allocation82_spill] sm:$0xff]  ;;  %v8682_v24 = vld [vmem:[#allocation85_spill] sm:$0xff] }
 0x8c6   :  { %v3718_v7 = vmul.f32 0.0, %v5656_v36  ;;  %3907 = vmatprep.subr.mxu0 %v8655_v11  ;;  %3978 = vmatprep.subr.mxu1 %v8656_v30  ;;  %v8685_v36 = vld [vmem:[#allocation88_spill] sm:$0xff]  ;;  %v8687_v4 = vld [vmem:[#allocation90_spill] sm:$0xff]  ;;  %v8690_v30 = vld [vmem:[#allocation93_spill] sm:$0xff] }
 0x8c7   :  { %3908 = vmatpush1.msra.mxu0 %v8657_v60  ;;  %3979 = vmatpush1.msra.mxu1 %v8658_v37  ;;  %v8689_v11 = vld [vmem:[#allocation92_spill] sm:$0xff]  ;;  %v4133_v37 = vld [vmem:[%s8326_s9 + $0xd8] sm:$0xff] }
 0x8c8   :  { %v8072_v18 = vadd.f32 %v3719_v8, %v3718_v7  ;;  %3909 = vmatprep.subr.mxu0 %v8659_v19  ;;  %3980 = vmatprep.subr.mxu1 %v8660_v56  ;;  %v5658_v63 = vpop.eup %5657  ;;  %v8688_v7 = vld [vmem:[#allocation91_spill] sm:$0xff]  ;;  %v4117_v19 = vld [vmem:[%s8326_s9 + $0x58] sm:$0xff]  ;;  %v4132_v56 = vld [vmem:[%s8326_s9 + $0xd0] sm:$0xff] }
 0x8c9   :  { %3910 = vmatpush1.msra.mxu0 %v8661_v28  ;;  %3981 = vmatpush1.msra.mxu1 %v8662_v44  ;;  %v4116_v28 = vld [vmem:[%s8326_s9 + $0x50] sm:$0xff]  ;;  %v4131_v44 = vld [vmem:[%s8326_s9 + $0xc8] sm:$0xff] }
 0x8ca   :  { %5659 = vtanh.f32 %v8072_v18  ;;  %3911 = vmatprep.subr.mxu0 %v8663_v21  ;;  %3982 = vmatprep.subr.mxu1 %v8664_v46  ;;  %v4115_v21 = vld [vmem:[%s8326_s9 + $0x48] sm:$0xff]  ;;  %v4130_v46 = vld [vmem:[%s8326_s9 + $0xc0] sm:$0xff] }
 0x8cb   :  { %3912 = vmatpush1.msra.mxu0 %v8665_v49  ;;  %3983 = vmatpush1.msra.mxu1 %v8666_v42  ;;  %v4114_v49 = vld [vmem:[%s8326_s9 + $0x40] sm:$0xff]  ;;  %v4129_v42 = vld [vmem:[%s8326_s9 + $0xb8] sm:$0xff] }
 0x8cc   :  { %3913 = vmatprep.subr.mxu0 %v8667_v57  ;;  %3984 = vmatprep.subr.mxu1 %v8668_v59  ;;  %v4113_v57 = vld [vmem:[%s8326_s9 + $0x38] sm:$0xff]  ;;  %v4128_v59 = vld [vmem:[%s8326_s9 + $0xb0] sm:$0xff] }
 0x8cd   :  { %3914 = vmatpush1.msra.mxu0 %v8669_v32  ;;  %3985 = vmatpush1.msra.mxu1 %v8670_v35  ;;  %v4112_v32 = vld [vmem:[%s8326_s9 + $0x30] sm:$0xff]  ;;  %v4127_v35 = vld [vmem:[%s8326_s9 + $0xa8] sm:$0xff] }
 0x8ce   :  { %3915 = vmatprep.subr.mxu0 %v8671_v3  ;;  %3986 = vmatprep.subr.mxu1 %v8672_v5  ;;  %v4111_v3 = vld [vmem:[%s8326_s9 + $0x28] sm:$0xff]  ;;  %v4126_v5 = vld [vmem:[%s8326_s9 + $0xa0] sm:$0xff] }
 0x8cf   :  { %3916 = vmatpush1.msra.mxu0 %v8673_v39  ;;  %3987 = vmatpush1.msra.mxu1 %v8674_v6  ;;  %v4110_v39 = vld [vmem:[%s8326_s9 + $0x20] sm:$0xff]  ;;  %v4125_v6 = vld [vmem:[%s8326_s9 + $0x98] sm:$0xff] }
 0x8d0   :  { %3917 = vmatprep.subr.mxu0 %v8675_v9  ;;  %3988 = vmatprep.subr.mxu1 %v8676_v52  ;;  %v4109_v9 = vld [vmem:[%s8326_s9 + $0x18] sm:$0xff]  ;;  %v4124_v52 = vld [vmem:[%s8326_s9 + $0x90] sm:$0xff] }
 0x8d1   :  { %3918 = vmatpush1.msra.mxu0 %v8677_v10  ;;  %3989 = vmatpush1.msra.mxu1 %v8678_v38  ;;  %v4108_v10 = vld [vmem:[%s8326_s9 + $0x10] sm:$0xff]  ;;  %v4123_v38 = vld [vmem:[%s8326_s9 + $0x88] sm:$0xff] }
 0x8d2   :  { %3919 = vmatprep.subr.mxu0 %v8679_v1  ;;  %3990 = vmatprep.subr.mxu1 %v8680_v2  ;;  %v4107_v1 = vld [vmem:[%s8326_s9 + $0x8] sm:$0xff]  ;;  %v4122_v2 = vld [vmem:[%s8326_s9 + $0x80] sm:$0xff] }
 0x8d3   :  { %3920 = vmatpush1.msra.mxu0 %v8681_v22  ;;  %3991 = vmatpush1.msra.mxu1 %v8682_v24  ;;  %v4106_v22 = vld [vmem:[%s8326_s9] sm:$0xff]  ;;  %v4234_v24 = vld [vmem:[%s8328_s11 + $0x38] sm:$0xff] }
 0x8d4   :  { %3921 = vmatprep.subr.mxu0 %v8683_v27  ;;  %3992 = vmatprep.subr.mxu1 %v8684_v29  ;;  %v4233_v27 = vld [vmem:[%s8328_s11 + $0x30] sm:$0xff]  ;;  %v4232_v29 = vld [vmem:[%s8328_s11 + $0x28] sm:$0xff] }
 0x8d5   :  { %3922 = vmatpush1.msra.mxu0 %v8685_v36  ;;  %3993 = vmatpush1.msra.mxu1 %v8686_v41  ;;  %v3026_v41 = vadd.f32 %v7971_v23, %v7992_v17  ;;  %v3097_v17 = vadd.f32 %v7973_v15, %v8016_v47 }
 0x8d6   :  { %3923 = vmatprep.subr.mxu0 %v8687_v4  ;;  %3994 = vmatprep.subr.mxu1 %v8688_v7  ;;  %v3028_v7 = vadd.f32 %v7975_v58, %v7998_v0 }
 0x8d7   :  { %v5660_v8 = vpop.eup %5659  ;;  %3924 = vmatpush1.msra.mxu0 %v8689_v11  ;;  %3995 = vmatpush1.msra.mxu1 %v8690_v30 }
 0x8d8   :  { %3925 = vmatprep.subr.mxu0 %v7850_v31  ;;  %3996 = vmatprep.subr.mxu1 %v7855_v16  ;;  %v3722_v60 = vmul.f32 %v5660_v8, %v5658_v63  ;;  %v4135_v16 = vld [vmem:[%s8326_s9 + $0xe8] sm:$0xff] }
 0x8d9   :  { %3926 = vmatpush1.msra.mxu0 %v7862_v61  ;;  %3997 = vmatpush1.msra.mxu1 %v7867_v12  ;;  %v4137_v61 = vld [vmem:[%s8326_s9 + $0xf8] sm:$0xff]  ;;  %v4119_v31 = vld [vmem:[%s8326_s9 + $0x68] sm:$0xff] }
 0x8da   :  { %3927 = vmatprep.subr.mxu0 %v7874_v50  ;;  %3998 = vmatprep.subr.mxu1 %v7879_v14  ;;  %3736 = vst [vmem:[#allocation2 + $0x3] sm:$0x1] %v3722_v60  ;;  %v4121_v12 = vld [vmem:[%s8326_s9 + $0x78] sm:$0xff]  ;;  %v4120_v14 = vld [vmem:[%s8326_s9 + $0x70] sm:$0xff]  ;;  %v4134_v50 = vld [vmem:[%s8326_s9 + $0xe0] sm:$0xff] }
 0x8db   :  { %3928 = vmatpush1.msra.mxu0 %v7886_v13  ;;  %3961 = vmatprep.mubr.f32.mxu0 %v8483_v62  ;;  %v4136_v13 = vld [vmem:[%s8326_s9 + $0xf0] sm:$0xff] }
 0x8dc   :  { %3999 = vmatpush1.msra.mxu1 %v7893_v48  ;;  %4032 = vmatprep.mubr.f32.mxu1 %v8483_v62  ;;  %v4118_v48 = vld [vmem:[%s8326_s9 + $0x60] sm:$0xff] }
 0x8dd   :  { %3962 = vmatmul.mubr.f32.vlgmr.msra.gmra.mxu0 %v3722_v60  ;;  %4033 = vmatmul.mubr.f32.vlgmr.msra.gmra.mxu1 %v3722_v60 }
 0x8de   :  { %5570 = vmatprep.subr.mxu1 %v8483_v62  ;;  %5586 = vmatprep.mubr.msk.f32.mxu1 %vm5862_vm0, %v8483_v62 }
 0x8df   :  { %5027 = vmatprep.subr.mxu0 %v4137_v61  ;;  %5571 = vmatpush3.msra.mxu1 %v4234_v24 }
 0x8e0   :  { %5028 = vmatpush3.msra.mxu0 %v4121_v12  ;;  %5572 = vmatprep.subr.mxu1 %v8483_v62 }
 0x8e1   :  { %5029 = vmatprep.subr.mxu0 %v4136_v13  ;;  %5573 = vmatpush3.msra.mxu1 %v4233_v27 }
 0x8e2   :  { %5030 = vmatpush3.msra.mxu0 %v4120_v14  ;;  %5574 = vmatprep.subr.mxu1 %v8483_v62 }
 0x8e3   :  { %5031 = vmatprep.subr.mxu0 %v4135_v16  ;;  %5575 = vmatpush3.msra.mxu1 %v4232_v29  ;;  %v3099_v16 = vadd.f32 %v7980_v51, %v8012_v34  ;;  %v8692_v34 = vld [vmem:[#allocation26_spill] sm:$0xff] }
 0x8e4   :  { %5032 = vmatpush3.msra.mxu0 %v4119_v31  ;;  %5576 = vmatprep.subr.mxu1 %v8483_v62 }
 0x8e5   :  { %5033 = vmatprep.subr.mxu0 %v4134_v50 }
 0x8e6   :  { %5034 = vmatpush3.msra.mxu0 %v4118_v48 }
 0x8e7   :  { %5035 = vmatprep.subr.mxu0 %v4133_v37 }
 0x8e8   :  { %5036 = vmatpush3.msra.mxu0 %v4117_v19 }
 0x8e9   :  { %5037 = vmatprep.subr.mxu0 %v4132_v56  ;;  %v8691_v56 = vld [vmem:[#allocation24_spill] sm:$0xff] }
 0x8ea   :  { %5038 = vmatpush3.msra.mxu0 %v4116_v28  ;;  %v1727_v28 = vadd.f32 %v8691_v56, %v8025_v54 }
 0x8eb   :  { %5039 = vmatprep.subr.mxu0 %v4131_v44 }
 0x8ec   :  { %5040 = vmatpush3.msra.mxu0 %v4115_v21  ;;  %v1729_v21 = vadd.f32 %v8692_v34, %v8028_v45  ;;  %v8693_v45 = vld [vmem:[#allocation27_spill] sm:$0xff] }
 0x8ed   :  { %5041 = vmatprep.subr.mxu0 %v4130_v46  ;;  %v4791_v34 = vld [vmem:[#allocation11] ss:$0 sm:$0xff] }
 0x8ee   :  { %5042 = vmatpush3.msra.mxu0 %v4114_v49 }
 0x8ef   :  { %5043 = vmatprep.subr.mxu0 %v4129_v42 }
 0x8f0   :  { %5044 = vmatpush3.msra.mxu0 %v4113_v57 }
 0x8f1   :  { %5045 = vmatprep.subr.mxu0 %v4128_v59 }
 0x8f2   :  { %5046 = vmatpush3.msra.mxu0 %v4112_v32 }
 0x8f3   :  { %5047 = vmatprep.subr.mxu0 %v4127_v35 }
 0x8f4   :  { %5048 = vmatpush3.msra.mxu0 %v4111_v3 }
 0x8f5   :  { %5049 = vmatprep.subr.mxu0 %v4126_v5 }
 0x8f6   :  { %5050 = vmatpush3.msra.mxu0 %v4110_v39 }
 0x8f7   :  { %5051 = vmatprep.subr.mxu0 %v4125_v6 }
 0x8f8   :  { %5052 = vmatpush3.msra.mxu0 %v4109_v9  ;;  %v1800_v9 = vadd.f32 %v8693_v45, %v8036_v25 }
 0x8f9   :  { %5053 = vmatprep.subr.mxu0 %v4124_v52 }
 0x8fa   :  { %5054 = vmatpush3.msra.mxu0 %v4108_v10  ;;  %v8694_v10 = vld [vmem:[#allocation25_spill] sm:$0xff] }
 0x8fb   :  { %5055 = vmatprep.subr.mxu0 %v4123_v38  ;;  %v1798_v38 = vadd.f32 %v8694_v10, %v8042_v20  ;;  %v5867_v10 = vmov 2475754826  }
 0x8fc   :  { %5056 = vmatpush3.msra.mxu0 %v4107_v1 }
 0x8fd   :  { %5057 = vmatprep.subr.mxu0 %v4122_v2 }
 0x8fe   :  { %5058 = vmatpush3.msra.mxu0 %v4106_v22 }
 0x97c   :  { %v3805_v36 = vpop.f32.mrf.mxu0  ;;  %v3876_v11 = vpop.f32.mrf.mxu1 }
 0x97d   :  { %v3885_v63 = vrot.slane %v3805_v36, 5  ;;  %v3887_v31 = vrot.slane %v3876_v11, 5 }
 0x97e   :  { %v3807_v4 = vpop.f32.mrf.mxu0  ;;  %v3878_v13 = vpop.f32.mrf.mxu1 }
 0x97f   :  { %v3893_v8 = vadd.f32 %v3885_v63, %v3026_v41  ;;  %v3886_v30 = vrot.slane %v3807_v4, 5  ;;  %v3888_v14 = vrot.slane %v3878_v13, 5  ;;  %v3895_v50 = vadd.f32 %v3887_v31, %v3097_v17  ;;  %v4229_v17 = vld [vmem:[%s8328_s11 + $0x10] sm:$0xff] }
 0x981   :  { %v4782_v60 = vmul.f32 -1.442695, %v3893_v8  ;;  %v3894_v61 = vadd.f32 %v3886_v30, %v3028_v7  ;;  %v3896_v23 = vadd.f32 %v3888_v14, %v3099_v16 }
 0x983   :  { %5661 = vpow2.f32 %v4782_v60  ;;  %v4783_v12 = vmul.f32 -1.442695, %v3894_v61  ;;  %v4784_v58 = vmul.f32 -1.442695, %v3896_v23  ;;  %v4231_v23 = vld [vmem:[%s8328_s11 + $0x20] sm:$0xff] }
 0x984   :  { %5577 = vmatpush3.msra.mxu1 %v4231_v23 }
 0x985   :  { %5663 = vpow2.f32 %v4783_v12  ;;  %5578 = vmatprep.subr.mxu1 %v8483_v62 }
 0x986   :  { %5665 = vtanh.f32 %v3895_v50  ;;  %v4228_v50 = vld [vmem:[%s8328_s11 + $0x8] sm:$0xff] }
 0x987   :  { %5667 = vpow2.f32 %v4784_v58  ;;  %v4227_v58 = vld [vmem:[%s8328_s11] sm:$0xff] }
 0x990   :  { %v5662_v0 = vpop.eup %5661 }
 0x991   :  { %v4046_v48 = vadd.f32 1.0, %v5662_v0 }
 0x992   :  { %v5664_v37 = vpop.eup %5663 }
 0x993   :  { %5669 = vrcp.f32 %v4046_v48  ;;  %v4052_v19 = vadd.f32 1.0, %v5664_v37  ;;  %v5666_v51 = vpop.eup %5665  ;;  %v4789_v48 = vld [vmem:[#allocation9] ss:$0 sm:$0xff] }
 0x994   :  { %v5668_v15 = vpop.eup %5667 }
 0x995   :  { %5671 = vrcp.f32 %v4052_v19  ;;  %v4059_v35 = vadd.f32 1.0, %v5668_v15 }
 0x99d   :  { %v3963_v44 = vpop.f32.mrf.mxu0  ;;  %v4034_v3 = vpop.f32.mrf.mxu1 }
 0x99e   :  { %v4039_v46 = vadd.f32 %v3963_v44, %v1727_v28  ;;  %v4041_v1 = vadd.f32 %v4034_v3, %v1798_v38  ;;  %v5864_v44 = vmov 1  }
 0x99f   :  { %v3965_v47 = vpop.f32.mrf.mxu0  ;;  %v4036_v6 = vpop.f32.mrf.mxu1  ;;  %5623 = vset.pattern.permute.xlu1 %v5864_v44 }
 0x9a0   :  { %v5670_v49 = vpop.eup %5669  ;;  %v4785_v42 = vmul.f32 -1.442695, %v4039_v46  ;;  %v4040_v57 = vadd.f32 %v3965_v47, %v1729_v21  ;;  %v4042_v52 = vadd.f32 %v4036_v6, %v1800_v9  ;;  %v5866_v9 = vmov 683565275  }
 0x9a1   :  { %v4063_v59 = vmul.f32 %v5670_v49, %v5666_v51  ;;  %v5865_v51 = vmov 0  }
 0x9a2   :  { %v5672_v32 = vpop.eup %5671  ;;  %5673 = vpow2.f32 %v4785_v42  ;;  %v4786_v5 = vmul.f32 -1.442695, %v4040_v57  ;;  %v4787_v2 = vmul.f32 -1.442695, %v4042_v52  ;;  %5622 = vset.pattern.permute.xlu0 %v5865_v51 }
 0x9a3   :  { %v4062_v39 = vmul.f32 %v5672_v32, %v8033_v33 }
 0x9a4   :  { %5675 = vpow2.f32 %v4786_v5 }
 0x9a5   :  { %v4064_v54 = vadd.f32 %v4063_v59, %v4062_v39  ;;  %5677 = vrcp.f32 %v4059_v35 }
 0x9a7   :  { %5679 = vtanh.f32 %v4064_v54 }
 0x9a8   :  { %5681 = vtanh.f32 %v4041_v1 }
 0x9a9   :  { %5683 = vpow2.f32 %v4787_v2  ;;  %v5868_v2 = vmov 2131351028  }
 0x9af   :  { %v5674_v22 = vpop.eup %5673 }
 0x9b0   :  { %v4070_v24 = vadd.f32 1.0, %v5674_v22 }
 0x9b1   :  { %v5676_v27 = vpop.eup %5675 }
 0x9b2   :  { %5685 = vrcp.f32 %v4070_v24  ;;  %v4076_v33 = vadd.f32 1.0, %v5676_v27  ;;  %v5678_v29 = vpop.eup %5677  ;;  %v5869_v27 = vmov 2102212464  }
 0x9b4   :  { %v5680_v36 = vpop.eup %5679  ;;  %5687 = vrcp.f32 %v4076_v33 }
 0x9b5   :  { %v4066_v41 = vmul.f32 %v5680_v36, %v5678_v29  ;;  %v5682_v7 = vpop.eup %5681  ;;  %v5870_v36 = vmov 920167782  }
 0x9b6   :  { %v5684_v20 = vpop.eup %5683 }
 0x9b7   :  { %v4098_v25 = vrot.slane %v4066_v41, %v8047_v40  ;;  %v4083_v60 = vadd.f32 1.0, %v5684_v20 }
 0x9b9   :  { %v4099_v63 = vcombine.high %v4098_v25, %v4098_v25  ;;  %5689 = vrcp.f32 %v4083_v60 }
 0x9bb   :  { %v4788_v4 = vrot.slane %v4099_v63, 9  ;;  %v5871_v63 = vmov 1326507024  }
 0x9bd   :  { %4103 = vst [vmem:[#allocation2 + $0x1] sm:$0x1] %v4788_v4 }
 0x9bf   :  { %v5686_v8 = vpop.eup %5685 }
 0x9c0   :  { %v4087_v11 = vmul.f32 %v5686_v8, %v5682_v7 }
 0x9c1   :  { %v5688_v30 = vpop.eup %5687 }
 0x9c2   :  { %v4086_v61 = vmul.f32 %v5688_v30, %v8072_v18  ;;  %v4230_v18 = vld [vmem:[%s8328_s11 + $0x18] sm:$0xff] }
 0x9c3   :  { %5579 = vmatpush3.msra.mxu1 %v4230_v18 }
 0x9c4   :  { %v4088_v12 = vadd.f32 %v4087_v11, %v4086_v61  ;;  %5580 = vmatprep.subr.mxu1 %v8483_v62 }
 0x9c5   :  { %5581 = vmatpush3.msra.mxu1 %v4229_v17 }
 0x9c6   :  { %5691 = vtanh.f32 %v4088_v12  ;;  %v5690_v13 = vpop.eup %5689  ;;  %5582 = vmatprep.subr.mxu1 %v8483_v62 }
 0x9c7   :  { %5583 = vmatpush3.msra.mxu1 %v4228_v50 }
 0x9c8   :  { %5584 = vmatprep.subr.mxu1 %v8483_v62 }
 0x9c9   :  { %5585 = vmatpush3.msra.mxu1 %v4227_v58 }
 0x9ca   :  { %5589 = vmatprep.subr.mxu1 %v8483_v62 }
 0x9d3   :  { %v5692_v14 = vpop.eup %5691 }
 0x9d4   :  { %v4090_v16 = vmul.f32 %v5692_v14, %v5690_v13 }
 0x9d6   :  { %4104 = vst [vmem:[#allocation2 + $0x2] sm:$0x1] %v4090_v16 }
 0x9dd   :  { %v4790_v31 = vld.sshfl [vmem:[#allocation2] sm:$0x33 pattern:$0x76325410] }
 0x9de   :  { %v4153_v40 = vcombine.high %v4790_v31, %v4790_v31 }
 0x9e0   :  { %4220 = vmatprep.mubr.f32.mxu0 %v4153_v40 }
 0x9e1   :  { %4221 = vmatmul.mubr.f32.vlgmr.msra.gmra.mxu0 %v4790_v31 }
 0xaa1   :  { %v5059_v0 = vpop.f32.mrf.mxu0 }
 0xaa3   :  { %v5060_v37 = vpop.f32.mrf.mxu0 }
 0xaa4   :  { %v5061_v19 = vadd.f32 %v5060_v37, %v5059_v0 }
 0xaa6   :  { %v4223_v56 = vadd.f32 %v5061_v19, %v4789_v48 }
 0xaa8   :  { %v4226_v28 = vmax.f32 %v4223_v56, 0.0 }
 0xaaa   :  { %5587 = vmatmul.mubr.msk.f32.vlgmr.msra.gmra.mxu1 %vm4242_vm14, %v4226_v28 }
 0xaab   :  { %5593 = vmatprep.mubr.msk.f32.mxu1 %vm5862_vm0, %v8483_v62 }
 0xb6a   :  { %v4312_v21 = vpop.f32.mrf.mxu1 }
 0xb6b   :  { %v4313_v46 = vadd.f32 %v4791_v34, %v4312_v21 }
 0xb6c   :  { %v5588_v15 = vpop.f32.mrf.mxu1 }
 0xb6d   :  { %5693 = vtanh.f32 %v4313_v46 }
 0xb7a   :  { %v5694_v47 = vpop.eup %5693 }
 0xb7b   :  { %v4317_v49 = vmul.f32 1.5707964, %v5694_v47 }
 0xb7d   :  { %v8270_v42 = vmul.f32 0.5, %v4317_v49 }
 0xb7f   :  { %v4322_v57 = vand.u32 2139095040, %v8270_v42  ;;  %v4319_v3 = vand.u32 2147483647, %v8270_v42  ;;  %vm4321_vm6 = vcmp.lt.s32.totalorder %v8270_v42, 0  ;;  %vm4411_vm11 = vweird.f32 %v8270_v42 }
 0xb81   :  { %v4323_v59 = vshrl.u32 %v4322_v57, 23  ;;  %v4326_v54 = vand.u32 8388607, %v4319_v3  ;;  %vm4320_vm7 = vcmp.le.f32.partialorder %v4319_v3, 0.7853982 }
 0xb83   :  { %v4793_v32 = vadd.s32 4294967169, %v4323_v59  ;;  %v4327_v7 = vor.u32 8388608, %v4326_v54 }
 0xb85   :  { %v4329_v35 = vadd.s32 1, %v4793_v32  ;;  %v4367_v18 = vshll.u32 %v4327_v7, 8 }
 0xb87   :  { %vm4330_vm15 = vcmp.gt.s32.totalorder %v4329_v35, 0 }
 0xb88   :  { %v4331_v5 = vsel %vm4330_vm15, %v4329_v35, 0 }
 0xb89   :  { %v4333_v39 = vand.u32 31, %v4331_v5  ;;  %v4332_v45 = vshrl.u32 %v4331_v5, 5 }
 0xb8b   :  { %v4334_v6 = vsub.s32 32, %v4333_v39  ;;  %v4336_v52 = vshll.u32 %v5866_v9, %v4333_v39  ;;  %v4339_v38 = vshll.u32 %v5867_v10, %v4333_v39  ;;  %v4342_v24 = vshll.u32 %v5868_v2, %v4333_v39 }
 0xb8c   :  { %v4345_v29 = vshll.u32 %v5869_v27, %v4333_v39  ;;  %v4348_v25 = vshll.u32 %v5870_v36, %v4333_v39  ;;  %vm4351_vm0 = vcmp.lt.s32.totalorder %v4332_v45, 1  ;;  %vm4354_vm1 = vcmp.lt.s32.totalorder %v4332_v45, 4 }
 0xb8d   :  { %v4337_v1 = vshrl.u32 %v5867_v10, %v4334_v6  ;;  %v4340_v22 = vshrl.u32 %v5868_v2, %v4334_v6  ;;  %v4343_v33 = vshrl.u32 %v5869_v27, %v4334_v6  ;;  %v4346_v41 = vshrl.u32 %v5870_v36, %v4334_v6 }
 0xb8e   :  { %v4349_v4 = vshrl.u32 %v5871_v63, %v4334_v6  ;;  %v4335_v14 = vshrl.u32 %v5866_v9, %v4334_v6  ;;  %vm4353_vm2 = vcmp.lt.s32.totalorder %v4332_v45, 3  ;;  %vm4352_vm3 = vcmp.lt.s32.totalorder %v4332_v45, 2 }
 0xb8f   :  { %v4338_v20 = vor.u32 %v4337_v1, %v4336_v52  ;;  %v4341_v8 = vor.u32 %v4340_v22, %v4339_v38  ;;  %v4344_v11 = vor.u32 %v4343_v33, %v4342_v24  ;;  %v4347_v30 = vor.u32 %v4346_v41, %v4345_v29 }
 0xb90   :  { %v4350_v60 = vor.u32 %v4349_v4, %v4348_v25 }
 0xb91   :  { %v4356_v61 = vsel %vm4354_vm1, %v4344_v11, 2102212464  ;;  %v4359_v12 = vsel %vm4351_vm0, %v4338_v20, %v4341_v8  ;;  %v4363_v13 = vsel %vm4351_vm0, %v4341_v8, %v4344_v11  ;;  %v4360_v16 = vsel %vm4354_vm1, %v4347_v30, 920167782 }
 0xb92   :  { %v4364_v31 = vsel %vm4354_vm1, %v4350_v60, 1326507024  ;;  %v4361_v40 = vsel %vm4353_vm2, %v4344_v11, %v4360_v16  ;;  %v4355_v17 = vsel %vm4351_vm0, %v4335_v14, %v4338_v20  ;;  %v4357_v50 = vsel %vm4353_vm2, %v4341_v8, %v4356_v61 }
 0xb93   :  { %v4365_v23 = vsel %vm4353_vm2, %v4347_v30, %v4364_v31  ;;  %v4362_v58 = vsel %vm4352_vm3, %v4359_v12, %v4361_v40  ;;  %v4358_v28 = vsel %vm4352_vm3, %v4355_v17, %v4357_v50  ;;  %v5872_v16 = vmov 2   ;;  %v4508_v40 = vld [vmem:[%s8331_s14] sm:$0xff] }
 0xb94   :  { %v4366_v0 = vsel %vm4352_vm3, %v4363_v13, %v4365_v23  ;;  %v8279_v19 = vmul.u32.u64.low %v4367_v18, %v4362_v58  ;;  %v8280_v56 = vmul.u32.u64.high %v4367_v18, %v4362_v58, %v8279_v19  ;;  %v4374_v34 = vmul.u32 %v4367_v18, %v4358_v28 }
 0xb95   :  { %v8276_v48 = vmul.u32.u64.low %v4367_v18, %v4366_v0  ;;  %v8277_v37 = vmul.u32.u64.high %v4367_v18, %v4366_v0, %v8276_v48  ;;  %v5873_v31 = vmov 3  }
 0xb96   :  { %v4377_v44 = vadd.s32 1, %v8280_v56 }
 0xb97   :  { %vm4376_vm4 = vc.u32 %v8277_v37, %v8279_v19  ;;  %v4375_v54 = vadd.s32 %v8279_v19, %v8277_v37 }
 0xb98   :  { %v4378_v21 = vsel %vm4376_vm4, %v4377_v44, %v8280_v56 }
 0xb99   :  { %v4379_v46 = vadd.s32 %v4378_v21, %v4374_v34 }
 0xb9b   :  { %v4380_v15 = vadd.s32 536870912, %v4379_v46 }
 0xb9d   :  { %v4381_v47 = vshrl.u32 %v4380_v15, 30 }
 0xb9f   :  { %v4382_v49 = vshll.u32 %v4381_v47, 30  ;;  %v4405_v29 = vsub.s32 4, %v4381_v47 }
 0xba1   :  { %v4383_v57 = vsub.s32 %v4379_v46, %v4382_v49  ;;  %v4406_v25 = vsel %vm4321_vm6, %v4405_v29, %v4381_v47 }
 0xba2   :  { %v4408_v63 = vsel %vm4320_vm7, 0, %v4406_v25 }
 0xba3   :  { %v4385_v59 = vsub.s32 0, %v4383_v57  ;;  %v4412_v4 = vadd.s32 3, %v4408_v63 }
 0xba5   :  { %v4794_v32 = vmin.u32 %v4385_v59, %v4383_v57  ;;  %v4413_v7 = vand.u32 3, %v4412_v4 }
 0xba7   :  { %v4387_v35 = vclz %v4794_v32  ;;  %vm4418_vm8 = vcmp.eq.s32.totalorder %v4413_v7, 2  ;;  %vm4415_vm9 = vcmp.eq.s32.totalorder %v4413_v7, 0  ;;  %vm4414_vm10 = vcmp.lt.s32.totalorder %v4413_v7, 2 }
 0xba9   :  { %v4795_v5 = vadd.s32 4294967294, %v4387_v35 }
 0xbab   :  { %vm4796_vm5 = vcmp.lt.s32.totalorder %v4795_v5, 0 }
 0xbac   :  { %v4390_v39 = vsel %vm4796_vm5, 0, %v4795_v5 }
 0xbad   :  { %v4391_v6 = vsub.s32 32, %v4390_v39  ;;  %v4395_v45 = vsub.s32 4294967266, %v4390_v39  ;;  %v4392_v9 = vshll.u32 %v4383_v57, %v4390_v39 }
 0xbaf   :  { %v4393_v52 = vshrl.u32 %v4375_v54, %v4391_v6  ;;  %v4396_v10 = vadd.s32 127, %v4395_v45 }
 0xbb1   :  { %v4394_v38 = vor.u32 %v4393_v52, %v4392_v9  ;;  %v4397_v1 = vshll.u32 %v4396_v10, 23  ;;  %v4797_v52 = vld [vmem:[#allocation12] ss:$0 sm:$0xff] }
 0xbb3   :  { %v4398_v2 = vor.u32 4788187, %v4397_v1  ;;  %v4401_v24 = vcvt.s32.f32 %v4394_v38 }
 0xbb5   :  { %v4399_v22 = vand.u32 2147483647, %v4398_v2 }
 0xbb7   :  { %v4402_v27 = vmul.f32 %v4401_v24, %v4399_v22 }
 0xbb9   :  { %v4403_v33 = vxor.u32 2147483648, %v4402_v27 }
 0xbbb   :  { %v4404_v36 = vsel %vm4321_vm6, %v4403_v33, %v4402_v27 }
 0xbbc   :  { %v4407_v41 = vsel %vm4320_vm7, %v8270_v42, %v4404_v36  ;;  %v4509_v42 = vld [vmem:[%s8331_s14 + $0x8] sm:$0xff] }
 0xbbd   :  { %5695 = vcosq.f32 %v4407_v41  ;;  %5590 = vmatpush3.msra.mxu1 %v4509_v42 }
 0xbbe   :  { %5697 = vsinq.f32 %v4407_v41  ;;  %5591 = vmatprep.subr.mxu1 %v8483_v62 }
 0xbbf   :  { %5592 = vmatpush3.msra.mxu1 %v4508_v40 }
 0xbca   :  { %v5696_v20 = vpop.eup %5695 }
 0xbcb   :  { %v5698_v8 = vpop.eup %5697  ;;  %v4419_v11 = vxor.u32 2147483648, %v5696_v20 }
 0xbcc   :  { %v4416_v30 = vxor.u32 2147483648, %v5698_v8 }
 0xbcd   :  { %v4420_v60 = vsel %vm4418_vm8, %v4419_v11, %v5698_v8 }
 0xbce   :  { %v4417_v61 = vsel %vm4415_vm9, %v5696_v20, %v4416_v30 }
 0xbcf   :  { %v4421_v3 = vsel %vm4414_vm10, %v4417_v61, %v4420_v60 }
 0xbd0   :  { %v4422_v12 = vsel %vm4411_vm11, nan, %v4421_v3 }
 0xbd1   :  { %v4423_v13 = vmul.f32 %v4422_v12, %v4422_v12 }
 0xbd3   :  { %4449 = vperm.xlu1 %5623, %v4423_v13   ;;  %4428 = vperm.xlu0 %5622, %v4423_v13   ;;  %v4424_v14 = vsub.f32 1.0, %v4423_v13 }
 0xbd7   :  { %5624 = vset.pattern.permute.xlu0 %v5872_v16  ;;  %4458 = vperm.xlu1 %5623, %v4424_v14  }
 0xbd8   :  { %4469 = vperm.xlu0 %5624, %v4423_v13  }
 0xbdb   :  { %5626 = vset.pattern.permute.xlu1 %v5872_v16 }
 0xbdc   :  { %5625 = vset.pattern.permute.xlu0 %v5865_v51  ;;  %4478 = vperm.xlu1 %5626, %v4424_v14   ;;  %v4425_v51 = vld [vmem:[%s8330_s13] sm:$0xf]  ;;  %s5874_s13 = smov [#allocation14]  }
 0xbdd   :  { %4439 = vperm.xlu0 %5625, %v4424_v14   ;;  %v4436_v17 = vsub.f32 1.0, %v4425_v51  ;;  %v4455_v48 = vrot.slane %v4425_v51, %v7988_v43  ;;  %v4434_v37 = vrot.slane %v4425_v51, %v7978_v53  ;;  %v4475_v28 = vrot.slane %v4425_v51, %v8008_v26  ;;  %s4609_s14 = sshll.u32 %s5874_s13, 4  ;;  %s4610_s14 = int_to_ptr.vmem [resolvable:$true] %s4609_s14 }
 0xbde   :  { %v4495_v21 = vrot.slane %v4425_v51, %v8005_v55  ;;  %s5823_s20 = scalar_lea.vmem %s4610_s14, 32  ;;  %p5828_p3 = scmp.lt.s32.totalorder %s4610_s14, %s4610_s14 }
 0xbdf   :  { %v4464_v58 = vrot.slane %v4436_v17, %v7988_v43  ;;  %v4484_v19 = vrot.slane %v4436_v17, %v8008_v26  ;;  %v4445_v62 = vrot.slane %v4436_v17, %v7978_v53  ;;  %v4504_v57 = vrot.slane %v4436_v17, %v8005_v55  ;;  %p5824_p2 = scmp.ne.s32.totalorder %s4610_s14, %s5823_s20  ;;  %p5829_p4 = scmp.lt.s32.totalorder %s5823_s20, %s5823_s20 }
 0xbe0   :  { %5627 = vset.pattern.permute.xlu1 %v5873_v31 }
 0xbe1   :  { %4489 = vperm.xlu1 %5627, %v4423_v13   ;;  %5628 = vset.pattern.permute.xlu0 %v5873_v31  ;;  %p5830_p5 = por %p5829_p4, %p5828_p3 }
 0xbe2   :  { %4498 = vperm.xlu0 %5628, %v4424_v14  }
 0xbe3   :  { %p5831_p6 = pnand %p5830_p5, %p5824_p2 }
 0xc4e   :  { %v4450_v23 = vpop.permute.xlu1 %4449  ;;  %v4429_v18 = vpop.permute.xlu0 %4428 }
 0xc4f   :  { %v4456_v46 = vmul.f32 %v4455_v48, %v4450_v23  ;;  %v4435_v15 = vmul.f32 %v4434_v37, %v4429_v18 }
 0xc52   :  { %v4459_v50 = vpop.permute.xlu1 %4458 }
 0xc53   :  { %v4470_v0 = vpop.permute.xlu0 %4469  ;;  %v4465_v56 = vmul.f32 %v4464_v58, %v4459_v50 }
 0xc54   :  { %v4476_v59 = vmul.f32 %v4475_v28, %v4470_v0 }
 0xc55   :  { %v4466_v43 = vadd.f32 %v4465_v56, %v4456_v46 }
 0xc57   :  { %v4479_v44 = vpop.permute.xlu1 %4478 }
 0xc58   :  { %v4440_v34 = vpop.permute.xlu0 %4439  ;;  %v4485_v47 = vmul.f32 %v4484_v19, %v4479_v44 }
 0xc59   :  { %v4446_v49 = vmul.f32 %v4445_v62, %v4440_v34 }
 0xc5a   :  { %v4486_v5 = vadd.f32 %v4485_v47, %v4476_v59 }
 0xc5b   :  { %v4447_v32 = vadd.f32 %v4446_v49, %v4435_v15 }
 0xc5c   :  { %v4490_v35 = vpop.permute.xlu1 %4489 }
 0xc5d   :  { %v4467_v39 = vmul.f32 %v4466_v43, %v4447_v32  ;;  %v4496_v53 = vmul.f32 %v4495_v21, %v4490_v35  ;;  %v4499_v54 = vpop.permute.xlu0 %4498 }
 0xc5e   :  { %v4505_v6 = vmul.f32 %v4504_v57, %v4499_v54 }
 0xc5f   :  { %v4487_v26 = vmul.f32 %v4486_v5, %v4467_v39 }
 0xc60   :  { %v4506_v45 = vadd.f32 %v4505_v6, %v4496_v53 }
 0xc62   :  { %v4507_v9 = vmul.f32 %v4506_v45, %v4487_v26 }
 0xc64   :  { %5594 = vmatmul.mubr.msk.f32.vlgmr.msra.gmra.mxu1 %vm1514_vm13, %v4507_v9 }
 0xd24   :  { %v4586_v10 = vpop.f32.mrf.mxu1 }
 0xd25   :  { %v4587_v38 = vadd.f32 %v4797_v52, %v4586_v10 }
 0xd26   :  { %v5595_v1 = vpop.f32.mrf.mxu1 }
 0xd27   :  { %v4591_v55 = vsel %vm4590_vm12, %v4587_v38, -inf }
 0xd28   :  { %4592 = vmax.xlane.f32.xlu1 %v4591_v55 }
 0xdb1   :  { %v4593_v2 = vpop.xlane.xlu1 %4592 }
 0xdb2   :  { %v4594_v22 = vsub.f32 %v4587_v38, %v4593_v2 }
 0xdb4   :  { %v4595_v24 = vmul.f32 1.442695, %v4594_v22 }
 0xdb6   :  { %5699 = vpow2.f32 %v4595_v24 }
 0xdc3   :  { %v5700_v27 = vpop.eup %5699 }
 0xdc4   :  { %v4597_v33 = vsel %vm4590_vm12, %v5700_v27, 0.0 }
 0xdc5   :  { %4598 = vadd.xlane.f32.xlu0 %v4597_v33 }
 0xe4e   :  { %v4599_v29 = vpop.xlane.xlu0 %4598 }
 0xe4f   :  { %5701 = vrcp.f32 %v4599_v29 }
 0xe5c   :  { %v5702_v36 = vpop.eup %5701 }
 0xe5d   :  { %v4601_v41 = vmul.f32 %v5702_v36, %v5700_v27 }
 0xe5f   :  { %4602 = vst.msk [vmem:[#allocation14] sm:$0x3] %vm4590_vm12, %v4601_v41 }
 0xe60   :  { %5834 = shalt.err (!%p5831_p6)
}
 0xe61   :  { %4612 = dma.vmem_to_hbm [thread:$0]  %s4610_s14, 32, %s8333_s16, [#allocation5]  }
 0xe62   :  { %5851 = dma.done.wait [#allocation5], 32  }
 0xe63   :  { %5852 = vsyncadd [#allocation5], 4294967264 }
 0xe64   :  { %4616 = vsyncpa [#allocation4], 1 }
 0xe65   :  { %4617 = vsyncpa [#allocation7], 1 }
 0xe66   :  { %4618 = vsyncpa [#allocation10], 1 }
 0xe67   :  { %4619 = vsyncpa [#allocation13], 1 }
 0xe68   :  { %4620 = vsyncpa [#allocation5], 1 }

</bundles_post_ra>
